<compile_context>
chip_gen: v7x
topology: tpu7x:2x2x1
jax: 0.10.0
libtpu: 0.0.40
codegen_flags: <defaults>
</compile_context>

<pallas_src>
import functools
import math

import jax
import jax.numpy as jnp
from jax.experimental import pallas as pl
from jax.experimental.pallas import tpu as pltpu

MATMUL_DTYPE = jnp.bfloat16   # MXU-native operand dtype; accumulation is f32
LN_EPS = 1e-5                 # torch.nn.LayerNorm default


# --------------------------------------------------------------------------- #
# Kernels
# --------------------------------------------------------------------------- #
def _layernorm(x, gamma, beta):
    mu = jnp.mean(x, axis=-1, keepdims=True)
    xc = x - mu
    var = jnp.mean(xc * xc, axis=-1, keepdims=True)
    return xc * jax.lax.rsqrt(var + LN_EPS) * gamma + beta


def _attention_kernel(v_ref, k_ref, q_ref, mask_ref,
                      wv_ref, wk_ref, wq_ref, wo_ref, bo_ref,
                      o_ref, *, heads, head_dim, scale):
    """Fused multi-head SelfAttention + fc_out for one batch element.

    v/k/q refs: (len, E) f32 (heads packed along lanes).
    mask_ref:   (q_len, k_len) f32, shared across heads.
    wv/wk/wq:   (E, E) bf16 block-diagonal = kron(I_heads, W.T).
    wo:         (E, E) bf16 = fc_out.weight.T,  bo: (1, E) f32.
    """
    # All-head projections as single lane-dense matmuls (bf16 in, f32 acc).
    v = jnp.dot(v_ref[...].astype(MATMUL_DTYPE), wv_ref[...],
                preferred_element_type=jnp.float32)
    k = jnp.dot(k_ref[...].astype(MATMUL_DTYPE), wk_ref[...],
                preferred_element_type=jnp.float32)
    q = jnp.dot(q_ref[...].astype(MATMUL_DTYPE), wq_ref[...],
                preferred_element_type=jnp.float32)

    mask0 = mask_ref[...] == 0
    q_len, embed = q_ref.shape
    acc = jnp.zeros((q_len, embed), jnp.float32)

    # heads is small; this Python loop fully unrolls at trace time.
    for h in range(heads):
        lo = h * head_dim
        hi = lo + head_dim
        qh = q[:, lo:hi].astype(MATMUL_DTYPE)
        kh = k[:, lo:hi].astype(MATMUL_DTYPE)
        vh = v[:, lo:hi].astype(MATMUL_DTYPE)

        # energy[q, k] = <q_q, k_k>  (contract last dims; no explicit k.T)
        energy = jax.lax.dot_general(qh, kh, (((1,), (1,)), ((), ())),
                                     preferred_element_type=jnp.float32)
        energy = jnp.where(mask0, jnp.float32(-1e20), energy)
        scores = energy * jnp.float32(scale)

        m = jnp.max(scores, axis=-1, keepdims=True)
        p = jnp.exp(scores - m)
        attn = p * pl.reciprocal(jnp.sum(p, axis=-1, keepdims=True), approx=True)

        head_o = jnp.dot(attn.astype(MATMUL_DTYPE), vh,
                         preferred_element_type=jnp.float32)
        # fc_out folded in:  concat_h(head_o) @ Wo  ==  sum_h head_o_h @ Wo[rows h]
        acc = acc + jnp.dot(head_o.astype(MATMUL_DTYPE), wo_ref[lo:hi, :],
                            preferred_element_type=jnp.float32)

    o_ref[...] = acc + bo_ref[...]


def _block_ffn_kernel(attn_ref, x_ref,
                      g1_ref, b1_ref, w1_ref, bb1_ref,
                      w2_ref, bb2_ref, g2_ref, b2_ref, o_ref):
    """TransformerBlock tail: norm1(attn + x) -> FFN -> norm2(ffn + h)."""
    h = _layernorm(attn_ref[...] + x_ref[...], g1_ref[...], b1_ref[...])
    f = jnp.dot(h.astype(MATMUL_DTYPE), w1_ref[...],
                preferred_element_type=jnp.float32) + bb1_ref[...]
    f = jnp.maximum(f, 0.0)
    f = jnp.dot(f.astype(MATMUL_DTYPE), w2_ref[...],
                preferred_element_type=jnp.float32) + bb2_ref[...]
    o_ref[...] = _layernorm(f + h, g2_ref[...], b2_ref[...])


def _add_layernorm_kernel(a_ref, b_ref, g_ref, be_ref, o_ref):
    o_ref[...] = _layernorm(a_ref[...] + b_ref[...], g_ref[...], be_ref[...])


def _linear_kernel(x_ref, w_ref, b_ref, o_ref):
    o_ref[...] = jnp.dot(x_ref[...].astype(MATMUL_DTYPE), w_ref[...],
                         preferred_element_type=jnp.float32) + b_ref[...]


# --------------------------------------------------------------------------- #
# pallas_call wrappers
# --------------------------------------------------------------------------- #
def _bcast_spec(shape):
    # Whole-array block, identical for every grid step (weights / biases).
    return pl.BlockSpec(shape, lambda n: (0,) * len(shape))


def _row_spec(seq, feat):
    # One batch element per grid step, natural layout.
    return pl.BlockSpec((None, seq, feat), lambda n: (n, 0, 0))


_PARALLEL = pltpu.CompilerParams(dimension_semantics=("parallel",))


def attention(values, keys, query, mask_qk, ap, *, heads):
    N, q_len, E = query.shape
    v_len, k_len = values.shape[1], keys.shape[1]
    head_dim = E // heads
    kernel = functools.partial(_attention_kernel, heads=heads,
                               head_dim=head_dim, scale=1.0 / math.sqrt(E))
    return pl.pallas_call(
        kernel,
        out_shape=jax.ShapeDtypeStruct((N, q_len, E), jnp.float32),
        grid=(N,),
        in_specs=[
            _row_spec(v_len, E),
            _row_spec(k_len, E),
            _row_spec(q_len, E),
            _row_spec(q_len, k_len),
            _bcast_spec((E, E)), _bcast_spec((E, E)), _bcast_spec((E, E)),
            _bcast_spec((E, E)), _bcast_spec((1, E)),
        ],
        out_specs=_row_spec(q_len, E),
        compiler_params=_PARALLEL,
    )(values, keys, query, mask_qk,
      ap["wv"], ap["wk"], ap["wq"], ap["wo"], ap["bo"])


def transformer_block_tail(attn_out, x, bp):
    N, s, E = x.shape
    H = bp["w1"].shape[1]
    return pl.pallas_call(
        _block_ffn_kernel,
        out_shape=jax.ShapeDtypeStruct((N, s, E), jnp.float32),
        grid=(N,),
        in_specs=[
            _row_spec(s, E), _row_spec(s, E),
            _bcast_spec((1, E)), _bcast_spec((1, E)),
            _bcast_spec((E, H)), _bcast_spec((1, H)),
            _bcast_spec((H, E)), _bcast_spec((1, E)),
            _bcast_spec((1, E)), _bcast_spec((1, E)),
        ],
        out_specs=_row_spec(s, E),
        compiler_params=_PARALLEL,
    )(attn_out, x, bp["g1"], bp["b1"], bp["w1"], bp["bb1"],
      bp["w2"], bp["bb2"], bp["g2"], bp["b2"])


def add_layernorm(a, b, g, be):
    N, s, E = a.shape
    return pl.pallas_call(
        _add_layernorm_kernel,
        out_shape=jax.ShapeDtypeStruct((N, s, E), jnp.float32),
        grid=(N,),
        in_specs=[_row_spec(s, E), _row_spec(s, E),
                  _bcast_spec((1, E)), _bcast_spec((1, E))],
        out_specs=_row_spec(s, E),
        compiler_params=_PARALLEL,
    )(a, b, g, be)


def linear(x, w, b):
    N, s, E = x.shape
    V = w.shape[1]
    return pl.pallas_call(
        _linear_kernel,
        out_shape=jax.ShapeDtypeStruct((N, s, V), jnp.float32),
        grid=(N,),
        in_specs=[_row_spec(s, E), _bcast_spec((E, V)), _bcast_spec((1, V))],
        out_specs=_row_spec(s, V),
        compiler_params=_PARALLEL,
    )(x, w, b)


# --------------------------------------------------------------------------- #
# Full Transformer forward (Pallas kernels + thin JAX glue)
# --------------------------------------------------------------------------- #
def transformer_forward(src, trg, kp, *, heads, src_pad_idx):
    N, src_len = src.shape
    _, trg_len = trg.shape

    # Masks shared across heads: one (q_len, k_len) tile per batch element.
    src_keep = (src != src_pad_idx).astype(jnp.float32)                 # (N, S)
    enc_self_mask = jnp.broadcast_to(src_keep[:, None, :], (N, src_len, src_len))
    cross_mask = jnp.broadcast_to(src_keep[:, None, :], (N, trg_len, src_len))
    tril = jnp.tril(jnp.ones((trg_len, trg_len), jnp.float32))
    trg_mask = jnp.broadcast_to(tril[None], (N, trg_len, trg_len))

    # TODO(synk): embedding gathers (word/position) stay in plain XLA; a Pallas
    # gather kernel is not worthwhile at these sizes. Dropout(p=0) is identity.
    x = kp["enc"]["word_emb"][src] + kp["enc"]["pos_emb"][jnp.arange(src_len)][None]
    for lp in kp["enc"]["layers"]:
        a = attention(x, x, x, enc_self_mask, lp["attn"], heads=heads)
        x = transformer_block_tail(a, x, lp["ffn"])
    enc_out = x

    y = kp["dec"]["word_emb"][trg] + kp["dec"]["pos_emb"][jnp.arange(trg_len)][None]
    for lp in kp["dec"]["layers"]:
        a = attention(y, y, y, trg_mask, lp["self_attn"], heads=heads)
        q = add_layernorm(a, y, lp["norm_g"], lp["norm_b"])
        a2 = attention(enc_out, enc_out, q, cross_mask, lp["cross_attn"], heads=heads)
        y = transformer_block_tail(a2, q, lp["ffn"])

    return linear(y, kp["dec"]["fc_w"], kp["dec"]["fc_b"])


# --------------------------------------------------------------------------- #
# Parameters (PyTorch layout) and one-time kernel-friendly preparation
# --------------------------------------------------------------------------- #
def init_params(key, *, src_vocab, trg_vocab, embed, heads, num_layers,
                ff_hidden, max_length):
    head_dim = embed // heads
    keys = iter(jax.random.split(key, 256))

    def nrm(shape, scale=0.1):
        return scale * jax.random.normal(next(keys), shape, jnp.float32)

    def attn_p():
        return {"w_v": nrm((head_dim, head_dim)), "w_k": nrm((head_dim, head_dim)),
                "w_q": nrm((head_dim, head_dim)), "w_fc": nrm((embed, embed)),
                "b_fc": nrm((embed,))}

    def block_p():
        return {"attn": attn_p(),
                "g1": jnp.ones((embed,), jnp.float32), "b1": jnp.zeros((embed,), jnp.float32),
                "g2": jnp.ones((embed,), jnp.float32), "b2": jnp.zeros((embed,), jnp.float32),
                "w1": nrm((ff_hidden, embed)), "bb1": nrm((ff_hidden,)),
                "w2": nrm((embed, ff_hidden)), "bb2": nrm((embed,))}

    enc = {"word_emb": nrm((src_vocab, embed), 1.0),
           "pos_emb": nrm((max_length, embed), 1.0),
           "layers": [block_p() for _ in range(num_layers)]}
    dec = {"word_emb": nrm((trg_vocab, embed), 1.0),
           "pos_emb": nrm((max_length, embed), 1.0),
           "layers": [{"norm_g": jnp.ones((embed,), jnp.float32),
                       "norm_b": jnp.zeros((embed,), jnp.float32),
                       "self_attn": attn_p(),
                       "block": block_p()} for _ in range(num_layers)],
           "fc_w": nrm((trg_vocab, embed)), "fc_b": nrm((trg_vocab,))}
    return {"enc": enc, "dec": dec}


def prepare_kernel_params(p, *, heads):
    """One-time transform: block-diagonalize / transpose weights, cast to bf16."""
    eye = jnp.eye(heads, dtype=jnp.float32)

    def prep_attn(ap):
        return {"wv": jnp.kron(eye, ap["w_v"].T).astype(MATMUL_DTYPE),
                "wk": jnp.kron(eye, ap["w_k"].T).astype(MATMUL_DTYPE),
                "wq": jnp.kron(eye, ap["w_q"].T).astype(MATMUL_DTYPE),
                "wo": ap["w_fc"].T.astype(MATMUL_DTYPE),
                "bo": ap["b_fc"].reshape(1, -1)}

    def prep_ffn(bp):
        return {"g1": bp["g1"].reshape(1, -1), "b1": bp["b1"].reshape(1, -1),
                "w1": bp["w1"].T.astype(MATMUL_DTYPE), "bb1": bp["bb1"].reshape(1, -1),
                "w2": bp["w2"].T.astype(MATMUL_DTYPE), "bb2": bp["bb2"].reshape(1, -1),
                "g2": bp["g2"].reshape(1, -1), "b2": bp["b2"].reshape(1, -1)}

    enc = {"word_emb": p["enc"]["word_emb"], "pos_emb": p["enc"]["pos_emb"],
           "layers": [{"attn": prep_attn(lp["attn"]), "ffn": prep_ffn(lp)}
                      for lp in p["enc"]["layers"]]}
    dec = {"word_emb": p["dec"]["word_emb"], "pos_emb": p["dec"]["pos_emb"],
           "layers": [{"self_attn": prep_attn(lp["self_attn"]),
                       "norm_g": lp["norm_g"].reshape(1, -1),
                       "norm_b": lp["norm_b"].reshape(1, -1),
                       "cross_attn": prep_attn(lp["block"]["attn"]),
                       "ffn": prep_ffn(lp["block"])}
                      for lp in p["dec"]["layers"]],
           "fc_w": p["dec"]["fc_w"].T.astype(MATMUL_DTYPE),
           "fc_b": p["dec"]["fc_b"].reshape(1, -1)}
    return {"enc": enc, "dec": dec}


# --------------------------------------------------------------------------- #
# Pure-JAX f32 reference (mirrors the PyTorch module exactly)
# --------------------------------------------------------------------------- #
def _ref_layernorm(x, g, b):
    mu = x.mean(-1, keepdims=True)
    var = ((x - mu) ** 2).mean(-1, keepdims=True)
    return (x - mu) / jnp.sqrt(var + LN_EPS) * g + b


def _ref_self_attention(values, keys, query, mask, ap, *, embed, heads):
    N = query.shape[0]
    hd = embed // heads
    v = values.reshape(N, -1, heads, hd) @ ap["w_v"].T
    k = keys.reshape(N, -1, heads, hd) @ ap["w_k"].T
    q = query.reshape(N, -1, heads, hd) @ ap["w_q"].T
    energy = jnp.einsum("nqhd,nkhd->nhqk", q, k)
    energy = jnp.where(mask == 0, jnp.float32(-1e20), energy)
    attn = jax.nn.softmax(energy / (embed ** 0.5), axis=3)
    out = jnp.einsum("nhql,nlhd->nqhd", attn, v).reshape(N, -1, embed)
    return out @ ap["w_fc"].T + ap["b_fc"]


def _ref_transformer_block(value, key_, query, mask, bp, *, embed, heads):
    a = _ref_self_attention(value, key_, query, mask, bp["attn"], embed=embed, heads=heads)
    x = _ref_layernorm(a + query, bp["g1"], bp["b1"])
    f = jnp.maximum(x @ bp["w1"].T + bp["bb1"], 0.0) @ bp["w2"].T + bp["bb2"]
    return _ref_layernorm(f + x, bp["g2"], bp["b2"])


def _ref_transformer(src, trg, p, *, embed, heads, src_pad_idx):
    N, src_len = src.shape
    _, trg_len = trg.shape
    src_mask = (src != src_pad_idx)[:, None, None, :]
    trg_mask = jnp.broadcast_to(jnp.tril(jnp.ones((trg_len, trg_len), jnp.float32)),
                                (N, 1, trg_len, trg_len))

    x = p["enc"]["word_emb"][src] + p["enc"]["pos_emb"][jnp.arange(src_len)][None]
    for lp in p["enc"]["layers"]:
        x = _ref_transformer_block(x, x, x, src_mask, lp, embed=embed, heads=heads)
    enc_out = x

    y = p["dec"]["word_emb"][trg] + p["dec"]["pos_emb"][jnp.arange(trg_len)][None]
    for lp in p["dec"]["layers"]:
        a = _ref_self_attention(y, y, y, trg_mask, lp["self_attn"], embed=embed, heads=heads)
        q = _ref_layernorm(a + y, lp["norm_g"], lp["norm_b"])
        y = _ref_transformer_block(enc_out, enc_out, q, src_mask, lp["block"],
                                   embed=embed, heads=heads)
    return y @ p["dec"]["fc_w"].T + p["dec"]["fc_b"]


# --------------------------------------------------------------------------- #
# Main
# --------------------------------------------------------------------------- #
if __name__ == "__main__":
    EMBED, HEADS, LAYERS, FWD_EXP = 128, 4, 2, 4       # small config (spec default: 512/8/6/4)
    SRC_VOCAB, TRG_VOCAB, MAX_LEN = 128, 128, 32
    SRC_PAD = 0
    N, SRC_LEN, TRG_LEN = 2, 16, 8

    root = jax.random.PRNGKey(0)
    k_par, k_src, k_trg = jax.random.split(root, 3)

    params = init_params(k_par, src_vocab=SRC_VOCAB, trg_vocab=TRG_VOCAB,
                         embed=EMBED, heads=HEADS, num_layers=LAYERS,
                         ff_hidden=FWD_EXP * EMBED, max_length=MAX_LEN)

    src = jax.random.randint(k_src, (N, SRC_LEN), 1, SRC_VOCAB, dtype=jnp.int32)
    trg = jax.random.randint(k_trg, (N, TRG_LEN), 1, TRG_VOCAB, dtype=jnp.int32)
    src = src.at[0, -3:].set(SRC_PAD)    # some padding to exercise the src mask

    kparams = prepare_kernel_params(params, heads=HEADS)

    fwd = jax.jit(functools.partial(transformer_forward, heads=HEADS,
                                    src_pad_idx=SRC_PAD))
    out = jax.block_until_ready(fwd(src, trg, kparams))
    assert out.shape == (N, TRG_LEN, TRG_VOCAB)
    assert bool(jnp.all(jnp.isfinite(out)))

    with jax.default_matmul_precision("highest"):
        ref = _ref_transformer(src, trg, params, embed=EMBED, heads=HEADS,
                               src_pad_idx=SRC_PAD)

    # Kernels use bf16 MXU operands with f32 accumulation, so allow
    # bf16-level mismatch vs the full-f32 reference.
    max_err = float(jnp.max(jnp.abs(out - ref)))
    scale = float(jnp.max(jnp.abs(ref)))
    assert max_err <= 0.05 * scale + 1e-3, f"mismatch: max_err={max_err}, scale={scale}"

    print("KERNEL_OK")
</pallas_src>

<mosaic_0001>
module attributes {stable_mosaic.version = 11 : i64} {
  func.func @_block_ffn_kernel(%arg0: i32, %arg1: memref<1x16x128xf32, #tpu.memory_space<vmem>>, %arg2: memref<1x16x128xf32, #tpu.memory_space<vmem>>, %arg3: memref<1x128xf32, #tpu.memory_space<vmem>>, %arg4: memref<1x128xf32, #tpu.memory_space<vmem>>, %arg5: memref<128x512xbf16, #tpu.memory_space<vmem>>, %arg6: memref<1x512xf32, #tpu.memory_space<vmem>>, %arg7: memref<512x128xbf16, #tpu.memory_space<vmem>>, %arg8: memref<1x128xf32, #tpu.memory_space<vmem>>, %arg9: memref<1x128xf32, #tpu.memory_space<vmem>>, %arg10: memref<1x128xf32, #tpu.memory_space<vmem>>, %arg11: memref<1x16x128xf32, #tpu.memory_space<vmem>>) attributes {dimension_semantics = [#tpu.dimension_semantics<parallel>], iteration_bounds = array<i64: 2>, scalar_prefetch = 0 : i64, scratch_operands = 0 : i64, tpu.core_type = #tpu.core_type<tc>, window_params = [{transform_indices = @transform_0, window_bounds = array<i64: 1, 16, 128>}, {transform_indices = @transform_1, window_bounds = array<i64: 1, 16, 128>}, {pipeline_mode = #tpu.pipeline_mode<synchronous>, transform_indices = @transform_2, window_bounds = array<i64: 1, 128>}, {pipeline_mode = #tpu.pipeline_mode<synchronous>, transform_indices = @transform_3, window_bounds = array<i64: 1, 128>}, {pipeline_mode = #tpu.pipeline_mode<synchronous>, transform_indices = @transform_4, window_bounds = array<i64: 128, 512>}, {pipeline_mode = #tpu.pipeline_mode<synchronous>, transform_indices = @transform_5, window_bounds = array<i64: 1, 512>}, {pipeline_mode = #tpu.pipeline_mode<synchronous>, transform_indices = @transform_6, window_bounds = array<i64: 512, 128>}, {pipeline_mode = #tpu.pipeline_mode<synchronous>, transform_indices = @transform_7, window_bounds = array<i64: 1, 128>}, {pipeline_mode = #tpu.pipeline_mode<synchronous>, transform_indices = @transform_8, window_bounds = array<i64: 1, 128>}, {pipeline_mode = #tpu.pipeline_mode<synchronous>, transform_indices = @transform_9, window_bounds = array<i64: 1, 128>}, {transform_indices = @transform_10, window_bounds = array<i64: 1, 16, 128>}]} {
    %c0 = arith.constant 0 : index
    %c0_0 = arith.constant 0 : index
    %c0_1 = arith.constant 0 : index
    %0 = vector.load %arg1[%c0, %c0_0, %c0_1] : memref<1x16x128xf32, #tpu.memory_space<vmem>>, vector<1x16x128xf32>
    %1 = vector.shape_cast %0 : vector<1x16x128xf32> to vector<16x128xf32>
    %c0_2 = arith.constant 0 : index
    %c0_3 = arith.constant 0 : index
    %c0_4 = arith.constant 0 : index
    %2 = vector.load %arg2[%c0_2, %c0_3, %c0_4] : memref<1x16x128xf32, #tpu.memory_space<vmem>>, vector<1x16x128xf32>
    %3 = vector.shape_cast %2 : vector<1x16x128xf32> to vector<16x128xf32>
    %4 = arith.addf %1, %3 : vector<16x128xf32>
    %c0_5 = arith.constant 0 : index
    %c0_6 = arith.constant 0 : index
    %5 = vector.load %arg3[%c0_5, %c0_6] : memref<1x128xf32, #tpu.memory_space<vmem>>, vector<1x128xf32>
    %c0_7 = arith.constant 0 : index
    %c0_8 = arith.constant 0 : index
    %6 = vector.load %arg4[%c0_7, %c0_8] : memref<1x128xf32, #tpu.memory_space<vmem>>, vector<1x128xf32>
    %cst = arith.constant dense<0.000000e+00> : vector<16xf32>
    %7 = vector.multi_reduction <add>, %4, %cst [1] : vector<16x128xf32> to vector<16xf32>
    %8 = vector.shape_cast %7 : vector<16xf32> to vector<16x1xf32>
    %cst_9 = arith.constant 1.280000e+02 : f32
    %9 = vector.broadcast %cst_9 : f32 to vector<16x1xf32>
    %10 = arith.divf %8, %9 : vector<16x1xf32>
    %11 = vector.broadcast %10 : vector<16x1xf32> to vector<16x128xf32>
    %12 = arith.subf %4, %11 : vector<16x128xf32>
    %13 = arith.mulf %12, %12 : vector<16x128xf32>
    %cst_10 = arith.constant dense<0.000000e+00> : vector<16xf32>
    %14 = vector.multi_reduction <add>, %13, %cst_10 [1] : vector<16x128xf32> to vector<16xf32>
    %15 = vector.shape_cast %14 : vector<16xf32> to vector<16x1xf32>
    %cst_11 = arith.constant 1.280000e+02 : f32
    %16 = vector.broadcast %cst_11 : f32 to vector<16x1xf32>
    %17 = arith.divf %15, %16 : vector<16x1xf32>
    %cst_12 = arith.constant 9.99999974E-6 : f32
    %18 = vector.broadcast %cst_12 : f32 to vector<16x1xf32>
    %19 = arith.addf %17, %18 : vector<16x1xf32>
    %20 = math.rsqrt %19 : vector<16x1xf32>
    %21 = vector.broadcast %20 : vector<16x1xf32> to vector<16x128xf32>
    %22 = arith.mulf %12, %21 : vector<16x128xf32>
    %23 = vector.broadcast %5 : vector<1x128xf32> to vector<16x128xf32>
    %24 = arith.mulf %22, %23 : vector<16x128xf32>
    %25 = vector.broadcast %6 : vector<1x128xf32> to vector<16x128xf32>
    %26 = arith.addf %24, %25 : vector<16x128xf32>
    %27 = arith.truncf %26 : vector<16x128xf32> to vector<16x128xbf16>
    %c0_13 = arith.constant 0 : index
    %c0_14 = arith.constant 0 : index
    %28 = vector.load %arg5[%c0_13, %c0_14] : memref<128x512xbf16, #tpu.memory_space<vmem>>, vector<128x512xbf16>
    %cst_15 = arith.constant dense<0.000000e+00> : vector<16x512xf32>
    %29 = tpu.matmul %27, %28, %cst_15 {dimension_numbers = #tpu.dot_dimension_numbers<[1], [0], [0], [1], [0, 0, 1, 1], [], []>} : vector<16x128xbf16>, vector<128x512xbf16>, vector<16x512xf32> -> vector<16x512xf32>
    %c0_16 = arith.constant 0 : index
    %c0_17 = arith.constant 0 : index
    %30 = vector.load %arg6[%c0_16, %c0_17] : memref<1x512xf32, #tpu.memory_space<vmem>>, vector<1x512xf32>
    %31 = vector.broadcast %30 : vector<1x512xf32> to vector<16x512xf32>
    %32 = arith.addf %29, %31 : vector<16x512xf32>
    %cst_18 = arith.constant 0.000000e+00 : f32
    %33 = vector.broadcast %cst_18 : f32 to vector<16x512xf32>
    %34 = arith.maximumf %32, %33 : vector<16x512xf32>
    %35 = arith.truncf %34 : vector<16x512xf32> to vector<16x512xbf16>
    %c0_19 = arith.constant 0 : index
    %c0_20 = arith.constant 0 : index
    %36 = vector.load %arg7[%c0_19, %c0_20] : memref<512x128xbf16, #tpu.memory_space<vmem>>, vector<512x128xbf16>
    %cst_21 = arith.constant dense<0.000000e+00> : vector<16x128xf32>
    %37 = tpu.matmul %35, %36, %cst_21 {dimension_numbers = #tpu.dot_dimension_numbers<[1], [0], [0], [1], [0, 0, 1, 1], [], []>} : vector<16x512xbf16>, vector<512x128xbf16>, vector<16x128xf32> -> vector<16x128xf32>
    %c0_22 = arith.constant 0 : index
    %c0_23 = arith.constant 0 : index
    %38 = vector.load %arg8[%c0_22, %c0_23] : memref<1x128xf32, #tpu.memory_space<vmem>>, vector<1x128xf32>
    %39 = vector.broadcast %38 : vector<1x128xf32> to vector<16x128xf32>
    %40 = arith.addf %37, %39 : vector<16x128xf32>
    %41 = arith.addf %40, %26 : vector<16x128xf32>
    %c0_24 = arith.constant 0 : index
    %c0_25 = arith.constant 0 : index
    %42 = vector.load %arg9[%c0_24, %c0_25] : memref<1x128xf32, #tpu.memory_space<vmem>>, vector<1x128xf32>
    %c0_26 = arith.constant 0 : index
    %c0_27 = arith.constant 0 : index
    %43 = vector.load %arg10[%c0_26, %c0_27] : memref<1x128xf32, #tpu.memory_space<vmem>>, vector<1x128xf32>
    %cst_28 = arith.constant dense<0.000000e+00> : vector<16xf32>
    %44 = vector.multi_reduction <add>, %41, %cst_28 [1] : vector<16x128xf32> to vector<16xf32>
    %45 = vector.shape_cast %44 : vector<16xf32> to vector<16x1xf32>
    %cst_29 = arith.constant 1.280000e+02 : f32
    %46 = vector.broadcast %cst_29 : f32 to vector<16x1xf32>
    %47 = arith.divf %45, %46 : vector<16x1xf32>
    %48 = vector.broadcast %47 : vector<16x1xf32> to vector<16x128xf32>
    %49 = arith.subf %41, %48 : vector<16x128xf32>
    %50 = arith.mulf %49, %49 : vector<16x128xf32>
    %cst_30 = arith.constant dense<0.000000e+00> : vector<16xf32>
    %51 = vector.multi_reduction <add>, %50, %cst_30 [1] : vector<16x128xf32> to vector<16xf32>
    %52 = vector.shape_cast %51 : vector<16xf32> to vector<16x1xf32>
    %cst_31 = arith.constant 1.280000e+02 : f32
    %53 = vector.broadcast %cst_31 : f32 to vector<16x1xf32>
    %54 = arith.divf %52, %53 : vector<16x1xf32>
    %cst_32 = arith.constant 9.99999974E-6 : f32
    %55 = vector.broadcast %cst_32 : f32 to vector<16x1xf32>
    %56 = arith.addf %54, %55 : vector<16x1xf32>
    %57 = math.rsqrt %56 : vector<16x1xf32>
    %58 = vector.broadcast %57 : vector<16x1xf32> to vector<16x128xf32>
    %59 = arith.mulf %49, %58 : vector<16x128xf32>
    %60 = vector.broadcast %42 : vector<1x128xf32> to vector<16x128xf32>
    %61 = arith.mulf %59, %60 : vector<16x128xf32>
    %62 = vector.broadcast %43 : vector<1x128xf32> to vector<16x128xf32>
    %63 = arith.addf %61, %62 : vector<16x128xf32>
    %c0_33 = arith.constant 0 : index
    %c0_34 = arith.constant 0 : index
    %c0_35 = arith.constant 0 : index
    %64 = vector.load %arg11[%c0_33, %c0_34, %c0_35] : memref<1x16x128xf32, #tpu.memory_space<vmem>>, vector<1x16x128xf32>
    %65 = vector.shape_cast %64 : vector<1x16x128xf32> to vector<16x128xf32>
    %66 = vector.shape_cast %63 : vector<16x128xf32> to vector<1x16x128xf32>
    tpu.vector_store %arg11[%c0_33, %c0_34, %c0_35], %66 {strides = array<i32>} : memref<1x16x128xf32, #tpu.memory_space<vmem>>, vector<1x16x128xf32>,
    return
  }
  func.func @transform_0(%arg0: i32) -> (i32, i32, i32) {
    %c0_i32 = arith.constant 0 : i32
    %c0_i32_0 = arith.constant 0 : i32
    %c0_i32_1 = arith.constant 0 : i32
    return %arg0, %c0_i32, %c0_i32_0 : i32, i32, i32
  }
  func.func @transform_1(%arg0: i32) -> (i32, i32, i32) {
    %c0_i32 = arith.constant 0 : i32
    %c0_i32_0 = arith.constant 0 : i32
    %c0_i32_1 = arith.constant 0 : i32
    return %arg0, %c0_i32, %c0_i32_0 : i32, i32, i32
  }
  func.func @transform_2(%arg0: i32) -> (i32, i32) {
    %c0_i32 = arith.constant 0 : i32
    %c0_i32_0 = arith.constant 0 : i32
    %c0_i32_1 = arith.constant 0 : i32
    return %c0_i32, %c0_i32_0 : i32, i32
  }
  func.func @transform_3(%arg0: i32) -> (i32, i32) {
    %c0_i32 = arith.constant 0 : i32
    %c0_i32_0 = arith.constant 0 : i32
    %c0_i32_1 = arith.constant 0 : i32
    return %c0_i32, %c0_i32_0 : i32, i32
  }
  func.func @transform_4(%arg0: i32) -> (i32, i32) {
    %c0_i32 = arith.constant 0 : i32
    %c0_i32_0 = arith.constant 0 : i32
    %c0_i32_1 = arith.constant 0 : i32
    return %c0_i32, %c0_i32_0 : i32, i32
  }
  func.func @transform_5(%arg0: i32) -> (i32, i32) {
    %c0_i32 = arith.constant 0 : i32
    %c0_i32_0 = arith.constant 0 : i32
    %c0_i32_1 = arith.constant 0 : i32
    return %c0_i32, %c0_i32_0 : i32, i32
  }
  func.func @transform_6(%arg0: i32) -> (i32, i32) {
    %c0_i32 = arith.constant 0 : i32
    %c0_i32_0 = arith.constant 0 : i32
    %c0_i32_1 = arith.constant 0 : i32
    return %c0_i32, %c0_i32_0 : i32, i32
  }
  func.func @transform_7(%arg0: i32) -> (i32, i32) {
    %c0_i32 = arith.constant 0 : i32
    %c0_i32_0 = arith.constant 0 : i32
    %c0_i32_1 = arith.constant 0 : i32
    return %c0_i32, %c0_i32_0 : i32, i32
  }
  func.func @transform_8(%arg0: i32) -> (i32, i32) {
    %c0_i32 = arith.constant 0 : i32
    %c0_i32_0 = arith.constant 0 : i32
    %c0_i32_1 = arith.constant 0 : i32
    return %c0_i32, %c0_i32_0 : i32, i32
  }
  func.func @transform_9(%arg0: i32) -> (i32, i32) {
    %c0_i32 = arith.constant 0 : i32
    %c0_i32_0 = arith.constant 0 : i32
    %c0_i32_1 = arith.constant 0 : i32
    return %c0_i32, %c0_i32_0 : i32, i32
  }
  func.func @transform_10(%arg0: i32) -> (i32, i32, i32) {
    %c0_i32 = arith.constant 0 : i32
    %c0_i32_0 = arith.constant 0 : i32
    %c0_i32_1 = arith.constant 0 : i32
    return %arg0, %c0_i32, %c0_i32_0 : i32, i32, i32
  }
}

module attributes {stable_mosaic.version = 11 : i64} {
  func.func @_attention_kernel(%arg0: i32, %arg1: memref<1x16x128xf32, #tpu.memory_space<vmem>>, %arg2: memref<1x16x128xf32, #tpu.memory_space<vmem>>, %arg3: memref<1x16x128xf32, #tpu.memory_space<vmem>>, %arg4: memref<1x16x16xf32, #tpu.memory_space<vmem>>, %arg5: memref<128x128xbf16, #tpu.memory_space<vmem>>, %arg6: memref<128x128xbf16, #tpu.memory_space<vmem>>, %arg7: memref<128x128xbf16, #tpu.memory_space<vmem>>, %arg8: memref<128x128xbf16, #tpu.memory_space<vmem>>, %arg9: memref<1x128xf32, #tpu.memory_space<vmem>>, %arg10: memref<1x16x128xf32, #tpu.memory_space<vmem>>) attributes {dimension_semantics = [#tpu.dimension_semantics<parallel>], iteration_bounds = array<i64: 2>, scalar_prefetch = 0 : i64, scratch_operands = 0 : i64, tpu.core_type = #tpu.core_type<tc>, window_params = [{transform_indices = @transform_0, window_bounds = array<i64: 1, 16, 128>}, {transform_indices = @transform_1, window_bounds = array<i64: 1, 16, 128>}, {transform_indices = @transform_2, window_bounds = array<i64: 1, 16, 128>}, {transform_indices = @transform_3, window_bounds = array<i64: 1, 16, 16>}, {pipeline_mode = #tpu.pipeline_mode<synchronous>, transform_indices = @transform_4, window_bounds = array<i64: 128, 128>}, {pipeline_mode = #tpu.pipeline_mode<synchronous>, transform_indices = @transform_5, window_bounds = array<i64: 128, 128>}, {pipeline_mode = #tpu.pipeline_mode<synchronous>, transform_indices = @transform_6, window_bounds = array<i64: 128, 128>}, {pipeline_mode = #tpu.pipeline_mode<synchronous>, transform_indices = @transform_7, window_bounds = array<i64: 128, 128>}, {pipeline_mode = #tpu.pipeline_mode<synchronous>, transform_indices = @transform_8, window_bounds = array<i64: 1, 128>}, {transform_indices = @transform_9, window_bounds = array<i64: 1, 16, 128>}]} {
    %c0 = arith.constant 0 : index
    %c0_0 = arith.constant 0 : index
    %c0_1 = arith.constant 0 : index
    %0 = vector.load %arg1[%c0, %c0_0, %c0_1] : memref<1x16x128xf32, #tpu.memory_space<vmem>>, vector<1x16x128xf32>
    %1 = vector.shape_cast %0 : vector<1x16x128xf32> to vector<16x128xf32>
    %2 = arith.truncf %1 : vector<16x128xf32> to vector<16x128xbf16>
    %c0_2 = arith.constant 0 : index
    %c0_3 = arith.constant 0 : index
    %3 = vector.load %arg5[%c0_2, %c0_3] : memref<128x128xbf16, #tpu.memory_space<vmem>>, vector<128x128xbf16>
    %cst = arith.constant dense<0.000000e+00> : vector<16x128xf32>
    %4 = tpu.matmul %2, %3, %cst {dimension_numbers = #tpu.dot_dimension_numbers<[1], [0], [0], [1], [0, 0, 1, 1], [], []>} : vector<16x128xbf16>, vector<128x128xbf16>, vector<16x128xf32> -> vector<16x128xf32>
    %c0_4 = arith.constant 0 : index
    %c0_5 = arith.constant 0 : index
    %c0_6 = arith.constant 0 : index
    %5 = vector.load %arg2[%c0_4, %c0_5, %c0_6] : memref<1x16x128xf32, #tpu.memory_space<vmem>>, vector<1x16x128xf32>
    %6 = vector.shape_cast %5 : vector<1x16x128xf32> to vector<16x128xf32>
    %7 = arith.truncf %6 : vector<16x128xf32> to vector<16x128xbf16>
    %c0_7 = arith.constant 0 : index
    %c0_8 = arith.constant 0 : index
    %8 = vector.load %arg6[%c0_7, %c0_8] : memref<128x128xbf16, #tpu.memory_space<vmem>>, vector<128x128xbf16>
    %cst_9 = arith.constant dense<0.000000e+00> : vector<16x128xf32>
    %9 = tpu.matmul %7, %8, %cst_9 {dimension_numbers = #tpu.dot_dimension_numbers<[1], [0], [0], [1], [0, 0, 1, 1], [], []>} : vector<16x128xbf16>, vector<128x128xbf16>, vector<16x128xf32> -> vector<16x128xf32>
    %c0_10 = arith.constant 0 : index
    %c0_11 = arith.constant 0 : index
    %c0_12 = arith.constant 0 : index
    %10 = vector.load %arg3[%c0_10, %c0_11, %c0_12] : memref<1x16x128xf32, #tpu.memory_space<vmem>>, vector<1x16x128xf32>
    %11 = vector.shape_cast %10 : vector<1x16x128xf32> to vector<16x128xf32>
    %12 = arith.truncf %11 : vector<16x128xf32> to vector<16x128xbf16>
    %c0_13 = arith.constant 0 : index
    %c0_14 = arith.constant 0 : index
    %13 = vector.load %arg7[%c0_13, %c0_14] : memref<128x128xbf16, #tpu.memory_space<vmem>>, vector<128x128xbf16>
    %cst_15 = arith.constant dense<0.000000e+00> : vector<16x128xf32>
    %14 = tpu.matmul %12, %13, %cst_15 {dimension_numbers = #tpu.dot_dimension_numbers<[1], [0], [0], [1], [0, 0, 1, 1], [], []>} : vector<16x128xbf16>, vector<128x128xbf16>, vector<16x128xf32> -> vector<16x128xf32>
    %c0_16 = arith.constant 0 : index
    %c0_17 = arith.constant 0 : index
    %c0_18 = arith.constant 0 : index
    %15 = vector.load %arg4[%c0_16, %c0_17, %c0_18] : memref<1x16x16xf32, #tpu.memory_space<vmem>>, vector<1x16x16xf32>
    %16 = vector.shape_cast %15 : vector<1x16x16xf32> to vector<16x16xf32>
    %cst_19 = arith.constant 0.000000e+00 : f32
    %17 = vector.broadcast %cst_19 : f32 to vector<16x16xf32>
    %18 = arith.cmpf oeq, %16, %17 : vector<16x16xf32>
    %cst_20 = arith.constant 0.000000e+00 : f32
    %19 = vector.broadcast %cst_20 : f32 to vector<16x128xf32>
    %20 = vector.extract_strided_slice %14 {offsets = [0, 0], sizes = [16, 32], strides = [1, 1]} : vector<16x128xf32> to vector<16x32xf32>
    %21 = arith.truncf %20 : vector<16x32xf32> to vector<16x32xbf16>
    %22 = vector.extract_strided_slice %9 {offsets = [0, 0], sizes = [16, 32], strides = [1, 1]} : vector<16x128xf32> to vector<16x32xf32>
    %23 = arith.truncf %22 : vector<16x32xf32> to vector<16x32xbf16>
    %24 = vector.extract_strided_slice %4 {offsets = [0, 0], sizes = [16, 32], strides = [1, 1]} : vector<16x128xf32> to vector<16x32xf32>
    %25 = arith.truncf %24 : vector<16x32xf32> to vector<16x32xbf16>
    %cst_21 = arith.constant dense<0.000000e+00> : vector<16x16xf32>
    %26 = tpu.matmul %21, %23, %cst_21 {dimension_numbers = #tpu.dot_dimension_numbers<[1], [1], [0], [0], [0, 0, 1, 0], [], []>} : vector<16x32xbf16>, vector<16x32xbf16>, vector<16x16xf32> -> vector<16x16xf32>
    %cst_22 = arith.constant -1.000000e+20 : f32
    %27 = vector.broadcast %cst_22 : f32 to vector<16x16xf32>
    %28 = arith.select %18, %27, %26 : vector<16x16xi1>, vector<16x16xf32>
    %cst_23 = arith.constant 0.0883883461 : f32
    %29 = vector.broadcast %cst_23 : f32 to vector<16x16xf32>
    %30 = arith.mulf %28, %29 : vector<16x16xf32>
    %cst_24 = arith.constant dense<0xFF800000> : vector<16xf32>
    %31 = vector.multi_reduction <maximumf>, %30, %cst_24 [1] : vector<16x16xf32> to vector<16xf32>
    %32 = vector.shape_cast %31 : vector<16xf32> to vector<16x1xf32>
    %33 = vector.broadcast %32 : vector<16x1xf32> to vector<16x16xf32>
    %34 = arith.subf %30, %33 : vector<16x16xf32>
    %35 = math.exp %34 : vector<16x16xf32>
    %cst_25 = arith.constant dense<0.000000e+00> : vector<16xf32>
    %36 = vector.multi_reduction <add>, %35, %cst_25 [1] : vector<16x16xf32> to vector<16xf32>
    %37 = vector.shape_cast %36 : vector<16xf32> to vector<16x1xf32>
    %38 = tpu.reciprocal %37 {approx = true} : vector<16x1xf32> -> vector<16x1xf32>
    %39 = vector.broadcast %38 : vector<16x1xf32> to vector<16x16xf32>
    %40 = arith.mulf %35, %39 : vector<16x16xf32>
    %41 = arith.truncf %40 : vector<16x16xf32> to vector<16x16xbf16>
    %cst_26 = arith.constant dense<0.000000e+00> : vector<16x32xf32>
    %42 = tpu.matmul %41, %25, %cst_26 {dimension_numbers = #tpu.dot_dimension_numbers<[1], [0], [0], [1], [0, 0, 1, 1], [], []>} : vector<16x16xbf16>, vector<16x32xbf16>, vector<16x32xf32> -> vector<16x32xf32>
    %43 = arith.truncf %42 : vector<16x32xf32> to vector<16x32xbf16>
    %c0_27 = arith.constant 0 : index
    %c0_28 = arith.constant 0 : index
    %44 = vector.load %arg8[%c0_27, %c0_28] : memref<128x128xbf16, #tpu.memory_space<vmem>>, vector<32x128xbf16>
    %cst_29 = arith.constant dense<0.000000e+00> : vector<16x128xf32>
    %45 = tpu.matmul %43, %44, %cst_29 {dimension_numbers = #tpu.dot_dimension_numbers<[1], [0], [0], [1], [0, 0, 1, 1], [], []>} : vector<16x32xbf16>, vector<32x128xbf16>, vector<16x128xf32> -> vector<16x128xf32>
    %46 = arith.addf %19, %45 : vector<16x128xf32>
    %47 = vector.extract_strided_slice %14 {offsets = [0, 32], sizes = [16, 32], strides = [1, 1]} : vector<16x128xf32> to vector<16x32xf32>
    %48 = arith.truncf %47 : vector<16x32xf32> to vector<16x32xbf16>
    %49 = vector.extract_strided_slice %9 {offsets = [0, 32], sizes = [16, 32], strides = [1, 1]} : vector<16x128xf32> to vector<16x32xf32>
    %50 = arith.truncf %49 : vector<16x32xf32> to vector<16x32xbf16>
    %51 = vector.extract_strided_slice %4 {offsets = [0, 32], sizes = [16, 32], strides = [1, 1]} : vector<16x128xf32> to vector<16x32xf32>
    %52 = arith.truncf %51 : vector<16x32xf32> to vector<16x32xbf16>
    %cst_30 = arith.constant dense<0.000000e+00> : vector<16x16xf32>
    %53 = tpu.matmul %48, %50, %cst_30 {dimension_numbers = #tpu.dot_dimension_numbers<[1], [1], [0], [0], [0, 0, 1, 0], [], []>} : vector<16x32xbf16>, vector<16x32xbf16>, vector<16x16xf32> -> vector<16x16xf32>
    %cst_31 = arith.constant -1.000000e+20 : f32
    %54 = vector.broadcast %cst_31 : f32 to vector<16x16xf32>
    %55 = arith.select %18, %54, %53 : vector<16x16xi1>, vector<16x16xf32>
    %cst_32 = arith.constant 0.0883883461 : f32
    %56 = vector.broadcast %cst_32 : f32 to vector<16x16xf32>
    %57 = arith.mulf %55, %56 : vector<16x16xf32>
    %cst_33 = arith.constant dense<0xFF800000> : vector<16xf32>
    %58 = vector.multi_reduction <maximumf>, %57, %cst_33 [1] : vector<16x16xf32> to vector<16xf32>
    %59 = vector.shape_cast %58 : vector<16xf32> to vector<16x1xf32>
    %60 = vector.broadcast %59 : vector<16x1xf32> to vector<16x16xf32>
    %61 = arith.subf %57, %60 : vector<16x16xf32>
    %62 = math.exp %61 : vector<16x16xf32>
    %cst_34 = arith.constant dense<0.000000e+00> : vector<16xf32>
    %63 = vector.multi_reduction <add>, %62, %cst_34 [1] : vector<16x16xf32> to vector<16xf32>
    %64 = vector.shape_cast %63 : vector<16xf32> to vector<16x1xf32>
    %65 = tpu.reciprocal %64 {approx = true} : vector<16x1xf32> -> vector<16x1xf32>
    %66 = vector.broadcast %65 : vector<16x1xf32> to vector<16x16xf32>
    %67 = arith.mulf %62, %66 : vector<16x16xf32>
    %68 = arith.truncf %67 : vector<16x16xf32> to vector<16x16xbf16>
    %cst_35 = arith.constant dense<0.000000e+00> : vector<16x32xf32>
    %69 = tpu.matmul %68, %52, %cst_35 {dimension_numbers = #tpu.dot_dimension_numbers<[1], [0], [0], [1], [0, 0, 1, 1], [], []>} : vector<16x16xbf16>, vector<16x32xbf16>, vector<16x32xf32> -> vector<16x32xf32>
    %70 = arith.truncf %69 : vector<16x32xf32> to vector<16x32xbf16>
    %c32 = arith.constant 32 : index
    %c0_36 = arith.constant 0 : index
    %71 = vector.load %arg8[%c32, %c0_36] : memref<128x128xbf16, #tpu.memory_space<vmem>>, vector<32x128xbf16>
    %cst_37 = arith.constant dense<0.000000e+00> : vector<16x128xf32>
    %72 = tpu.matmul %70, %71, %cst_37 {dimension_numbers = #tpu.dot_dimension_numbers<[1], [0], [0], [1], [0, 0, 1, 1], [], []>} : vector<16x32xbf16>, vector<32x128xbf16>, vector<16x128xf32> -> vector<16x128xf32>
    %73 = arith.addf %46, %72 : vector<16x128xf32>
    %74 = vector.extract_strided_slice %14 {offsets = [0, 64], sizes = [16, 32], strides = [1, 1]} : vector<16x128xf32> to vector<16x32xf32>
    %75 = arith.truncf %74 : vector<16x32xf32> to vector<16x32xbf16>
    %76 = vector.extract_strided_slice %9 {offsets = [0, 64], sizes = [16, 32], strides = [1, 1]} : vector<16x128xf32> to vector<16x32xf32>
    %77 = arith.truncf %76 : vector<16x32xf32> to vector<16x32xbf16>
    %78 = vector.extract_strided_slice %4 {offsets = [0, 64], sizes = [16, 32], strides = [1, 1]} : vector<16x128xf32> to vector<16x32xf32>
    %79 = arith.truncf %78 : vector<16x32xf32> to vector<16x32xbf16>
    %cst_38 = arith.constant dense<0.000000e+00> : vector<16x16xf32>
    %80 = tpu.matmul %75, %77, %cst_38 {dimension_numbers = #tpu.dot_dimension_numbers<[1], [1], [0], [0], [0, 0, 1, 0], [], []>} : vector<16x32xbf16>, vector<16x32xbf16>, vector<16x16xf32> -> vector<16x16xf32>
    %cst_39 = arith.constant -1.000000e+20 : f32
    %81 = vector.broadcast %cst_39 : f32 to vector<16x16xf32>
    %82 = arith.select %18, %81, %80 : vector<16x16xi1>, vector<16x16xf32>
    %cst_40 = arith.constant 0.0883883461 : f32
    %83 = vector.broadcast %cst_40 : f32 to vector<16x16xf32>
    %84 = arith.mulf %82, %83 : vector<16x16xf32>
    %cst_41 = arith.constant dense<0xFF800000> : vector<16xf32>
    %85 = vector.multi_reduction <maximumf>, %84, %cst_41 [1] : vector<16x16xf32> to vector<16xf32>
    %86 = vector.shape_cast %85 : vector<16xf32> to vector<16x1xf32>
    %87 = vector.broadcast %86 : vector<16x1xf32> to vector<16x16xf32>
    %88 = arith.subf %84, %87 : vector<16x16xf32>
    %89 = math.exp %88 : vector<16x16xf32>
    %cst_42 = arith.constant dense<0.000000e+00> : vector<16xf32>
    %90 = vector.multi_reduction <add>, %89, %cst_42 [1] : vector<16x16xf32> to vector<16xf32>
    %91 = vector.shape_cast %90 : vector<16xf32> to vector<16x1xf32>
    %92 = tpu.reciprocal %91 {approx = true} : vector<16x1xf32> -> vector<16x1xf32>
    %93 = vector.broadcast %92 : vector<16x1xf32> to vector<16x16xf32>
    %94 = arith.mulf %89, %93 : vector<16x16xf32>
    %95 = arith.truncf %94 : vector<16x16xf32> to vector<16x16xbf16>
    %cst_43 = arith.constant dense<0.000000e+00> : vector<16x32xf32>
    %96 = tpu.matmul %95, %79, %cst_43 {dimension_numbers = #tpu.dot_dimension_numbers<[1], [0], [0], [1], [0, 0, 1, 1], [], []>} : vector<16x16xbf16>, vector<16x32xbf16>, vector<16x32xf32> -> vector<16x32xf32>
    %97 = arith.truncf %96 : vector<16x32xf32> to vector<16x32xbf16>
    %c64 = arith.constant 64 : index
    %c0_44 = arith.constant 0 : index
    %98 = vector.load %arg8[%c64, %c0_44] : memref<128x128xbf16, #tpu.memory_space<vmem>>, vector<32x128xbf16>
    %cst_45 = arith.constant dense<0.000000e+00> : vector<16x128xf32>
    %99 = tpu.matmul %97, %98, %cst_45 {dimension_numbers = #tpu.dot_dimension_numbers<[1], [0], [0], [1], [0, 0, 1, 1], [], []>} : vector<16x32xbf16>, vector<32x128xbf16>, vector<16x128xf32> -> vector<16x128xf32>
    %100 = arith.addf %73, %99 : vector<16x128xf32>
    %101 = vector.extract_strided_slice %14 {offsets = [0, 96], sizes = [16, 32], strides = [1, 1]} : vector<16x128xf32> to vector<16x32xf32>
    %102 = arith.truncf %101 : vector<16x32xf32> to vector<16x32xbf16>
    %103 = vector.extract_strided_slice %9 {offsets = [0, 96], sizes = [16, 32], strides = [1, 1]} : vector<16x128xf32> to vector<16x32xf32>
    %104 = arith.truncf %103 : vector<16x32xf32> to vector<16x32xbf16>
    %105 = vector.extract_strided_slice %4 {offsets = [0, 96], sizes = [16, 32], strides = [1, 1]} : vector<16x128xf32> to vector<16x32xf32>
    %106 = arith.truncf %105 : vector<16x32xf32> to vector<16x32xbf16>
    %cst_46 = arith.constant dense<0.000000e+00> : vector<16x16xf32>
    %107 = tpu.matmul %102, %104, %cst_46 {dimension_numbers = #tpu.dot_dimension_numbers<[1], [1], [0], [0], [0, 0, 1, 0], [], []>} : vector<16x32xbf16>, vector<16x32xbf16>, vector<16x16xf32> -> vector<16x16xf32>
    %cst_47 = arith.constant -1.000000e+20 : f32
    %108 = vector.broadcast %cst_47 : f32 to vector<16x16xf32>
    %109 = arith.select %18, %108, %107 : vector<16x16xi1>, vector<16x16xf32>
    %cst_48 = arith.constant 0.0883883461 : f32
    %110 = vector.broadcast %cst_48 : f32 to vector<16x16xf32>
    %111 = arith.mulf %109, %110 : vector<16x16xf32>
    %cst_49 = arith.constant dense<0xFF800000> : vector<16xf32>
    %112 = vector.multi_reduction <maximumf>, %111, %cst_49 [1] : vector<16x16xf32> to vector<16xf32>
    %113 = vector.shape_cast %112 : vector<16xf32> to vector<16x1xf32>
    %114 = vector.broadcast %113 : vector<16x1xf32> to vector<16x16xf32>
    %115 = arith.subf %111, %114 : vector<16x16xf32>
    %116 = math.exp %115 : vector<16x16xf32>
    %cst_50 = arith.constant dense<0.000000e+00> : vector<16xf32>
    %117 = vector.multi_reduction <add>, %116, %cst_50 [1] : vector<16x16xf32> to vector<16xf32>
    %118 = vector.shape_cast %117 : vector<16xf32> to vector<16x1xf32>
    %119 = tpu.reciprocal %118 {approx = true} : vector<16x1xf32> -> vector<16x1xf32>
    %120 = vector.broadcast %119 : vector<16x1xf32> to vector<16x16xf32>
    %121 = arith.mulf %116, %120 : vector<16x16xf32>
    %122 = arith.truncf %121 : vector<16x16xf32> to vector<16x16xbf16>
    %cst_51 = arith.constant dense<0.000000e+00> : vector<16x32xf32>
    %123 = tpu.matmul %122, %106, %cst_51 {dimension_numbers = #tpu.dot_dimension_numbers<[1], [0], [0], [1], [0, 0, 1, 1], [], []>} : vector<16x16xbf16>, vector<16x32xbf16>, vector<16x32xf32> -> vector<16x32xf32>
    %124 = arith.truncf %123 : vector<16x32xf32> to vector<16x32xbf16>
    %c96 = arith.constant 96 : index
    %c0_52 = arith.constant 0 : index
    %125 = vector.load %arg8[%c96, %c0_52] : memref<128x128xbf16, #tpu.memory_space<vmem>>, vector<32x128xbf16>
    %cst_53 = arith.constant dense<0.000000e+00> : vector<16x128xf32>
    %126 = tpu.matmul %124, %125, %cst_53 {dimension_numbers = #tpu.dot_dimension_numbers<[1], [0], [0], [1], [0, 0, 1, 1], [], []>} : vector<16x32xbf16>, vector<32x128xbf16>, vector<16x128xf32> -> vector<16x128xf32>
    %127 = arith.addf %100, %126 : vector<16x128xf32>
    %c0_54 = arith.constant 0 : index
    %c0_55 = arith.constant 0 : index
    %128 = vector.load %arg9[%c0_54, %c0_55] : memref<1x128xf32, #tpu.memory_space<vmem>>, vector<1x128xf32>
    %129 = vector.broadcast %128 : vector<1x128xf32> to vector<16x128xf32>
    %130 = arith.addf %127, %129 : vector<16x128xf32>
    %c0_56 = arith.constant 0 : index
    %c0_57 = arith.constant 0 : index
    %c0_58 = arith.constant 0 : index
    %131 = vector.load %arg10[%c0_56, %c0_57, %c0_58] : memref<1x16x128xf32, #tpu.memory_space<vmem>>, vector<1x16x128xf32>
    %132 = vector.shape_cast %131 : vector<1x16x128xf32> to vector<16x128xf32>
    %133 = vector.shape_cast %130 : vector<16x128xf32> to vector<1x16x128xf32>
    tpu.vector_store %arg10[%c0_56, %c0_57, %c0_58], %133 {strides = array<i32>} : memref<1x16x128xf32, #tpu.memory_space<vmem>>, vector<1x16x128xf32>,
    return
  }
  func.func @transform_0(%arg0: i32) -> (i32, i32, i32) {
    %c0_i32 = arith.constant 0 : i32
    %c0_i32_0 = arith.constant 0 : i32
    %c0_i32_1 = arith.constant 0 : i32
    return %arg0, %c0_i32, %c0_i32_0 : i32, i32, i32
  }
  func.func @transform_1(%arg0: i32) -> (i32, i32, i32) {
    %c0_i32 = arith.constant 0 : i32
    %c0_i32_0 = arith.constant 0 : i32
    %c0_i32_1 = arith.constant 0 : i32
    return %arg0, %c0_i32, %c0_i32_0 : i32, i32, i32
  }
  func.func @transform_2(%arg0: i32) -> (i32, i32, i32) {
    %c0_i32 = arith.constant 0 : i32
    %c0_i32_0 = arith.constant 0 : i32
    %c0_i32_1 = arith.constant 0 : i32
    return %arg0, %c0_i32, %c0_i32_0 : i32, i32, i32
  }
  func.func @transform_3(%arg0: i32) -> (i32, i32, i32) {
    %c0_i32 = arith.constant 0 : i32
    %c0_i32_0 = arith.constant 0 : i32
    %c0_i32_1 = arith.constant 0 : i32
    return %arg0, %c0_i32, %c0_i32_0 : i32, i32, i32
  }
  func.func @transform_4(%arg0: i32) -> (i32, i32) {
    %c0_i32 = arith.constant 0 : i32
    %c0_i32_0 = arith.constant 0 : i32
    %c0_i32_1 = arith.constant 0 : i32
    return %c0_i32, %c0_i32_0 : i32, i32
  }
  func.func @transform_5(%arg0: i32) -> (i32, i32) {
    %c0_i32 = arith.constant 0 : i32
    %c0_i32_0 = arith.constant 0 : i32
    %c0_i32_1 = arith.constant 0 : i32
    return %c0_i32, %c0_i32_0 : i32, i32
  }
  func.func @transform_6(%arg0: i32) -> (i32, i32) {
    %c0_i32 = arith.constant 0 : i32
    %c0_i32_0 = arith.constant 0 : i32
    %c0_i32_1 = arith.constant 0 : i32
    return %c0_i32, %c0_i32_0 : i32, i32
  }
  func.func @transform_7(%arg0: i32) -> (i32, i32) {
    %c0_i32 = arith.constant 0 : i32
    %c0_i32_0 = arith.constant 0 : i32
    %c0_i32_1 = arith.constant 0 : i32
    return %c0_i32, %c0_i32_0 : i32, i32
  }
  func.func @transform_8(%arg0: i32) -> (i32, i32) {
    %c0_i32 = arith.constant 0 : i32
    %c0_i32_0 = arith.constant 0 : i32
    %c0_i32_1 = arith.constant 0 : i32
    return %c0_i32, %c0_i32_0 : i32, i32
  }
  func.func @transform_9(%arg0: i32) -> (i32, i32, i32) {
    %c0_i32 = arith.constant 0 : i32
    %c0_i32_0 = arith.constant 0 : i32
    %c0_i32_1 = arith.constant 0 : i32
    return %arg0, %c0_i32, %c0_i32_0 : i32, i32, i32
  }
}

module attributes {stable_mosaic.version = 11 : i64} {
  func.func @_add_layernorm_kernel(%arg0: i32, %arg1: memref<1x8x128xf32, #tpu.memory_space<vmem>>, %arg2: memref<1x8x128xf32, #tpu.memory_space<vmem>>, %arg3: memref<1x128xf32, #tpu.memory_space<vmem>>, %arg4: memref<1x128xf32, #tpu.memory_space<vmem>>, %arg5: memref<1x8x128xf32, #tpu.memory_space<vmem>>) attributes {dimension_semantics = [#tpu.dimension_semantics<parallel>], iteration_bounds = array<i64: 2>, scalar_prefetch = 0 : i64, scratch_operands = 0 : i64, tpu.core_type = #tpu.core_type<tc>, window_params = [{transform_indices = @transform_0, window_bounds = array<i64: 1, 8, 128>}, {transform_indices = @transform_1, window_bounds = array<i64: 1, 8, 128>}, {pipeline_mode = #tpu.pipeline_mode<synchronous>, transform_indices = @transform_2, window_bounds = array<i64: 1, 128>}, {pipeline_mode = #tpu.pipeline_mode<synchronous>, transform_indices = @transform_3, window_bounds = array<i64: 1, 128>}, {transform_indices = @transform_4, window_bounds = array<i64: 1, 8, 128>}]} {
    %c0 = arith.constant 0 : index
    %c0_0 = arith.constant 0 : index
    %c0_1 = arith.constant 0 : index
    %0 = vector.load %arg1[%c0, %c0_0, %c0_1] : memref<1x8x128xf32, #tpu.memory_space<vmem>>, vector<1x8x128xf32>
    %1 = vector.shape_cast %0 : vector<1x8x128xf32> to vector<8x128xf32>
    %c0_2 = arith.constant 0 : index
    %c0_3 = arith.constant 0 : index
    %c0_4 = arith.constant 0 : index
    %2 = vector.load %arg2[%c0_2, %c0_3, %c0_4] : memref<1x8x128xf32, #tpu.memory_space<vmem>>, vector<1x8x128xf32>
    %3 = vector.shape_cast %2 : vector<1x8x128xf32> to vector<8x128xf32>
    %4 = arith.addf %1, %3 : vector<8x128xf32>
    %c0_5 = arith.constant 0 : index
    %c0_6 = arith.constant 0 : index
    %5 = vector.load %arg3[%c0_5, %c0_6] : memref<1x128xf32, #tpu.memory_space<vmem>>, vector<1x128xf32>
    %c0_7 = arith.constant 0 : index
    %c0_8 = arith.constant 0 : index
    %6 = vector.load %arg4[%c0_7, %c0_8] : memref<1x128xf32, #tpu.memory_space<vmem>>, vector<1x128xf32>
    %cst = arith.constant dense<0.000000e+00> : vector<8xf32>
    %7 = vector.multi_reduction <add>, %4, %cst [1] : vector<8x128xf32> to vector<8xf32>
    %8 = vector.shape_cast %7 : vector<8xf32> to vector<8x1xf32>
    %cst_9 = arith.constant 1.280000e+02 : f32
    %9 = vector.broadcast %cst_9 : f32 to vector<8x1xf32>
    %10 = arith.divf %8, %9 : vector<8x1xf32>
    %11 = vector.broadcast %10 : vector<8x1xf32> to vector<8x128xf32>
    %12 = arith.subf %4, %11 : vector<8x128xf32>
    %13 = arith.mulf %12, %12 : vector<8x128xf32>
    %cst_10 = arith.constant dense<0.000000e+00> : vector<8xf32>
    %14 = vector.multi_reduction <add>, %13, %cst_10 [1] : vector<8x128xf32> to vector<8xf32>
    %15 = vector.shape_cast %14 : vector<8xf32> to vector<8x1xf32>
    %cst_11 = arith.constant 1.280000e+02 : f32
    %16 = vector.broadcast %cst_11 : f32 to vector<8x1xf32>
    %17 = arith.divf %15, %16 : vector<8x1xf32>
    %cst_12 = arith.constant 9.99999974E-6 : f32
    %18 = vector.broadcast %cst_12 : f32 to vector<8x1xf32>
    %19 = arith.addf %17, %18 : vector<8x1xf32>
    %20 = math.rsqrt %19 : vector<8x1xf32>
    %21 = vector.broadcast %20 : vector<8x1xf32> to vector<8x128xf32>
    %22 = arith.mulf %12, %21 : vector<8x128xf32>
    %23 = vector.broadcast %5 : vector<1x128xf32> to vector<8x128xf32>
    %24 = arith.mulf %22, %23 : vector<8x128xf32>
    %25 = vector.broadcast %6 : vector<1x128xf32> to vector<8x128xf32>
    %26 = arith.addf %24, %25 : vector<8x128xf32>
    %c0_13 = arith.constant 0 : index
    %c0_14 = arith.constant 0 : index
    %c0_15 = arith.constant 0 : index
    %27 = vector.load %arg5[%c0_13, %c0_14, %c0_15] : memref<1x8x128xf32, #tpu.memory_space<vmem>>, vector<1x8x128xf32>
    %28 = vector.shape_cast %27 : vector<1x8x128xf32> to vector<8x128xf32>
    %29 = vector.shape_cast %26 : vector<8x128xf32> to vector<1x8x128xf32>
    tpu.vector_store %arg5[%c0_13, %c0_14, %c0_15], %29 {strides = array<i32>} : memref<1x8x128xf32, #tpu.memory_space<vmem>>, vector<1x8x128xf32>,
    return
  }
  func.func @transform_0(%arg0: i32) -> (i32, i32, i32) {
    %c0_i32 = arith.constant 0 : i32
    %c0_i32_0 = arith.constant 0 : i32
    %c0_i32_1 = arith.constant 0 : i32
    return %arg0, %c0_i32, %c0_i32_0 : i32, i32, i32
  }
  func.func @transform_1(%arg0: i32) -> (i32, i32, i32) {
    %c0_i32 = arith.constant 0 : i32
    %c0_i32_0 = arith.constant 0 : i32
    %c0_i32_1 = arith.constant 0 : i32
    return %arg0, %c0_i32, %c0_i32_0 : i32, i32, i32
  }
  func.func @transform_2(%arg0: i32) -> (i32, i32) {
    %c0_i32 = arith.constant 0 : i32
    %c0_i32_0 = arith.constant 0 : i32
    %c0_i32_1 = arith.constant 0 : i32
    return %c0_i32, %c0_i32_0 : i32, i32
  }
  func.func @transform_3(%arg0: i32) -> (i32, i32) {
    %c0_i32 = arith.constant 0 : i32
    %c0_i32_0 = arith.constant 0 : i32
    %c0_i32_1 = arith.constant 0 : i32
    return %c0_i32, %c0_i32_0 : i32, i32
  }
  func.func @transform_4(%arg0: i32) -> (i32, i32, i32) {
    %c0_i32 = arith.constant 0 : i32
    %c0_i32_0 = arith.constant 0 : i32
    %c0_i32_1 = arith.constant 0 : i32
    return %arg0, %c0_i32, %c0_i32_0 : i32, i32, i32
  }
}

module attributes {stable_mosaic.version = 11 : i64} {
  func.func @_attention_kernel(%arg0: i32, %arg1: memref<1x8x128xf32, #tpu.memory_space<vmem>>, %arg2: memref<1x8x128xf32, #tpu.memory_space<vmem>>, %arg3: memref<1x8x128xf32, #tpu.memory_space<vmem>>, %arg4: memref<1x8x8xf32, #tpu.memory_space<vmem>>, %arg5: memref<128x128xbf16, #tpu.memory_space<vmem>>, %arg6: memref<128x128xbf16, #tpu.memory_space<vmem>>, %arg7: memref<128x128xbf16, #tpu.memory_space<vmem>>, %arg8: memref<128x128xbf16, #tpu.memory_space<vmem>>, %arg9: memref<1x128xf32, #tpu.memory_space<vmem>>, %arg10: memref<1x8x128xf32, #tpu.memory_space<vmem>>) attributes {dimension_semantics = [#tpu.dimension_semantics<parallel>], iteration_bounds = array<i64: 2>, scalar_prefetch = 0 : i64, scratch_operands = 0 : i64, tpu.core_type = #tpu.core_type<tc>, window_params = [{transform_indices = @transform_0, window_bounds = array<i64: 1, 8, 128>}, {transform_indices = @transform_1, window_bounds = array<i64: 1, 8, 128>}, {transform_indices = @transform_2, window_bounds = array<i64: 1, 8, 128>}, {transform_indices = @transform_3, window_bounds = array<i64: 1, 8, 8>}, {pipeline_mode = #tpu.pipeline_mode<synchronous>, transform_indices = @transform_4, window_bounds = array<i64: 128, 128>}, {pipeline_mode = #tpu.pipeline_mode<synchronous>, transform_indices = @transform_5, window_bounds = array<i64: 128, 128>}, {pipeline_mode = #tpu.pipeline_mode<synchronous>, transform_indices = @transform_6, window_bounds = array<i64: 128, 128>}, {pipeline_mode = #tpu.pipeline_mode<synchronous>, transform_indices = @transform_7, window_bounds = array<i64: 128, 128>}, {pipeline_mode = #tpu.pipeline_mode<synchronous>, transform_indices = @transform_8, window_bounds = array<i64: 1, 128>}, {transform_indices = @transform_9, window_bounds = array<i64: 1, 8, 128>}]} {
    %c0 = arith.constant 0 : index
    %c0_0 = arith.constant 0 : index
    %c0_1 = arith.constant 0 : index
    %0 = vector.load %arg1[%c0, %c0_0, %c0_1] : memref<1x8x128xf32, #tpu.memory_space<vmem>>, vector<1x8x128xf32>
    %1 = vector.shape_cast %0 : vector<1x8x128xf32> to vector<8x128xf32>
    %2 = arith.truncf %1 : vector<8x128xf32> to vector<8x128xbf16>
    %c0_2 = arith.constant 0 : index
    %c0_3 = arith.constant 0 : index
    %3 = vector.load %arg5[%c0_2, %c0_3] : memref<128x128xbf16, #tpu.memory_space<vmem>>, vector<128x128xbf16>
    %cst = arith.constant dense<0.000000e+00> : vector<8x128xf32>
    %4 = tpu.matmul %2, %3, %cst {dimension_numbers = #tpu.dot_dimension_numbers<[1], [0], [0], [1], [0, 0, 1, 1], [], []>} : vector<8x128xbf16>, vector<128x128xbf16>, vector<8x128xf32> -> vector<8x128xf32>
    %c0_4 = arith.constant 0 : index
    %c0_5 = arith.constant 0 : index
    %c0_6 = arith.constant 0 : index
    %5 = vector.load %arg2[%c0_4, %c0_5, %c0_6] : memref<1x8x128xf32, #tpu.memory_space<vmem>>, vector<1x8x128xf32>
    %6 = vector.shape_cast %5 : vector<1x8x128xf32> to vector<8x128xf32>
    %7 = arith.truncf %6 : vector<8x128xf32> to vector<8x128xbf16>
    %c0_7 = arith.constant 0 : index
    %c0_8 = arith.constant 0 : index
    %8 = vector.load %arg6[%c0_7, %c0_8] : memref<128x128xbf16, #tpu.memory_space<vmem>>, vector<128x128xbf16>
    %cst_9 = arith.constant dense<0.000000e+00> : vector<8x128xf32>
    %9 = tpu.matmul %7, %8, %cst_9 {dimension_numbers = #tpu.dot_dimension_numbers<[1], [0], [0], [1], [0, 0, 1, 1], [], []>} : vector<8x128xbf16>, vector<128x128xbf16>, vector<8x128xf32> -> vector<8x128xf32>
    %c0_10 = arith.constant 0 : index
    %c0_11 = arith.constant 0 : index
    %c0_12 = arith.constant 0 : index
    %10 = vector.load %arg3[%c0_10, %c0_11, %c0_12] : memref<1x8x128xf32, #tpu.memory_space<vmem>>, vector<1x8x128xf32>
    %11 = vector.shape_cast %10 : vector<1x8x128xf32> to vector<8x128xf32>
    %12 = arith.truncf %11 : vector<8x128xf32> to vector<8x128xbf16>
    %c0_13 = arith.constant 0 : index
    %c0_14 = arith.constant 0 : index
    %13 = vector.load %arg7[%c0_13, %c0_14] : memref<128x128xbf16, #tpu.memory_space<vmem>>, vector<128x128xbf16>
    %cst_15 = arith.constant dense<0.000000e+00> : vector<8x128xf32>
    %14 = tpu.matmul %12, %13, %cst_15 {dimension_numbers = #tpu.dot_dimension_numbers<[1], [0], [0], [1], [0, 0, 1, 1], [], []>} : vector<8x128xbf16>, vector<128x128xbf16>, vector<8x128xf32> -> vector<8x128xf32>
    %c0_16 = arith.constant 0 : index
    %c0_17 = arith.constant 0 : index
    %c0_18 = arith.constant 0 : index
    %15 = vector.load %arg4[%c0_16, %c0_17, %c0_18] : memref<1x8x8xf32, #tpu.memory_space<vmem>>, vector<1x8x8xf32>
    %16 = vector.shape_cast %15 : vector<1x8x8xf32> to vector<8x8xf32>
    %cst_19 = arith.constant 0.000000e+00 : f32
    %17 = vector.broadcast %cst_19 : f32 to vector<8x8xf32>
    %18 = arith.cmpf oeq, %16, %17 : vector<8x8xf32>
    %cst_20 = arith.constant 0.000000e+00 : f32
    %19 = vector.broadcast %cst_20 : f32 to vector<8x128xf32>
    %20 = vector.extract_strided_slice %14 {offsets = [0, 0], sizes = [8, 32], strides = [1, 1]} : vector<8x128xf32> to vector<8x32xf32>
    %21 = arith.truncf %20 : vector<8x32xf32> to vector<8x32xbf16>
    %22 = vector.extract_strided_slice %9 {offsets = [0, 0], sizes = [8, 32], strides = [1, 1]} : vector<8x128xf32> to vector<8x32xf32>
    %23 = arith.truncf %22 : vector<8x32xf32> to vector<8x32xbf16>
    %24 = vector.extract_strided_slice %4 {offsets = [0, 0], sizes = [8, 32], strides = [1, 1]} : vector<8x128xf32> to vector<8x32xf32>
    %25 = arith.truncf %24 : vector<8x32xf32> to vector<8x32xbf16>
    %cst_21 = arith.constant dense<0.000000e+00> : vector<8x8xf32>
    %26 = tpu.matmul %21, %23, %cst_21 {dimension_numbers = #tpu.dot_dimension_numbers<[1], [1], [0], [0], [0, 0, 1, 0], [], []>} : vector<8x32xbf16>, vector<8x32xbf16>, vector<8x8xf32> -> vector<8x8xf32>
    %cst_22 = arith.constant -1.000000e+20 : f32
    %27 = vector.broadcast %cst_22 : f32 to vector<8x8xf32>
    %28 = arith.select %18, %27, %26 : vector<8x8xi1>, vector<8x8xf32>
    %cst_23 = arith.constant 0.0883883461 : f32
    %29 = vector.broadcast %cst_23 : f32 to vector<8x8xf32>
    %30 = arith.mulf %28, %29 : vector<8x8xf32>
    %cst_24 = arith.constant dense<0xFF800000> : vector<8xf32>
    %31 = vector.multi_reduction <maximumf>, %30, %cst_24 [1] : vector<8x8xf32> to vector<8xf32>
    %32 = vector.shape_cast %31 : vector<8xf32> to vector<8x1xf32>
    %33 = vector.broadcast %32 : vector<8x1xf32> to vector<8x8xf32>
    %34 = arith.subf %30, %33 : vector<8x8xf32>
    %35 = math.exp %34 : vector<8x8xf32>
    %cst_25 = arith.constant dense<0.000000e+00> : vector<8xf32>
    %36 = vector.multi_reduction <add>, %35, %cst_25 [1] : vector<8x8xf32> to vector<8xf32>
    %37 = vector.shape_cast %36 : vector<8xf32> to vector<8x1xf32>
    %38 = tpu.reciprocal %37 {approx = true} : vector<8x1xf32> -> vector<8x1xf32>
    %39 = vector.broadcast %38 : vector<8x1xf32> to vector<8x8xf32>
    %40 = arith.mulf %35, %39 : vector<8x8xf32>
    %41 = arith.truncf %40 : vector<8x8xf32> to vector<8x8xbf16>
    %cst_26 = arith.constant dense<0.000000e+00> : vector<8x32xf32>
    %42 = tpu.matmul %41, %25, %cst_26 {dimension_numbers = #tpu.dot_dimension_numbers<[1], [0], [0], [1], [0, 0, 1, 1], [], []>} : vector<8x8xbf16>, vector<8x32xbf16>, vector<8x32xf32> -> vector<8x32xf32>
    %43 = arith.truncf %42 : vector<8x32xf32> to vector<8x32xbf16>
    %c0_27 = arith.constant 0 : index
    %c0_28 = arith.constant 0 : index
    %44 = vector.load %arg8[%c0_27, %c0_28] : memref<128x128xbf16, #tpu.memory_space<vmem>>, vector<32x128xbf16>
    %cst_29 = arith.constant dense<0.000000e+00> : vector<8x128xf32>
    %45 = tpu.matmul %43, %44, %cst_29 {dimension_numbers = #tpu.dot_dimension_numbers<[1], [0], [0], [1], [0, 0, 1, 1], [], []>} : vector<8x32xbf16>, vector<32x128xbf16>, vector<8x128xf32> -> vector<8x128xf32>
    %46 = arith.addf %19, %45 : vector<8x128xf32>
    %47 = vector.extract_strided_slice %14 {offsets = [0, 32], sizes = [8, 32], strides = [1, 1]} : vector<8x128xf32> to vector<8x32xf32>
    %48 = arith.truncf %47 : vector<8x32xf32> to vector<8x32xbf16>
    %49 = vector.extract_strided_slice %9 {offsets = [0, 32], sizes = [8, 32], strides = [1, 1]} : vector<8x128xf32> to vector<8x32xf32>
    %50 = arith.truncf %49 : vector<8x32xf32> to vector<8x32xbf16>
    %51 = vector.extract_strided_slice %4 {offsets = [0, 32], sizes = [8, 32], strides = [1, 1]} : vector<8x128xf32> to vector<8x32xf32>
    %52 = arith.truncf %51 : vector<8x32xf32> to vector<8x32xbf16>
    %cst_30 = arith.constant dense<0.000000e+00> : vector<8x8xf32>
    %53 = tpu.matmul %48, %50, %cst_30 {dimension_numbers = #tpu.dot_dimension_numbers<[1], [1], [0], [0], [0, 0, 1, 0], [], []>} : vector<8x32xbf16>, vector<8x32xbf16>, vector<8x8xf32> -> vector<8x8xf32>
    %cst_31 = arith.constant -1.000000e+20 : f32
    %54 = vector.broadcast %cst_31 : f32 to vector<8x8xf32>
    %55 = arith.select %18, %54, %53 : vector<8x8xi1>, vector<8x8xf32>
    %cst_32 = arith.constant 0.0883883461 : f32
    %56 = vector.broadcast %cst_32 : f32 to vector<8x8xf32>
    %57 = arith.mulf %55, %56 : vector<8x8xf32>
    %cst_33 = arith.constant dense<0xFF800000> : vector<8xf32>
    %58 = vector.multi_reduction <maximumf>, %57, %cst_33 [1] : vector<8x8xf32> to vector<8xf32>
    %59 = vector.shape_cast %58 : vector<8xf32> to vector<8x1xf32>
    %60 = vector.broadcast %59 : vector<8x1xf32> to vector<8x8xf32>
    %61 = arith.subf %57, %60 : vector<8x8xf32>
    %62 = math.exp %61 : vector<8x8xf32>
    %cst_34 = arith.constant dense<0.000000e+00> : vector<8xf32>
    %63 = vector.multi_reduction <add>, %62, %cst_34 [1] : vector<8x8xf32> to vector<8xf32>
    %64 = vector.shape_cast %63 : vector<8xf32> to vector<8x1xf32>
    %65 = tpu.reciprocal %64 {approx = true} : vector<8x1xf32> -> vector<8x1xf32>
    %66 = vector.broadcast %65 : vector<8x1xf32> to vector<8x8xf32>
    %67 = arith.mulf %62, %66 : vector<8x8xf32>
    %68 = arith.truncf %67 : vector<8x8xf32> to vector<8x8xbf16>
    %cst_35 = arith.constant dense<0.000000e+00> : vector<8x32xf32>
    %69 = tpu.matmul %68, %52, %cst_35 {dimension_numbers = #tpu.dot_dimension_numbers<[1], [0], [0], [1], [0, 0, 1, 1], [], []>} : vector<8x8xbf16>, vector<8x32xbf16>, vector<8x32xf32> -> vector<8x32xf32>
    %70 = arith.truncf %69 : vector<8x32xf32> to vector<8x32xbf16>
    %c32 = arith.constant 32 : index
    %c0_36 = arith.constant 0 : index
    %71 = vector.load %arg8[%c32, %c0_36] : memref<128x128xbf16, #tpu.memory_space<vmem>>, vector<32x128xbf16>
    %cst_37 = arith.constant dense<0.000000e+00> : vector<8x128xf32>
    %72 = tpu.matmul %70, %71, %cst_37 {dimension_numbers = #tpu.dot_dimension_numbers<[1], [0], [0], [1], [0, 0, 1, 1], [], []>} : vector<8x32xbf16>, vector<32x128xbf16>, vector<8x128xf32> -> vector<8x128xf32>
    %73 = arith.addf %46, %72 : vector<8x128xf32>
    %74 = vector.extract_strided_slice %14 {offsets = [0, 64], sizes = [8, 32], strides = [1, 1]} : vector<8x128xf32> to vector<8x32xf32>
    %75 = arith.truncf %74 : vector<8x32xf32> to vector<8x32xbf16>
    %76 = vector.extract_strided_slice %9 {offsets = [0, 64], sizes = [8, 32], strides = [1, 1]} : vector<8x128xf32> to vector<8x32xf32>
    %77 = arith.truncf %76 : vector<8x32xf32> to vector<8x32xbf16>
    %78 = vector.extract_strided_slice %4 {offsets = [0, 64], sizes = [8, 32], strides = [1, 1]} : vector<8x128xf32> to vector<8x32xf32>
    %79 = arith.truncf %78 : vector<8x32xf32> to vector<8x32xbf16>
    %cst_38 = arith.constant dense<0.000000e+00> : vector<8x8xf32>
    %80 = tpu.matmul %75, %77, %cst_38 {dimension_numbers = #tpu.dot_dimension_numbers<[1], [1], [0], [0], [0, 0, 1, 0], [], []>} : vector<8x32xbf16>, vector<8x32xbf16>, vector<8x8xf32> -> vector<8x8xf32>
    %cst_39 = arith.constant -1.000000e+20 : f32
    %81 = vector.broadcast %cst_39 : f32 to vector<8x8xf32>
    %82 = arith.select %18, %81, %80 : vector<8x8xi1>, vector<8x8xf32>
    %cst_40 = arith.constant 0.0883883461 : f32
    %83 = vector.broadcast %cst_40 : f32 to vector<8x8xf32>
    %84 = arith.mulf %82, %83 : vector<8x8xf32>
    %cst_41 = arith.constant dense<0xFF800000> : vector<8xf32>
    %85 = vector.multi_reduction <maximumf>, %84, %cst_41 [1] : vector<8x8xf32> to vector<8xf32>
    %86 = vector.shape_cast %85 : vector<8xf32> to vector<8x1xf32>
    %87 = vector.broadcast %86 : vector<8x1xf32> to vector<8x8xf32>
    %88 = arith.subf %84, %87 : vector<8x8xf32>
    %89 = math.exp %88 : vector<8x8xf32>
    %cst_42 = arith.constant dense<0.000000e+00> : vector<8xf32>
    %90 = vector.multi_reduction <add>, %89, %cst_42 [1] : vector<8x8xf32> to vector<8xf32>
    %91 = vector.shape_cast %90 : vector<8xf32> to vector<8x1xf32>
    %92 = tpu.reciprocal %91 {approx = true} : vector<8x1xf32> -> vector<8x1xf32>
    %93 = vector.broadcast %92 : vector<8x1xf32> to vector<8x8xf32>
    %94 = arith.mulf %89, %93 : vector<8x8xf32>
    %95 = arith.truncf %94 : vector<8x8xf32> to vector<8x8xbf16>
    %cst_43 = arith.constant dense<0.000000e+00> : vector<8x32xf32>
    %96 = tpu.matmul %95, %79, %cst_43 {dimension_numbers = #tpu.dot_dimension_numbers<[1], [0], [0], [1], [0, 0, 1, 1], [], []>} : vector<8x8xbf16>, vector<8x32xbf16>, vector<8x32xf32> -> vector<8x32xf32>
    %97 = arith.truncf %96 : vector<8x32xf32> to vector<8x32xbf16>
    %c64 = arith.constant 64 : index
    %c0_44 = arith.constant 0 : index
    %98 = vector.load %arg8[%c64, %c0_44] : memref<128x128xbf16, #tpu.memory_space<vmem>>, vector<32x128xbf16>
    %cst_45 = arith.constant dense<0.000000e+00> : vector<8x128xf32>
    %99 = tpu.matmul %97, %98, %cst_45 {dimension_numbers = #tpu.dot_dimension_numbers<[1], [0], [0], [1], [0, 0, 1, 1], [], []>} : vector<8x32xbf16>, vector<32x128xbf16>, vector<8x128xf32> -> vector<8x128xf32>
    %100 = arith.addf %73, %99 : vector<8x128xf32>
    %101 = vector.extract_strided_slice %14 {offsets = [0, 96], sizes = [8, 32], strides = [1, 1]} : vector<8x128xf32> to vector<8x32xf32>
    %102 = arith.truncf %101 : vector<8x32xf32> to vector<8x32xbf16>
    %103 = vector.extract_strided_slice %9 {offsets = [0, 96], sizes = [8, 32], strides = [1, 1]} : vector<8x128xf32> to vector<8x32xf32>
    %104 = arith.truncf %103 : vector<8x32xf32> to vector<8x32xbf16>
    %105 = vector.extract_strided_slice %4 {offsets = [0, 96], sizes = [8, 32], strides = [1, 1]} : vector<8x128xf32> to vector<8x32xf32>
    %106 = arith.truncf %105 : vector<8x32xf32> to vector<8x32xbf16>
    %cst_46 = arith.constant dense<0.000000e+00> : vector<8x8xf32>
    %107 = tpu.matmul %102, %104, %cst_46 {dimension_numbers = #tpu.dot_dimension_numbers<[1], [1], [0], [0], [0, 0, 1, 0], [], []>} : vector<8x32xbf16>, vector<8x32xbf16>, vector<8x8xf32> -> vector<8x8xf32>
    %cst_47 = arith.constant -1.000000e+20 : f32
    %108 = vector.broadcast %cst_47 : f32 to vector<8x8xf32>
    %109 = arith.select %18, %108, %107 : vector<8x8xi1>, vector<8x8xf32>
    %cst_48 = arith.constant 0.0883883461 : f32
    %110 = vector.broadcast %cst_48 : f32 to vector<8x8xf32>
    %111 = arith.mulf %109, %110 : vector<8x8xf32>
    %cst_49 = arith.constant dense<0xFF800000> : vector<8xf32>
    %112 = vector.multi_reduction <maximumf>, %111, %cst_49 [1] : vector<8x8xf32> to vector<8xf32>
    %113 = vector.shape_cast %112 : vector<8xf32> to vector<8x1xf32>
    %114 = vector.broadcast %113 : vector<8x1xf32> to vector<8x8xf32>
    %115 = arith.subf %111, %114 : vector<8x8xf32>
    %116 = math.exp %115 : vector<8x8xf32>
    %cst_50 = arith.constant dense<0.000000e+00> : vector<8xf32>
    %117 = vector.multi_reduction <add>, %116, %cst_50 [1] : vector<8x8xf32> to vector<8xf32>
    %118 = vector.shape_cast %117 : vector<8xf32> to vector<8x1xf32>
    %119 = tpu.reciprocal %118 {approx = true} : vector<8x1xf32> -> vector<8x1xf32>
    %120 = vector.broadcast %119 : vector<8x1xf32> to vector<8x8xf32>
    %121 = arith.mulf %116, %120 : vector<8x8xf32>
    %122 = arith.truncf %121 : vector<8x8xf32> to vector<8x8xbf16>
    %cst_51 = arith.constant dense<0.000000e+00> : vector<8x32xf32>
    %123 = tpu.matmul %122, %106, %cst_51 {dimension_numbers = #tpu.dot_dimension_numbers<[1], [0], [0], [1], [0, 0, 1, 1], [], []>} : vector<8x8xbf16>, vector<8x32xbf16>, vector<8x32xf32> -> vector<8x32xf32>
    %124 = arith.truncf %123 : vector<8x32xf32> to vector<8x32xbf16>
    %c96 = arith.constant 96 : index
    %c0_52 = arith.constant 0 : index
    %125 = vector.load %arg8[%c96, %c0_52] : memref<128x128xbf16, #tpu.memory_space<vmem>>, vector<32x128xbf16>
    %cst_53 = arith.constant dense<0.000000e+00> : vector<8x128xf32>
    %126 = tpu.matmul %124, %125, %cst_53 {dimension_numbers = #tpu.dot_dimension_numbers<[1], [0], [0], [1], [0, 0, 1, 1], [], []>} : vector<8x32xbf16>, vector<32x128xbf16>, vector<8x128xf32> -> vector<8x128xf32>
    %127 = arith.addf %100, %126 : vector<8x128xf32>
    %c0_54 = arith.constant 0 : index
    %c0_55 = arith.constant 0 : index
    %128 = vector.load %arg9[%c0_54, %c0_55] : memref<1x128xf32, #tpu.memory_space<vmem>>, vector<1x128xf32>
    %129 = vector.broadcast %128 : vector<1x128xf32> to vector<8x128xf32>
    %130 = arith.addf %127, %129 : vector<8x128xf32>
    %c0_56 = arith.constant 0 : index
    %c0_57 = arith.constant 0 : index
    %c0_58 = arith.constant 0 : index
    %131 = vector.load %arg10[%c0_56, %c0_57, %c0_58] : memref<1x8x128xf32, #tpu.memory_space<vmem>>, vector<1x8x128xf32>
    %132 = vector.shape_cast %131 : vector<1x8x128xf32> to vector<8x128xf32>
    %133 = vector.shape_cast %130 : vector<8x128xf32> to vector<1x8x128xf32>
    tpu.vector_store %arg10[%c0_56, %c0_57, %c0_58], %133 {strides = array<i32>} : memref<1x8x128xf32, #tpu.memory_space<vmem>>, vector<1x8x128xf32>,
    return
  }
  func.func @transform_0(%arg0: i32) -> (i32, i32, i32) {
    %c0_i32 = arith.constant 0 : i32
    %c0_i32_0 = arith.constant 0 : i32
    %c0_i32_1 = arith.constant 0 : i32
    return %arg0, %c0_i32, %c0_i32_0 : i32, i32, i32
  }
  func.func @transform_1(%arg0: i32) -> (i32, i32, i32) {
    %c0_i32 = arith.constant 0 : i32
    %c0_i32_0 = arith.constant 0 : i32
    %c0_i32_1 = arith.constant 0 : i32
    return %arg0, %c0_i32, %c0_i32_0 : i32, i32, i32
  }
  func.func @transform_2(%arg0: i32) -> (i32, i32, i32) {
    %c0_i32 = arith.constant 0 : i32
    %c0_i32_0 = arith.constant 0 : i32
    %c0_i32_1 = arith.constant 0 : i32
    return %arg0, %c0_i32, %c0_i32_0 : i32, i32, i32
  }
  func.func @transform_3(%arg0: i32) -> (i32, i32, i32) {
    %c0_i32 = arith.constant 0 : i32
    %c0_i32_0 = arith.constant 0 : i32
    %c0_i32_1 = arith.constant 0 : i32
    return %arg0, %c0_i32, %c0_i32_0 : i32, i32, i32
  }
  func.func @transform_4(%arg0: i32) -> (i32, i32) {
    %c0_i32 = arith.constant 0 : i32
    %c0_i32_0 = arith.constant 0 : i32
    %c0_i32_1 = arith.constant 0 : i32
    return %c0_i32, %c0_i32_0 : i32, i32
  }
  func.func @transform_5(%arg0: i32) -> (i32, i32) {
    %c0_i32 = arith.constant 0 : i32
    %c0_i32_0 = arith.constant 0 : i32
    %c0_i32_1 = arith.constant 0 : i32
    return %c0_i32, %c0_i32_0 : i32, i32
  }
  func.func @transform_6(%arg0: i32) -> (i32, i32) {
    %c0_i32 = arith.constant 0 : i32
    %c0_i32_0 = arith.constant 0 : i32
    %c0_i32_1 = arith.constant 0 : i32
    return %c0_i32, %c0_i32_0 : i32, i32
  }
  func.func @transform_7(%arg0: i32) -> (i32, i32) {
    %c0_i32 = arith.constant 0 : i32
    %c0_i32_0 = arith.constant 0 : i32
    %c0_i32_1 = arith.constant 0 : i32
    return %c0_i32, %c0_i32_0 : i32, i32
  }
  func.func @transform_8(%arg0: i32) -> (i32, i32) {
    %c0_i32 = arith.constant 0 : i32
    %c0_i32_0 = arith.constant 0 : i32
    %c0_i32_1 = arith.constant 0 : i32
    return %c0_i32, %c0_i32_0 : i32, i32
  }
  func.func @transform_9(%arg0: i32) -> (i32, i32, i32) {
    %c0_i32 = arith.constant 0 : i32
    %c0_i32_0 = arith.constant 0 : i32
    %c0_i32_1 = arith.constant 0 : i32
    return %arg0, %c0_i32, %c0_i32_0 : i32, i32, i32
  }
}

module attributes {stable_mosaic.version = 11 : i64} {
  func.func @_attention_kernel(%arg0: i32, %arg1: memref<1x16x128xf32, #tpu.memory_space<vmem>>, %arg2: memref<1x16x128xf32, #tpu.memory_space<vmem>>, %arg3: memref<1x8x128xf32, #tpu.memory_space<vmem>>, %arg4: memref<1x8x16xf32, #tpu.memory_space<vmem>>, %arg5: memref<128x128xbf16, #tpu.memory_space<vmem>>, %arg6: memref<128x128xbf16, #tpu.memory_space<vmem>>, %arg7: memref<128x128xbf16, #tpu.memory_space<vmem>>, %arg8: memref<128x128xbf16, #tpu.memory_space<vmem>>, %arg9: memref<1x128xf32, #tpu.memory_space<vmem>>, %arg10: memref<1x8x128xf32, #tpu.memory_space<vmem>>) attributes {dimension_semantics = [#tpu.dimension_semantics<parallel>], iteration_bounds = array<i64: 2>, scalar_prefetch = 0 : i64, scratch_operands = 0 : i64, tpu.core_type = #tpu.core_type<tc>, window_params = [{transform_indices = @transform_0, window_bounds = array<i64: 1, 16, 128>}, {transform_indices = @transform_1, window_bounds = array<i64: 1, 16, 128>}, {transform_indices = @transform_2, window_bounds = array<i64: 1, 8, 128>}, {transform_indices = @transform_3, window_bounds = array<i64: 1, 8, 16>}, {pipeline_mode = #tpu.pipeline_mode<synchronous>, transform_indices = @transform_4, window_bounds = array<i64: 128, 128>}, {pipeline_mode = #tpu.pipeline_mode<synchronous>, transform_indices = @transform_5, window_bounds = array<i64: 128, 128>}, {pipeline_mode = #tpu.pipeline_mode<synchronous>, transform_indices = @transform_6, window_bounds = array<i64: 128, 128>}, {pipeline_mode = #tpu.pipeline_mode<synchronous>, transform_indices = @transform_7, window_bounds = array<i64: 128, 128>}, {pipeline_mode = #tpu.pipeline_mode<synchronous>, transform_indices = @transform_8, window_bounds = array<i64: 1, 128>}, {transform_indices = @transform_9, window_bounds = array<i64: 1, 8, 128>}]} {
    %c0 = arith.constant 0 : index
    %c0_0 = arith.constant 0 : index
    %c0_1 = arith.constant 0 : index
    %0 = vector.load %arg1[%c0, %c0_0, %c0_1] : memref<1x16x128xf32, #tpu.memory_space<vmem>>, vector<1x16x128xf32>
    %1 = vector.shape_cast %0 : vector<1x16x128xf32> to vector<16x128xf32>
    %2 = arith.truncf %1 : vector<16x128xf32> to vector<16x128xbf16>
    %c0_2 = arith.constant 0 : index
    %c0_3 = arith.constant 0 : index
    %3 = vector.load %arg5[%c0_2, %c0_3] : memref<128x128xbf16, #tpu.memory_space<vmem>>, vector<128x128xbf16>
    %cst = arith.constant dense<0.000000e+00> : vector<16x128xf32>
    %4 = tpu.matmul %2, %3, %cst {dimension_numbers = #tpu.dot_dimension_numbers<[1], [0], [0], [1], [0, 0, 1, 1], [], []>} : vector<16x128xbf16>, vector<128x128xbf16>, vector<16x128xf32> -> vector<16x128xf32>
    %c0_4 = arith.constant 0 : index
    %c0_5 = arith.constant 0 : index
    %c0_6 = arith.constant 0 : index
    %5 = vector.load %arg2[%c0_4, %c0_5, %c0_6] : memref<1x16x128xf32, #tpu.memory_space<vmem>>, vector<1x16x128xf32>
    %6 = vector.shape_cast %5 : vector<1x16x128xf32> to vector<16x128xf32>
    %7 = arith.truncf %6 : vector<16x128xf32> to vector<16x128xbf16>
    %c0_7 = arith.constant 0 : index
    %c0_8 = arith.constant 0 : index
    %8 = vector.load %arg6[%c0_7, %c0_8] : memref<128x128xbf16, #tpu.memory_space<vmem>>, vector<128x128xbf16>
    %cst_9 = arith.constant dense<0.000000e+00> : vector<16x128xf32>
    %9 = tpu.matmul %7, %8, %cst_9 {dimension_numbers = #tpu.dot_dimension_numbers<[1], [0], [0], [1], [0, 0, 1, 1], [], []>} : vector<16x128xbf16>, vector<128x128xbf16>, vector<16x128xf32> -> vector<16x128xf32>
    %c0_10 = arith.constant 0 : index
    %c0_11 = arith.constant 0 : index
    %c0_12 = arith.constant 0 : index
    %10 = vector.load %arg3[%c0_10, %c0_11, %c0_12] : memref<1x8x128xf32, #tpu.memory_space<vmem>>, vector<1x8x128xf32>
    %11 = vector.shape_cast %10 : vector<1x8x128xf32> to vector<8x128xf32>
    %12 = arith.truncf %11 : vector<8x128xf32> to vector<8x128xbf16>
    %c0_13 = arith.constant 0 : index
    %c0_14 = arith.constant 0 : index
    %13 = vector.load %arg7[%c0_13, %c0_14] : memref<128x128xbf16, #tpu.memory_space<vmem>>, vector<128x128xbf16>
    %cst_15 = arith.constant dense<0.000000e+00> : vector<8x128xf32>
    %14 = tpu.matmul %12, %13, %cst_15 {dimension_numbers = #tpu.dot_dimension_numbers<[1], [0], [0], [1], [0, 0, 1, 1], [], []>} : vector<8x128xbf16>, vector<128x128xbf16>, vector<8x128xf32> -> vector<8x128xf32>
    %c0_16 = arith.constant 0 : index
    %c0_17 = arith.constant 0 : index
    %c0_18 = arith.constant 0 : index
    %15 = vector.load %arg4[%c0_16, %c0_17, %c0_18] : memref<1x8x16xf32, #tpu.memory_space<vmem>>, vector<1x8x16xf32>
    %16 = vector.shape_cast %15 : vector<1x8x16xf32> to vector<8x16xf32>
    %cst_19 = arith.constant 0.000000e+00 : f32
    %17 = vector.broadcast %cst_19 : f32 to vector<8x16xf32>
    %18 = arith.cmpf oeq, %16, %17 : vector<8x16xf32>
    %cst_20 = arith.constant 0.000000e+00 : f32
    %19 = vector.broadcast %cst_20 : f32 to vector<8x128xf32>
    %20 = vector.extract_strided_slice %14 {offsets = [0, 0], sizes = [8, 32], strides = [1, 1]} : vector<8x128xf32> to vector<8x32xf32>
    %21 = arith.truncf %20 : vector<8x32xf32> to vector<8x32xbf16>
    %22 = vector.extract_strided_slice %9 {offsets = [0, 0], sizes = [16, 32], strides = [1, 1]} : vector<16x128xf32> to vector<16x32xf32>
    %23 = arith.truncf %22 : vector<16x32xf32> to vector<16x32xbf16>
    %24 = vector.extract_strided_slice %4 {offsets = [0, 0], sizes = [16, 32], strides = [1, 1]} : vector<16x128xf32> to vector<16x32xf32>
    %25 = arith.truncf %24 : vector<16x32xf32> to vector<16x32xbf16>
    %cst_21 = arith.constant dense<0.000000e+00> : vector<8x16xf32>
    %26 = tpu.matmul %21, %23, %cst_21 {dimension_numbers = #tpu.dot_dimension_numbers<[1], [1], [0], [0], [0, 0, 1, 0], [], []>} : vector<8x32xbf16>, vector<16x32xbf16>, vector<8x16xf32> -> vector<8x16xf32>
    %cst_22 = arith.constant -1.000000e+20 : f32
    %27 = vector.broadcast %cst_22 : f32 to vector<8x16xf32>
    %28 = arith.select %18, %27, %26 : vector<8x16xi1>, vector<8x16xf32>
    %cst_23 = arith.constant 0.0883883461 : f32
    %29 = vector.broadcast %cst_23 : f32 to vector<8x16xf32>
    %30 = arith.mulf %28, %29 : vector<8x16xf32>
    %cst_24 = arith.constant dense<0xFF800000> : vector<8xf32>
    %31 = vector.multi_reduction <maximumf>, %30, %cst_24 [1] : vector<8x16xf32> to vector<8xf32>
    %32 = vector.shape_cast %31 : vector<8xf32> to vector<8x1xf32>
    %33 = vector.broadcast %32 : vector<8x1xf32> to vector<8x16xf32>
    %34 = arith.subf %30, %33 : vector<8x16xf32>
    %35 = math.exp %34 : vector<8x16xf32>
    %cst_25 = arith.constant dense<0.000000e+00> : vector<8xf32>
    %36 = vector.multi_reduction <add>, %35, %cst_25 [1] : vector<8x16xf32> to vector<8xf32>
    %37 = vector.shape_cast %36 : vector<8xf32> to vector<8x1xf32>
    %38 = tpu.reciprocal %37 {approx = true} : vector<8x1xf32> -> vector<8x1xf32>
    %39 = vector.broadcast %38 : vector<8x1xf32> to vector<8x16xf32>
    %40 = arith.mulf %35, %39 : vector<8x16xf32>
    %41 = arith.truncf %40 : vector<8x16xf32> to vector<8x16xbf16>
    %cst_26 = arith.constant dense<0.000000e+00> : vector<8x32xf32>
    %42 = tpu.matmul %41, %25, %cst_26 {dimension_numbers = #tpu.dot_dimension_numbers<[1], [0], [0], [1], [0, 0, 1, 1], [], []>} : vector<8x16xbf16>, vector<16x32xbf16>, vector<8x32xf32> -> vector<8x32xf32>
    %43 = arith.truncf %42 : vector<8x32xf32> to vector<8x32xbf16>
    %c0_27 = arith.constant 0 : index
    %c0_28 = arith.constant 0 : index
    %44 = vector.load %arg8[%c0_27, %c0_28] : memref<128x128xbf16, #tpu.memory_space<vmem>>, vector<32x128xbf16>
    %cst_29 = arith.constant dense<0.000000e+00> : vector<8x128xf32>
    %45 = tpu.matmul %43, %44, %cst_29 {dimension_numbers = #tpu.dot_dimension_numbers<[1], [0], [0], [1], [0, 0, 1, 1], [], []>} : vector<8x32xbf16>, vector<32x128xbf16>, vector<8x128xf32> -> vector<8x128xf32>
    %46 = arith.addf %19, %45 : vector<8x128xf32>
    %47 = vector.extract_strided_slice %14 {offsets = [0, 32], sizes = [8, 32], strides = [1, 1]} : vector<8x128xf32> to vector<8x32xf32>
    %48 = arith.truncf %47 : vector<8x32xf32> to vector<8x32xbf16>
    %49 = vector.extract_strided_slice %9 {offsets = [0, 32], sizes = [16, 32], strides = [1, 1]} : vector<16x128xf32> to vector<16x32xf32>
    %50 = arith.truncf %49 : vector<16x32xf32> to vector<16x32xbf16>
    %51 = vector.extract_strided_slice %4 {offsets = [0, 32], sizes = [16, 32], strides = [1, 1]} : vector<16x128xf32> to vector<16x32xf32>
    %52 = arith.truncf %51 : vector<16x32xf32> to vector<16x32xbf16>
    %cst_30 = arith.constant dense<0.000000e+00> : vector<8x16xf32>
    %53 = tpu.matmul %48, %50, %cst_30 {dimension_numbers = #tpu.dot_dimension_numbers<[1], [1], [0], [0], [0, 0, 1, 0], [], []>} : vector<8x32xbf16>, vector<16x32xbf16>, vector<8x16xf32> -> vector<8x16xf32>
    %cst_31 = arith.constant -1.000000e+20 : f32
    %54 = vector.broadcast %cst_31 : f32 to vector<8x16xf32>
    %55 = arith.select %18, %54, %53 : vector<8x16xi1>, vector<8x16xf32>
    %cst_32 = arith.constant 0.0883883461 : f32
    %56 = vector.broadcast %cst_32 : f32 to vector<8x16xf32>
    %57 = arith.mulf %55, %56 : vector<8x16xf32>
    %cst_33 = arith.constant dense<0xFF800000> : vector<8xf32>
    %58 = vector.multi_reduction <maximumf>, %57, %cst_33 [1] : vector<8x16xf32> to vector<8xf32>
    %59 = vector.shape_cast %58 : vector<8xf32> to vector<8x1xf32>
    %60 = vector.broadcast %59 : vector<8x1xf32> to vector<8x16xf32>
    %61 = arith.subf %57, %60 : vector<8x16xf32>
    %62 = math.exp %61 : vector<8x16xf32>
    %cst_34 = arith.constant dense<0.000000e+00> : vector<8xf32>
    %63 = vector.multi_reduction <add>, %62, %cst_34 [1] : vector<8x16xf32> to vector<8xf32>
    %64 = vector.shape_cast %63 : vector<8xf32> to vector<8x1xf32>
    %65 = tpu.reciprocal %64 {approx = true} : vector<8x1xf32> -> vector<8x1xf32>
    %66 = vector.broadcast %65 : vector<8x1xf32> to vector<8x16xf32>
    %67 = arith.mulf %62, %66 : vector<8x16xf32>
    %68 = arith.truncf %67 : vector<8x16xf32> to vector<8x16xbf16>
    %cst_35 = arith.constant dense<0.000000e+00> : vector<8x32xf32>
    %69 = tpu.matmul %68, %52, %cst_35 {dimension_numbers = #tpu.dot_dimension_numbers<[1], [0], [0], [1], [0, 0, 1, 1], [], []>} : vector<8x16xbf16>, vector<16x32xbf16>, vector<8x32xf32> -> vector<8x32xf32>
    %70 = arith.truncf %69 : vector<8x32xf32> to vector<8x32xbf16>
    %c32 = arith.constant 32 : index
    %c0_36 = arith.constant 0 : index
    %71 = vector.load %arg8[%c32, %c0_36] : memref<128x128xbf16, #tpu.memory_space<vmem>>, vector<32x128xbf16>
    %cst_37 = arith.constant dense<0.000000e+00> : vector<8x128xf32>
    %72 = tpu.matmul %70, %71, %cst_37 {dimension_numbers = #tpu.dot_dimension_numbers<[1], [0], [0], [1], [0, 0, 1, 1], [], []>} : vector<8x32xbf16>, vector<32x128xbf16>, vector<8x128xf32> -> vector<8x128xf32>
    %73 = arith.addf %46, %72 : vector<8x128xf32>
    %74 = vector.extract_strided_slice %14 {offsets = [0, 64], sizes = [8, 32], strides = [1, 1]} : vector<8x128xf32> to vector<8x32xf32>
    %75 = arith.truncf %74 : vector<8x32xf32> to vector<8x32xbf16>
    %76 = vector.extract_strided_slice %9 {offsets = [0, 64], sizes = [16, 32], strides = [1, 1]} : vector<16x128xf32> to vector<16x32xf32>
    %77 = arith.truncf %76 : vector<16x32xf32> to vector<16x32xbf16>
    %78 = vector.extract_strided_slice %4 {offsets = [0, 64], sizes = [16, 32], strides = [1, 1]} : vector<16x128xf32> to vector<16x32xf32>
    %79 = arith.truncf %78 : vector<16x32xf32> to vector<16x32xbf16>
    %cst_38 = arith.constant dense<0.000000e+00> : vector<8x16xf32>
    %80 = tpu.matmul %75, %77, %cst_38 {dimension_numbers = #tpu.dot_dimension_numbers<[1], [1], [0], [0], [0, 0, 1, 0], [], []>} : vector<8x32xbf16>, vector<16x32xbf16>, vector<8x16xf32> -> vector<8x16xf32>
    %cst_39 = arith.constant -1.000000e+20 : f32
    %81 = vector.broadcast %cst_39 : f32 to vector<8x16xf32>
    %82 = arith.select %18, %81, %80 : vector<8x16xi1>, vector<8x16xf32>
    %cst_40 = arith.constant 0.0883883461 : f32
    %83 = vector.broadcast %cst_40 : f32 to vector<8x16xf32>
    %84 = arith.mulf %82, %83 : vector<8x16xf32>
    %cst_41 = arith.constant dense<0xFF800000> : vector<8xf32>
    %85 = vector.multi_reduction <maximumf>, %84, %cst_41 [1] : vector<8x16xf32> to vector<8xf32>
    %86 = vector.shape_cast %85 : vector<8xf32> to vector<8x1xf32>
    %87 = vector.broadcast %86 : vector<8x1xf32> to vector<8x16xf32>
    %88 = arith.subf %84, %87 : vector<8x16xf32>
    %89 = math.exp %88 : vector<8x16xf32>
    %cst_42 = arith.constant dense<0.000000e+00> : vector<8xf32>
    %90 = vector.multi_reduction <add>, %89, %cst_42 [1] : vector<8x16xf32> to vector<8xf32>
    %91 = vector.shape_cast %90 : vector<8xf32> to vector<8x1xf32>
    %92 = tpu.reciprocal %91 {approx = true} : vector<8x1xf32> -> vector<8x1xf32>
    %93 = vector.broadcast %92 : vector<8x1xf32> to vector<8x16xf32>
    %94 = arith.mulf %89, %93 : vector<8x16xf32>
    %95 = arith.truncf %94 : vector<8x16xf32> to vector<8x16xbf16>
    %cst_43 = arith.constant dense<0.000000e+00> : vector<8x32xf32>
    %96 = tpu.matmul %95, %79, %cst_43 {dimension_numbers = #tpu.dot_dimension_numbers<[1], [0], [0], [1], [0, 0, 1, 1], [], []>} : vector<8x16xbf16>, vector<16x32xbf16>, vector<8x32xf32> -> vector<8x32xf32>
    %97 = arith.truncf %96 : vector<8x32xf32> to vector<8x32xbf16>
    %c64 = arith.constant 64 : index
    %c0_44 = arith.constant 0 : index
    %98 = vector.load %arg8[%c64, %c0_44] : memref<128x128xbf16, #tpu.memory_space<vmem>>, vector<32x128xbf16>
    %cst_45 = arith.constant dense<0.000000e+00> : vector<8x128xf32>
    %99 = tpu.matmul %97, %98, %cst_45 {dimension_numbers = #tpu.dot_dimension_numbers<[1], [0], [0], [1], [0, 0, 1, 1], [], []>} : vector<8x32xbf16>, vector<32x128xbf16>, vector<8x128xf32> -> vector<8x128xf32>
    %100 = arith.addf %73, %99 : vector<8x128xf32>
    %101 = vector.extract_strided_slice %14 {offsets = [0, 96], sizes = [8, 32], strides = [1, 1]} : vector<8x128xf32> to vector<8x32xf32>
    %102 = arith.truncf %101 : vector<8x32xf32> to vector<8x32xbf16>
    %103 = vector.extract_strided_slice %9 {offsets = [0, 96], sizes = [16, 32], strides = [1, 1]} : vector<16x128xf32> to vector<16x32xf32>
    %104 = arith.truncf %103 : vector<16x32xf32> to vector<16x32xbf16>
    %105 = vector.extract_strided_slice %4 {offsets = [0, 96], sizes = [16, 32], strides = [1, 1]} : vector<16x128xf32> to vector<16x32xf32>
    %106 = arith.truncf %105 : vector<16x32xf32> to vector<16x32xbf16>
    %cst_46 = arith.constant dense<0.000000e+00> : vector<8x16xf32>
    %107 = tpu.matmul %102, %104, %cst_46 {dimension_numbers = #tpu.dot_dimension_numbers<[1], [1], [0], [0], [0, 0, 1, 0], [], []>} : vector<8x32xbf16>, vector<16x32xbf16>, vector<8x16xf32> -> vector<8x16xf32>
    %cst_47 = arith.constant -1.000000e+20 : f32
    %108 = vector.broadcast %cst_47 : f32 to vector<8x16xf32>
    %109 = arith.select %18, %108, %107 : vector<8x16xi1>, vector<8x16xf32>
    %cst_48 = arith.constant 0.0883883461 : f32
    %110 = vector.broadcast %cst_48 : f32 to vector<8x16xf32>
    %111 = arith.mulf %109, %110 : vector<8x16xf32>
    %cst_49 = arith.constant dense<0xFF800000> : vector<8xf32>
    %112 = vector.multi_reduction <maximumf>, %111, %cst_49 [1] : vector<8x16xf32> to vector<8xf32>
    %113 = vector.shape_cast %112 : vector<8xf32> to vector<8x1xf32>
    %114 = vector.broadcast %113 : vector<8x1xf32> to vector<8x16xf32>
    %115 = arith.subf %111, %114 : vector<8x16xf32>
    %116 = math.exp %115 : vector<8x16xf32>
    %cst_50 = arith.constant dense<0.000000e+00> : vector<8xf32>
    %117 = vector.multi_reduction <add>, %116, %cst_50 [1] : vector<8x16xf32> to vector<8xf32>
    %118 = vector.shape_cast %117 : vector<8xf32> to vector<8x1xf32>
    %119 = tpu.reciprocal %118 {approx = true} : vector<8x1xf32> -> vector<8x1xf32>
    %120 = vector.broadcast %119 : vector<8x1xf32> to vector<8x16xf32>
    %121 = arith.mulf %116, %120 : vector<8x16xf32>
    %122 = arith.truncf %121 : vector<8x16xf32> to vector<8x16xbf16>
    %cst_51 = arith.constant dense<0.000000e+00> : vector<8x32xf32>
    %123 = tpu.matmul %122, %106, %cst_51 {dimension_numbers = #tpu.dot_dimension_numbers<[1], [0], [0], [1], [0, 0, 1, 1], [], []>} : vector<8x16xbf16>, vector<16x32xbf16>, vector<8x32xf32> -> vector<8x32xf32>
    %124 = arith.truncf %123 : vector<8x32xf32> to vector<8x32xbf16>
    %c96 = arith.constant 96 : index
    %c0_52 = arith.constant 0 : index
    %125 = vector.load %arg8[%c96, %c0_52] : memref<128x128xbf16, #tpu.memory_space<vmem>>, vector<32x128xbf16>
    %cst_53 = arith.constant dense<0.000000e+00> : vector<8x128xf32>
    %126 = tpu.matmul %124, %125, %cst_53 {dimension_numbers = #tpu.dot_dimension_numbers<[1], [0], [0], [1], [0, 0, 1, 1], [], []>} : vector<8x32xbf16>, vector<32x128xbf16>, vector<8x128xf32> -> vector<8x128xf32>
    %127 = arith.addf %100, %126 : vector<8x128xf32>
    %c0_54 = arith.constant 0 : index
    %c0_55 = arith.constant 0 : index
    %128 = vector.load %arg9[%c0_54, %c0_55] : memref<1x128xf32, #tpu.memory_space<vmem>>, vector<1x128xf32>
    %129 = vector.broadcast %128 : vector<1x128xf32> to vector<8x128xf32>
    %130 = arith.addf %127, %129 : vector<8x128xf32>
    %c0_56 = arith.constant 0 : index
    %c0_57 = arith.constant 0 : index
    %c0_58 = arith.constant 0 : index
    %131 = vector.load %arg10[%c0_56, %c0_57, %c0_58] : memref<1x8x128xf32, #tpu.memory_space<vmem>>, vector<1x8x128xf32>
    %132 = vector.shape_cast %131 : vector<1x8x128xf32> to vector<8x128xf32>
    %133 = vector.shape_cast %130 : vector<8x128xf32> to vector<1x8x128xf32>
    tpu.vector_store %arg10[%c0_56, %c0_57, %c0_58], %133 {strides = array<i32>} : memref<1x8x128xf32, #tpu.memory_space<vmem>>, vector<1x8x128xf32>,
    return
  }
  func.func @transform_0(%arg0: i32) -> (i32, i32, i32) {
    %c0_i32 = arith.constant 0 : i32
    %c0_i32_0 = arith.constant 0 : i32
    %c0_i32_1 = arith.constant 0 : i32
    return %arg0, %c0_i32, %c0_i32_0 : i32, i32, i32
  }
  func.func @transform_1(%arg0: i32) -> (i32, i32, i32) {
    %c0_i32 = arith.constant 0 : i32
    %c0_i32_0 = arith.constant 0 : i32
    %c0_i32_1 = arith.constant 0 : i32
    return %arg0, %c0_i32, %c0_i32_0 : i32, i32, i32
  }
  func.func @transform_2(%arg0: i32) -> (i32, i32, i32) {
    %c0_i32 = arith.constant 0 : i32
    %c0_i32_0 = arith.constant 0 : i32
    %c0_i32_1 = arith.constant 0 : i32
    return %arg0, %c0_i32, %c0_i32_0 : i32, i32, i32
  }
  func.func @transform_3(%arg0: i32) -> (i32, i32, i32) {
    %c0_i32 = arith.constant 0 : i32
    %c0_i32_0 = arith.constant 0 : i32
    %c0_i32_1 = arith.constant 0 : i32
    return %arg0, %c0_i32, %c0_i32_0 : i32, i32, i32
  }
  func.func @transform_4(%arg0: i32) -> (i32, i32) {
    %c0_i32 = arith.constant 0 : i32
    %c0_i32_0 = arith.constant 0 : i32
    %c0_i32_1 = arith.constant 0 : i32
    return %c0_i32, %c0_i32_0 : i32, i32
  }
  func.func @transform_5(%arg0: i32) -> (i32, i32) {
    %c0_i32 = arith.constant 0 : i32
    %c0_i32_0 = arith.constant 0 : i32
    %c0_i32_1 = arith.constant 0 : i32
    return %c0_i32, %c0_i32_0 : i32, i32
  }
  func.func @transform_6(%arg0: i32) -> (i32, i32) {
    %c0_i32 = arith.constant 0 : i32
    %c0_i32_0 = arith.constant 0 : i32
    %c0_i32_1 = arith.constant 0 : i32
    return %c0_i32, %c0_i32_0 : i32, i32
  }
  func.func @transform_7(%arg0: i32) -> (i32, i32) {
    %c0_i32 = arith.constant 0 : i32
    %c0_i32_0 = arith.constant 0 : i32
    %c0_i32_1 = arith.constant 0 : i32
    return %c0_i32, %c0_i32_0 : i32, i32
  }
  func.func @transform_8(%arg0: i32) -> (i32, i32) {
    %c0_i32 = arith.constant 0 : i32
    %c0_i32_0 = arith.constant 0 : i32
    %c0_i32_1 = arith.constant 0 : i32
    return %c0_i32, %c0_i32_0 : i32, i32
  }
  func.func @transform_9(%arg0: i32) -> (i32, i32, i32) {
    %c0_i32 = arith.constant 0 : i32
    %c0_i32_0 = arith.constant 0 : i32
    %c0_i32_1 = arith.constant 0 : i32
    return %arg0, %c0_i32, %c0_i32_0 : i32, i32, i32
  }
}

module attributes {stable_mosaic.version = 11 : i64} {
  func.func @_block_ffn_kernel(%arg0: i32, %arg1: memref<1x8x128xf32, #tpu.memory_space<vmem>>, %arg2: memref<1x8x128xf32, #tpu.memory_space<vmem>>, %arg3: memref<1x128xf32, #tpu.memory_space<vmem>>, %arg4: memref<1x128xf32, #tpu.memory_space<vmem>>, %arg5: memref<128x512xbf16, #tpu.memory_space<vmem>>, %arg6: memref<1x512xf32, #tpu.memory_space<vmem>>, %arg7: memref<512x128xbf16, #tpu.memory_space<vmem>>, %arg8: memref<1x128xf32, #tpu.memory_space<vmem>>, %arg9: memref<1x128xf32, #tpu.memory_space<vmem>>, %arg10: memref<1x128xf32, #tpu.memory_space<vmem>>, %arg11: memref<1x8x128xf32, #tpu.memory_space<vmem>>) attributes {dimension_semantics = [#tpu.dimension_semantics<parallel>], iteration_bounds = array<i64: 2>, scalar_prefetch = 0 : i64, scratch_operands = 0 : i64, tpu.core_type = #tpu.core_type<tc>, window_params = [{transform_indices = @transform_0, window_bounds = array<i64: 1, 8, 128>}, {transform_indices = @transform_1, window_bounds = array<i64: 1, 8, 128>}, {pipeline_mode = #tpu.pipeline_mode<synchronous>, transform_indices = @transform_2, window_bounds = array<i64: 1, 128>}, {pipeline_mode = #tpu.pipeline_mode<synchronous>, transform_indices = @transform_3, window_bounds = array<i64: 1, 128>}, {pipeline_mode = #tpu.pipeline_mode<synchronous>, transform_indices = @transform_4, window_bounds = array<i64: 128, 512>}, {pipeline_mode = #tpu.pipeline_mode<synchronous>, transform_indices = @transform_5, window_bounds = array<i64: 1, 512>}, {pipeline_mode = #tpu.pipeline_mode<synchronous>, transform_indices = @transform_6, window_bounds = array<i64: 512, 128>}, {pipeline_mode = #tpu.pipeline_mode<synchronous>, transform_indices = @transform_7, window_bounds = array<i64: 1, 128>}, {pipeline_mode = #tpu.pipeline_mode<synchronous>, transform_indices = @transform_8, window_bounds = array<i64: 1, 128>}, {pipeline_mode = #tpu.pipeline_mode<synchronous>, transform_indices = @transform_9, window_bounds = array<i64: 1, 128>}, {transform_indices = @transform_10, window_bounds = array<i64: 1, 8, 128>}]} {
    %c0 = arith.constant 0 : index
    %c0_0 = arith.constant 0 : index
    %c0_1 = arith.constant 0 : index
    %0 = vector.load %arg1[%c0, %c0_0, %c0_1] : memref<1x8x128xf32, #tpu.memory_space<vmem>>, vector<1x8x128xf32>
    %1 = vector.shape_cast %0 : vector<1x8x128xf32> to vector<8x128xf32>
    %c0_2 = arith.constant 0 : index
    %c0_3 = arith.constant 0 : index
    %c0_4 = arith.constant 0 : index
    %2 = vector.load %arg2[%c0_2, %c0_3, %c0_4] : memref<1x8x128xf32, #tpu.memory_space<vmem>>, vector<1x8x128xf32>
    %3 = vector.shape_cast %2 : vector<1x8x128xf32> to vector<8x128xf32>
    %4 = arith.addf %1, %3 : vector<8x128xf32>
    %c0_5 = arith.constant 0 : index
    %c0_6 = arith.constant 0 : index
    %5 = vector.load %arg3[%c0_5, %c0_6] : memref<1x128xf32, #tpu.memory_space<vmem>>, vector<1x128xf32>
    %c0_7 = arith.constant 0 : index
    %c0_8 = arith.constant 0 : index
    %6 = vector.load %arg4[%c0_7, %c0_8] : memref<1x128xf32, #tpu.memory_space<vmem>>, vector<1x128xf32>
    %cst = arith.constant dense<0.000000e+00> : vector<8xf32>
    %7 = vector.multi_reduction <add>, %4, %cst [1] : vector<8x128xf32> to vector<8xf32>
    %8 = vector.shape_cast %7 : vector<8xf32> to vector<8x1xf32>
    %cst_9 = arith.constant 1.280000e+02 : f32
    %9 = vector.broadcast %cst_9 : f32 to vector<8x1xf32>
    %10 = arith.divf %8, %9 : vector<8x1xf32>
    %11 = vector.broadcast %10 : vector<8x1xf32> to vector<8x128xf32>
    %12 = arith.subf %4, %11 : vector<8x128xf32>
    %13 = arith.mulf %12, %12 : vector<8x128xf32>
    %cst_10 = arith.constant dense<0.000000e+00> : vector<8xf32>
    %14 = vector.multi_reduction <add>, %13, %cst_10 [1] : vector<8x128xf32> to vector<8xf32>
    %15 = vector.shape_cast %14 : vector<8xf32> to vector<8x1xf32>
    %cst_11 = arith.constant 1.280000e+02 : f32
    %16 = vector.broadcast %cst_11 : f32 to vector<8x1xf32>
    %17 = arith.divf %15, %16 : vector<8x1xf32>
    %cst_12 = arith.constant 9.99999974E-6 : f32
    %18 = vector.broadcast %cst_12 : f32 to vector<8x1xf32>
    %19 = arith.addf %17, %18 : vector<8x1xf32>
    %20 = math.rsqrt %19 : vector<8x1xf32>
    %21 = vector.broadcast %20 : vector<8x1xf32> to vector<8x128xf32>
    %22 = arith.mulf %12, %21 : vector<8x128xf32>
    %23 = vector.broadcast %5 : vector<1x128xf32> to vector<8x128xf32>
    %24 = arith.mulf %22, %23 : vector<8x128xf32>
    %25 = vector.broadcast %6 : vector<1x128xf32> to vector<8x128xf32>
    %26 = arith.addf %24, %25 : vector<8x128xf32>
    %27 = arith.truncf %26 : vector<8x128xf32> to vector<8x128xbf16>
    %c0_13 = arith.constant 0 : index
    %c0_14 = arith.constant 0 : index
    %28 = vector.load %arg5[%c0_13, %c0_14] : memref<128x512xbf16, #tpu.memory_space<vmem>>, vector<128x512xbf16>
    %cst_15 = arith.constant dense<0.000000e+00> : vector<8x512xf32>
    %29 = tpu.matmul %27, %28, %cst_15 {dimension_numbers = #tpu.dot_dimension_numbers<[1], [0], [0], [1], [0, 0, 1, 1], [], []>} : vector<8x128xbf16>, vector<128x512xbf16>, vector<8x512xf32> -> vector<8x512xf32>
    %c0_16 = arith.constant 0 : index
    %c0_17 = arith.constant 0 : index
    %30 = vector.load %arg6[%c0_16, %c0_17] : memref<1x512xf32, #tpu.memory_space<vmem>>, vector<1x512xf32>
    %31 = vector.broadcast %30 : vector<1x512xf32> to vector<8x512xf32>
    %32 = arith.addf %29, %31 : vector<8x512xf32>
    %cst_18 = arith.constant 0.000000e+00 : f32
    %33 = vector.broadcast %cst_18 : f32 to vector<8x512xf32>
    %34 = arith.maximumf %32, %33 : vector<8x512xf32>
    %35 = arith.truncf %34 : vector<8x512xf32> to vector<8x512xbf16>
    %c0_19 = arith.constant 0 : index
    %c0_20 = arith.constant 0 : index
    %36 = vector.load %arg7[%c0_19, %c0_20] : memref<512x128xbf16, #tpu.memory_space<vmem>>, vector<512x128xbf16>
    %cst_21 = arith.constant dense<0.000000e+00> : vector<8x128xf32>
    %37 = tpu.matmul %35, %36, %cst_21 {dimension_numbers = #tpu.dot_dimension_numbers<[1], [0], [0], [1], [0, 0, 1, 1], [], []>} : vector<8x512xbf16>, vector<512x128xbf16>, vector<8x128xf32> -> vector<8x128xf32>
    %c0_22 = arith.constant 0 : index
    %c0_23 = arith.constant 0 : index
    %38 = vector.load %arg8[%c0_22, %c0_23] : memref<1x128xf32, #tpu.memory_space<vmem>>, vector<1x128xf32>
    %39 = vector.broadcast %38 : vector<1x128xf32> to vector<8x128xf32>
    %40 = arith.addf %37, %39 : vector<8x128xf32>
    %41 = arith.addf %40, %26 : vector<8x128xf32>
    %c0_24 = arith.constant 0 : index
    %c0_25 = arith.constant 0 : index
    %42 = vector.load %arg9[%c0_24, %c0_25] : memref<1x128xf32, #tpu.memory_space<vmem>>, vector<1x128xf32>
    %c0_26 = arith.constant 0 : index
    %c0_27 = arith.constant 0 : index
    %43 = vector.load %arg10[%c0_26, %c0_27] : memref<1x128xf32, #tpu.memory_space<vmem>>, vector<1x128xf32>
    %cst_28 = arith.constant dense<0.000000e+00> : vector<8xf32>
    %44 = vector.multi_reduction <add>, %41, %cst_28 [1] : vector<8x128xf32> to vector<8xf32>
    %45 = vector.shape_cast %44 : vector<8xf32> to vector<8x1xf32>
    %cst_29 = arith.constant 1.280000e+02 : f32
    %46 = vector.broadcast %cst_29 : f32 to vector<8x1xf32>
    %47 = arith.divf %45, %46 : vector<8x1xf32>
    %48 = vector.broadcast %47 : vector<8x1xf32> to vector<8x128xf32>
    %49 = arith.subf %41, %48 : vector<8x128xf32>
    %50 = arith.mulf %49, %49 : vector<8x128xf32>
    %cst_30 = arith.constant dense<0.000000e+00> : vector<8xf32>
    %51 = vector.multi_reduction <add>, %50, %cst_30 [1] : vector<8x128xf32> to vector<8xf32>
    %52 = vector.shape_cast %51 : vector<8xf32> to vector<8x1xf32>
    %cst_31 = arith.constant 1.280000e+02 : f32
    %53 = vector.broadcast %cst_31 : f32 to vector<8x1xf32>
    %54 = arith.divf %52, %53 : vector<8x1xf32>
    %cst_32 = arith.constant 9.99999974E-6 : f32
    %55 = vector.broadcast %cst_32 : f32 to vector<8x1xf32>
    %56 = arith.addf %54, %55 : vector<8x1xf32>
    %57 = math.rsqrt %56 : vector<8x1xf32>
    %58 = vector.broadcast %57 : vector<8x1xf32> to vector<8x128xf32>
    %59 = arith.mulf %49, %58 : vector<8x128xf32>
    %60 = vector.broadcast %42 : vector<1x128xf32> to vector<8x128xf32>
    %61 = arith.mulf %59, %60 : vector<8x128xf32>
    %62 = vector.broadcast %43 : vector<1x128xf32> to vector<8x128xf32>
    %63 = arith.addf %61, %62 : vector<8x128xf32>
    %c0_33 = arith.constant 0 : index
    %c0_34 = arith.constant 0 : index
    %c0_35 = arith.constant 0 : index
    %64 = vector.load %arg11[%c0_33, %c0_34, %c0_35] : memref<1x8x128xf32, #tpu.memory_space<vmem>>, vector<1x8x128xf32>
    %65 = vector.shape_cast %64 : vector<1x8x128xf32> to vector<8x128xf32>
    %66 = vector.shape_cast %63 : vector<8x128xf32> to vector<1x8x128xf32>
    tpu.vector_store %arg11[%c0_33, %c0_34, %c0_35], %66 {strides = array<i32>} : memref<1x8x128xf32, #tpu.memory_space<vmem>>, vector<1x8x128xf32>,
    return
  }
  func.func @transform_0(%arg0: i32) -> (i32, i32, i32) {
    %c0_i32 = arith.constant 0 : i32
    %c0_i32_0 = arith.constant 0 : i32
    %c0_i32_1 = arith.constant 0 : i32
    return %arg0, %c0_i32, %c0_i32_0 : i32, i32, i32
  }
  func.func @transform_1(%arg0: i32) -> (i32, i32, i32) {
    %c0_i32 = arith.constant 0 : i32
    %c0_i32_0 = arith.constant 0 : i32
    %c0_i32_1 = arith.constant 0 : i32
    return %arg0, %c0_i32, %c0_i32_0 : i32, i32, i32
  }
  func.func @transform_2(%arg0: i32) -> (i32, i32) {
    %c0_i32 = arith.constant 0 : i32
    %c0_i32_0 = arith.constant 0 : i32
    %c0_i32_1 = arith.constant 0 : i32
    return %c0_i32, %c0_i32_0 : i32, i32
  }
  func.func @transform_3(%arg0: i32) -> (i32, i32) {
    %c0_i32 = arith.constant 0 : i32
    %c0_i32_0 = arith.constant 0 : i32
    %c0_i32_1 = arith.constant 0 : i32
    return %c0_i32, %c0_i32_0 : i32, i32
  }
  func.func @transform_4(%arg0: i32) -> (i32, i32) {
    %c0_i32 = arith.constant 0 : i32
    %c0_i32_0 = arith.constant 0 : i32
    %c0_i32_1 = arith.constant 0 : i32
    return %c0_i32, %c0_i32_0 : i32, i32
  }
  func.func @transform_5(%arg0: i32) -> (i32, i32) {
    %c0_i32 = arith.constant 0 : i32
    %c0_i32_0 = arith.constant 0 : i32
    %c0_i32_1 = arith.constant 0 : i32
    return %c0_i32, %c0_i32_0 : i32, i32
  }
  func.func @transform_6(%arg0: i32) -> (i32, i32) {
    %c0_i32 = arith.constant 0 : i32
    %c0_i32_0 = arith.constant 0 : i32
    %c0_i32_1 = arith.constant 0 : i32
    return %c0_i32, %c0_i32_0 : i32, i32
  }
  func.func @transform_7(%arg0: i32) -> (i32, i32) {
    %c0_i32 = arith.constant 0 : i32
    %c0_i32_0 = arith.constant 0 : i32
    %c0_i32_1 = arith.constant 0 : i32
    return %c0_i32, %c0_i32_0 : i32, i32
  }
  func.func @transform_8(%arg0: i32) -> (i32, i32) {
    %c0_i32 = arith.constant 0 : i32
    %c0_i32_0 = arith.constant 0 : i32
    %c0_i32_1 = arith.constant 0 : i32
    return %c0_i32, %c0_i32_0 : i32, i32
  }
  func.func @transform_9(%arg0: i32) -> (i32, i32) {
    %c0_i32 = arith.constant 0 : i32
    %c0_i32_0 = arith.constant 0 : i32
    %c0_i32_1 = arith.constant 0 : i32
    return %c0_i32, %c0_i32_0 : i32, i32
  }
  func.func @transform_10(%arg0: i32) -> (i32, i32, i32) {
    %c0_i32 = arith.constant 0 : i32
    %c0_i32_0 = arith.constant 0 : i32
    %c0_i32_1 = arith.constant 0 : i32
    return %arg0, %c0_i32, %c0_i32_0 : i32, i32, i32
  }
}

module attributes {stable_mosaic.version = 11 : i64} {
  func.func @_linear_kernel(%arg0: i32, %arg1: memref<1x8x128xf32, #tpu.memory_space<vmem>>, %arg2: memref<128x128xbf16, #tpu.memory_space<vmem>>, %arg3: memref<1x128xf32, #tpu.memory_space<vmem>>, %arg4: memref<1x8x128xf32, #tpu.memory_space<vmem>>) attributes {dimension_semantics = [#tpu.dimension_semantics<parallel>], iteration_bounds = array<i64: 2>, scalar_prefetch = 0 : i64, scratch_operands = 0 : i64, tpu.core_type = #tpu.core_type<tc>, window_params = [{transform_indices = @transform_0, window_bounds = array<i64: 1, 8, 128>}, {pipeline_mode = #tpu.pipeline_mode<synchronous>, transform_indices = @transform_1, window_bounds = array<i64: 128, 128>}, {pipeline_mode = #tpu.pipeline_mode<synchronous>, transform_indices = @transform_2, window_bounds = array<i64: 1, 128>}, {transform_indices = @transform_3, window_bounds = array<i64: 1, 8, 128>}]} {
    %c0 = arith.constant 0 : index
    %c0_0 = arith.constant 0 : index
    %c0_1 = arith.constant 0 : index
    %0 = vector.load %arg1[%c0, %c0_0, %c0_1] : memref<1x8x128xf32, #tpu.memory_space<vmem>>, vector<1x8x128xf32>
    %1 = vector.shape_cast %0 : vector<1x8x128xf32> to vector<8x128xf32>
    %2 = arith.truncf %1 : vector<8x128xf32> to vector<8x128xbf16>
    %c0_2 = arith.constant 0 : index
    %c0_3 = arith.constant 0 : index
    %3 = vector.load %arg2[%c0_2, %c0_3] : memref<128x128xbf16, #tpu.memory_space<vmem>>, vector<128x128xbf16>
    %cst = arith.constant dense<0.000000e+00> : vector<8x128xf32>
    %4 = tpu.matmul %2, %3, %cst {dimension_numbers = #tpu.dot_dimension_numbers<[1], [0], [0], [1], [0, 0, 1, 1], [], []>} : vector<8x128xbf16>, vector<128x128xbf16>, vector<8x128xf32> -> vector<8x128xf32>
    %c0_4 = arith.constant 0 : index
    %c0_5 = arith.constant 0 : index
    %5 = vector.load %arg3[%c0_4, %c0_5] : memref<1x128xf32, #tpu.memory_space<vmem>>, vector<1x128xf32>
    %6 = vector.broadcast %5 : vector<1x128xf32> to vector<8x128xf32>
    %7 = arith.addf %4, %6 : vector<8x128xf32>
    %c0_6 = arith.constant 0 : index
    %c0_7 = arith.constant 0 : index
    %c0_8 = arith.constant 0 : index
    %8 = vector.load %arg4[%c0_6, %c0_7, %c0_8] : memref<1x8x128xf32, #tpu.memory_space<vmem>>, vector<1x8x128xf32>
    %9 = vector.shape_cast %8 : vector<1x8x128xf32> to vector<8x128xf32>
    %10 = vector.shape_cast %7 : vector<8x128xf32> to vector<1x8x128xf32>
    tpu.vector_store %arg4[%c0_6, %c0_7, %c0_8], %10 {strides = array<i32>} : memref<1x8x128xf32, #tpu.memory_space<vmem>>, vector<1x8x128xf32>,
    return
  }
  func.func @transform_0(%arg0: i32) -> (i32, i32, i32) {
    %c0_i32 = arith.constant 0 : i32
    %c0_i32_0 = arith.constant 0 : i32
    %c0_i32_1 = arith.constant 0 : i32
    return %arg0, %c0_i32, %c0_i32_0 : i32, i32, i32
  }
  func.func @transform_1(%arg0: i32) -> (i32, i32) {
    %c0_i32 = arith.constant 0 : i32
    %c0_i32_0 = arith.constant 0 : i32
    %c0_i32_1 = arith.constant 0 : i32
    return %c0_i32, %c0_i32_0 : i32, i32
  }
  func.func @transform_2(%arg0: i32) -> (i32, i32) {
    %c0_i32 = arith.constant 0 : i32
    %c0_i32_0 = arith.constant 0 : i32
    %c0_i32_1 = arith.constant 0 : i32
    return %c0_i32, %c0_i32_0 : i32, i32
  }
  func.func @transform_3(%arg0: i32) -> (i32, i32, i32) {
    %c0_i32 = arith.constant 0 : i32
    %c0_i32_0 = arith.constant 0 : i32
    %c0_i32_1 = arith.constant 0 : i32
    return %arg0, %c0_i32, %c0_i32_0 : i32, i32, i32
  }
}

</mosaic_0001>

<bundles_post_ra>
// kernel: transformer_forward.18
= control target key start
LH: loop header
LB: loop body
LE: loop exit
PB: predicated region body
PF: predicated region fallthrough
CT: control target
= control target key end

     0   :  { %s362_s15 = smov 0   ;;  %s388_s0 = inlined_call_operand.vmem [shape: f32[2,8,128], index: 0, kind: input, shape index: {}]   ;;  %s389_s1 = inlined_call_operand.vmem [shape: f32[2,8,128], index: 1, kind: input, shape index: {}]   ;;  %s390_s2 = inlined_call_operand.vmem [shape: f32[1,128], index: 2, kind: input, shape index: {}]   ;;  %s391_s3 = inlined_call_operand.vmem [shape: f32[1,128], index: 3, kind: input, shape index: {}]   ;;  %s392_s4 = inlined_call_operand.vmem [shape: f32[2,8,128], index: 4, kind: output, shape index: {}]  }
   0x1 LB: > { %s307_s16 = sadd.s32 4294967295, %s335_s15   ;;  %p311_p0 = scmp.ge.s32.totalorder %s335_s15, 1  ;;  %s335_s15 = sphi %s362_s15, %s14_s15  }
   0x2   : > { %p170_p1 = scmp.lt.s32.totalorder %s335_s15, 3 }
   0x4   : > { %p171_p2 = pnand %p311_p0, %p170_p1 }
   0x5   : > { %p198_p3 = scmp.lt.s32.totalorder (!%p171_p2), %s307_s16, 1  ;;  %v315_v11 = vld [vmem:[%s390_s2] ss:$0 sm:$0xff] (!%p171_p2) }
   0x6   : > { %174 = sbr.rel (%p171_p2) target bundleno = 332 (0x14c), region = 36  ;;  %v316_v13 = vld [vmem:[%s391_s3] ss:$0 sm:$0xff] (!%p171_p2) }
   0xd   : > { %s394_s16 = smov (!%p198_p3, %s307_s16), 1 }
   0xe   : > { %s312_s17 = sshll.u32 %s394_s16, 3 }
   0xf   : > { %s201_s20 = scalar_lea.vmem %s388_s0, %s312_s17  ;;  %s205_s23 = scalar_lea.vmem %s389_s1, %s312_s17 }
  0x10   : > { %v210_v0 = vld [vmem:[%s201_s20] sm:$0xff]  ;;  %s209_s30 = scalar_lea.vmem %s392_s4, %s312_s17 }
  0x11   : > { %v211_v1 = vld [vmem:[%s205_s23] sm:$0xff] }
  0x12   : > { %v212_v2 = vadd.f32 %v211_v1, %v210_v0 }
  0x14   : > { %215 = vadd.xlane.f32.xlu0 %v212_v2 }
  0xa1   : > { %v216_v3 = vpop.xlane.xlu0 %215 }
  0xa2   : > { %v218_v4 = vmul.f32 0.0078125, %v216_v3 }
  0xa4   : > { %v219_v5 = vsub.f32 %v212_v2, %v218_v4 }
  0xa6   : > { %v220_v6 = vmul.f32 %v219_v5, %v219_v5 }
  0xa8   : > { %221 = vadd.xlane.f32.xlu0 %v220_v6 }
 0x135   : > { %v222_v7 = vpop.xlane.xlu0 %221 }
 0x136   : > { %v223_v8 = vmul.f32 0.0078125, %v222_v7 }
 0x138   : > { %v224_v9 = vadd.f32 1e-05, %v223_v8 }
 0x13a   : > { %327 = vrsqrt.f32 %v224_v9 }
 0x144   : > { %v328_v10 = vpop.eup %327 }
 0x145   : > { %v226_v12 = vmul.f32 %v328_v10, %v219_v5 }
 0x147   : > { %v233_v14 = vmul.f32 %v315_v11, %v226_v12 }
 0x149   : > { %v240_v15 = vadd.f32 %v316_v13, %v233_v14 }
 0x14b   : > { %241 = vst [vmem:[%s209_s30] sm:$0xff] %v240_v15 }
 0x14c PF: > { %s14_s15 = sadd.s32 1, %s335_s15  }
 0x14d   : > { %p11_p4 = scmp.ge.s32.totalorder %s14_s15, 4  }
 0x14f   :  { %13 = sbr.rel (!%p11_p4) target bundleno = 1 (0x1), region = 69 }

// kernel: transformer_forward.14
= control target key start
LH: loop header
LB: loop body
LE: loop exit
PB: predicated region body
PF: predicated region fallthrough
CT: control target
= control target key end

     0   :  { %s1487_s13 = smov 0   ;;  %s1740_s0 = inlined_call_operand.vmem [shape: f32[2,16,128], index: 0, kind: input, shape index: {}]   ;;  %s1741_s1 = inlined_call_operand.vmem [shape: f32[2,16,128], index: 1, kind: input, shape index: {}]   ;;  %s1742_s2 = inlined_call_operand.vmem [shape: f32[1,128], index: 2, kind: input, shape index: {}]   ;;  %s1743_s3 = inlined_call_operand.vmem [shape: f32[1,128], index: 3, kind: input, shape index: {}]   ;;  %s1744_s4 = inlined_call_operand.vmem [shape: bf16[128,512], index: 4, kind: input, shape index: {}]   ;;  %s1745_s5 = inlined_call_operand.vmem [shape: f32[1,512], index: 5, kind: input, shape index: {}]   ;;  %s1746_s6 = inlined_call_operand.vmem [shape: bf16[512,128], index: 6, kind: input, shape index: {}]   ;;  %s1747_s7 = inlined_call_operand.vmem [shape: f32[1,128], index: 7, kind: input, shape index: {}]   ;;  %s1748_s8 = inlined_call_operand.vmem [shape: f32[1,128], index: 8, kind: input, shape index: {}]   ;;  %s1749_s9 = inlined_call_operand.vmem [shape: f32[1,128], index: 9, kind: input, shape index: {}]   ;;  %s1750_s10 = inlined_call_operand.vmem [shape: f32[2,16,128], index: 10, kind: output, shape index: {}]  }
   0x1 LB: > { %s1197_s14 = sadd.s32 4294967295, %s1429_s13   ;;  %p1201_p0 = scmp.ge.s32.totalorder %s1429_s13, 1  ;;  %s1429_s13 = sphi %s1487_s13, %s20_s13  }
   0x2   : > { %p322_p1 = scmp.lt.s32.totalorder %s1429_s13, 3 }
   0x4   : > { %p323_p2 = pnand %p1201_p0, %p322_p1 }
   0x5   : > { %p365_p3 = scmp.lt.s32.totalorder (!%p323_p2), %s1197_s14, 1  ;;  %v1335_v6 = vld [vmem:[%s1744_s4 + $0x4] ss:$16 sps:$4 sm:$0xff] (!%p323_p2)   ;;  %v1337_v7 = vld [vmem:[%s1744_s4 + $0xc] ss:$16 sps:$4 sm:$0xff] (!%p323_p2)   ;;  %v1431_v40 = vmov (!%p323_p2), 0  }
   0x6   : > { %326 = sbr.rel (%p323_p2) target bundleno = 1094 (0x446), region = 60  ;;  %v1339_v8 = vld [vmem:[%s1744_s4] ss:$16 sps:$4 sm:$0xff] (!%p323_p2)   ;;  %v1340_v9 = vld [vmem:[%s1744_s4 + $0x8] ss:$16 sps:$4 sm:$0xff] (!%p323_p2)   ;;  %643 = vmatprep.subr.bf16.mxu0 (!%p323_p2), %v1335_v6  ;;  %686 = vmatprep.subr.bf16.mxu1 (!%p323_p2), %v1337_v7 }
   0x7   : > { %v1341_v10 = vld [vmem:[%s1744_s4 + $0x24] ss:$16 sps:$4 sm:$0xff] (!%p323_p2)   ;;  %v1343_v11 = vld [vmem:[%s1744_s4 + $0x2c] ss:$16 sps:$4 sm:$0xff] (!%p323_p2)   ;;  %644 = vmatpush1.bf16.msra.mxu0 (!%p323_p2), %v1339_v8  ;;  %687 = vmatpush1.bf16.msra.mxu1 (!%p323_p2), %v1340_v9  ;;  %v1345_v20 = vld [vmem:[%s1744_s4 + $0x20] ss:$16 sps:$4 sm:$0xff] (!%p323_p2)  }
   0x8   : > { %645 = vmatprep.subr.bf16.mxu0 (!%p323_p2), %v1341_v10  ;;  %688 = vmatprep.subr.bf16.mxu1 (!%p323_p2), %v1343_v11  ;;  %v1346_v21 = vld [vmem:[%s1744_s4 + $0x28] ss:$16 sps:$4 sm:$0xff] (!%p323_p2)   ;;  %v1347_v22 = vld [vmem:[%s1744_s4 + $0x44] ss:$16 sps:$4 sm:$0xff] (!%p323_p2)   ;;  %v1349_v23 = vld [vmem:[%s1744_s4 + $0x4c] ss:$16 sps:$4 sm:$0xff] (!%p323_p2)  }
   0x9   : > { %v1351_v24 = vld [vmem:[%s1744_s4 + $0x40] ss:$16 sps:$4 sm:$0xff] (!%p323_p2)   ;;  %v1352_v25 = vld [vmem:[%s1744_s4 + $0x48] ss:$16 sps:$4 sm:$0xff] (!%p323_p2)   ;;  %v1353_v26 = vld [vmem:[%s1744_s4 + $0x64] ss:$16 sps:$4 sm:$0xff] (!%p323_p2)   ;;  %675 = vmatprep.mubr.bf16.mxu0 (!%p323_p2), %v1431_v40  ;;  %718 = vmatprep.mubr.bf16.mxu1 (!%p323_p2), %v1431_v40 }
   0xa   : > { %v1355_v27 = vld [vmem:[%s1744_s4 + $0x6c] ss:$16 sps:$4 sm:$0xff] (!%p323_p2)   ;;  %v1357_v28 = vld [vmem:[%s1744_s4 + $0x60] ss:$16 sps:$4 sm:$0xff] (!%p323_p2)   ;;  %v1358_v29 = vld [vmem:[%s1744_s4 + $0x68] ss:$16 sps:$4 sm:$0xff] (!%p323_p2)  }
   0xb   : > { %646 = vmatpush1.bf16.msra.mxu0 (!%p323_p2), %v1345_v20  ;;  %689 = vmatpush1.bf16.msra.mxu1 (!%p323_p2), %v1346_v21  ;;  %v1359_v30 = vld [vmem:[%s1744_s4 + $0x84] ss:$16 sps:$4 sm:$0xff] (!%p323_p2)   ;;  %v1361_v31 = vld [vmem:[%s1744_s4 + $0x8c] ss:$16 sps:$4 sm:$0xff] (!%p323_p2)   ;;  %v1363_v32 = vld [vmem:[%s1744_s4 + $0x80] ss:$16 sps:$4 sm:$0xff] (!%p323_p2)  }
   0xc   : > { %647 = vmatprep.subr.bf16.mxu0 (!%p323_p2), %v1347_v22  ;;  %690 = vmatprep.subr.bf16.mxu1 (!%p323_p2), %v1349_v23  ;;  %v1364_v33 = vld [vmem:[%s1744_s4 + $0x88] ss:$16 sps:$4 sm:$0xff] (!%p323_p2)   ;;  %v1365_v34 = vld [vmem:[%s1744_s4 + $0xa4] ss:$16 sps:$4 sm:$0xff] (!%p323_p2)   ;;  %v1367_v35 = vld [vmem:[%s1744_s4 + $0xac] ss:$16 sps:$4 sm:$0xff] (!%p323_p2)  }
   0xd   : > { %s1752_s14 = smov (!%p365_p3, %s1197_s14), 1  ;;  %v1369_v36 = vld [vmem:[%s1744_s4 + $0xa0] ss:$16 sps:$4 sm:$0xff]   ;;  %v1370_v37 = vld [vmem:[%s1744_s4 + $0xa8] ss:$16 sps:$4 sm:$0xff]  }
   0xe   : > { %s1495_s15 = sshll.u32 %s1752_s14, 4  ;;  %v1371_v38 = vld [vmem:[%s1744_s4 + $0xc4] ss:$16 sps:$4 sm:$0xff]   ;;  %v1373_v39 = vld [vmem:[%s1744_s4 + $0xcc] ss:$16 sps:$4 sm:$0xff]  }
   0xf   : > { %s369_s18 = scalar_lea.vmem %s1740_s0, %s1495_s15  ;;  %s374_s21 = scalar_lea.vmem %s1741_s1, %s1495_s15  ;;  %648 = vmatpush1.bf16.msra.mxu0 %v1351_v24  ;;  %691 = vmatpush1.bf16.msra.mxu1 %v1352_v25  ;;  %v1375_v41 = vld [vmem:[%s1744_s4 + $0xc0] ss:$16 sps:$4 sm:$0xff]   ;;  %v1376_v42 = vld [vmem:[%s1744_s4 + $0xc8] ss:$16 sps:$4 sm:$0xff]   ;;  %v1377_v43 = vld [vmem:[%s1744_s4 + $0xe4] ss:$16 sps:$4 sm:$0xff]  }
  0x10   : > { %v381_v0 = vld [vmem:[%s369_s18] sm:$0xff]  ;;  %v382_v2 = vld [vmem:[%s369_s18 + $0x8] sm:$0xff]  ;;  %649 = vmatprep.subr.bf16.mxu0 %v1353_v26  ;;  %692 = vmatprep.subr.bf16.mxu1 %v1355_v27  ;;  %v1391_v8 = vld [vmem:[%s1746_s6 + $0x50] sm:$0xff]   ;;  %s379_s20 = scalar_lea.vmem %s1750_s10, %s1495_s15 }
  0x11   : > { %v383_v1 = vld [vmem:[%s374_s21] sm:$0xff]  ;;  %v384_v4 = vld [vmem:[%s374_s21 + $0x8] sm:$0xff]  ;;  %v1392_v9 = vld [vmem:[%s1746_s6 + $0xd0] sm:$0xff]  }
  0x12   : > { %v385_v3 = vadd.f32 %v383_v1, %v381_v0  ;;  %v386_v5 = vadd.f32 %v384_v4, %v382_v2  ;;  %v1379_v44 = vld [vmem:[%s1744_s4 + $0xec] ss:$16 sps:$4 sm:$0xff]   ;;  %v1381_v45 = vld [vmem:[%s1744_s4 + $0xe0] ss:$16 sps:$4 sm:$0xff]   ;;  %v1382_v46 = vld [vmem:[%s1744_s4 + $0xe8] ss:$16 sps:$4 sm:$0xff]  }
  0x13   : > { %650 = vmatpush1.bf16.msra.mxu0 %v1357_v28  ;;  %693 = vmatpush1.bf16.msra.mxu1 %v1358_v29  ;;  %v1383_v47 = vld [vmem:[%s1746_s6 + $0x40] sm:$0xff]   ;;  %v1387_v4 = vld [vmem:[%s1746_s6 + $0x48] sm:$0xff]   ;;  %v1393_v10 = vld [vmem:[%s1746_s6 + $0x10] sm:$0xff]  }
  0x14   : > { %389 = vadd.xlane.f32.xlu0 %v385_v3  ;;  %651 = vmatprep.subr.bf16.mxu0 %v1359_v30  ;;  %v1384_v48 = vld [vmem:[%s1746_s6 + $0xc0] sm:$0xff]   ;;  %v1389_v6 = vld [vmem:[%s1746_s6 + $0x8] sm:$0xff]   ;;  %v1394_v11 = vld [vmem:[%s1746_s6 + $0x90] sm:$0xff]  }
  0x15   : > { %694 = vmatprep.subr.bf16.mxu1 %v1361_v31  ;;  %v1208_v57 = vld [vmem:[%s1742_s2] ss:$0 sm:$0xff]  ;;  %v1390_v7 = vld [vmem:[%s1746_s6 + $0x88] sm:$0xff]   ;;  %v1407_v24 = vld [vmem:[%s1746_s6 + $0x70] sm:$0xff]  }
  0x16   : > { %v1209_v61 = vld [vmem:[%s1743_s3] ss:$0 sm:$0xff]  ;;  %v1403_v20 = vld [vmem:[%s1746_s6 + $0x68] sm:$0xff]   ;;  %v1408_v25 = vld [vmem:[%s1746_s6 + $0xf0] sm:$0xff]  }
  0x17   : > { %652 = vmatpush1.bf16.msra.mxu0 %v1363_v32  ;;  %695 = vmatpush1.bf16.msra.mxu1 %v1364_v33  ;;  %v1385_v1 = vld [vmem:[%s1746_s6] sm:$0xff]   ;;  %v1404_v21 = vld [vmem:[%s1746_s6 + $0xe8] sm:$0xff]   ;;  %v1409_v26 = vld [vmem:[%s1746_s6 + $0x30] sm:$0xff]   ;;  %v463_v32 = vlaneseq }
  0x18   : > { %391 = vadd.xlane.f32.xlu0 %v386_v5  ;;  %653 = vmatprep.subr.bf16.mxu0 %v1365_v34  ;;  %v1386_v2 = vld [vmem:[%s1746_s6 + $0x80] sm:$0xff]   ;;  %v1405_v22 = vld [vmem:[%s1746_s6 + $0x28] sm:$0xff]   ;;  %v1410_v27 = vld [vmem:[%s1746_s6 + $0xb0] sm:$0xff]  }
  0x19   : > { %696 = vmatprep.subr.bf16.mxu1 %v1367_v35  ;;  %v1406_v23 = vld [vmem:[%s1746_s6 + $0xa8] sm:$0xff]   ;;  %v1411_v28 = vld [vmem:[%s1746_s6 + $0x78] sm:$0xff]   ;;  %v464_v33 = vshrl.u32 %v463_v32, 7 }
  0x1a   : > { %v1412_v29 = vld [vmem:[%s1746_s6 + $0xf8] sm:$0xff]  }
  0x1b   : > { %654 = vmatpush1.bf16.msra.mxu0 %v1369_v36  ;;  %697 = vmatpush1.bf16.msra.mxu1 %v1370_v37  ;;  %v1413_v30 = vld [vmem:[%s1746_s6 + $0x38] sm:$0xff]   ;;  %v465_v34 = vsub.s32 0, %v464_v33  ;;  %v473_v35 = vsub.s32 2, %v464_v33  ;;  %v461_v36 = vld [vmem:[%s1745_s5] sm:$0xf]  ;;  %v469_v37 = vsub.s32 1, %v464_v33 }
  0x1c   : > { %655 = vmatprep.subr.bf16.mxu0 %v1371_v38  ;;  %698 = vmatprep.subr.bf16.mxu1 %v1373_v39  ;;  %v1414_v31 = vld [vmem:[%s1746_s6 + $0xb8] sm:$0xff]   ;;  %v477_v38 = vsub.s32 3, %v464_v33 }
  0x1d   : > { %v466_v39 = vrot.slane %v461_v36, %v465_v34  ;;  %v474_v40 = vrot.slane %v461_v36, %v473_v35 }
  0x1f   : > { %656 = vmatpush1.bf16.msra.mxu0 %v1375_v41  ;;  %699 = vmatpush1.bf16.msra.mxu1 %v1376_v42  ;;  %v470_v41 = vrot.slane %v461_v36, %v469_v37  ;;  %v478_v42 = vrot.slane %v461_v36, %v477_v38 }
  0x20   : > { %657 = vmatprep.subr.bf16.mxu0 %v1377_v43  ;;  %700 = vmatprep.subr.bf16.mxu1 %v1379_v44 }
  0x23   : > { %658 = vmatpush1.bf16.msra.mxu0 %v1381_v45  ;;  %701 = vmatpush1.bf16.msra.mxu1 %v1382_v46 }
  0x24   : > { %1282 = vmatprep.subr.bf16.mxu0 %v1383_v47  ;;  %1304 = vmatprep.subr.bf16.mxu1 %v1384_v48 }
  0xa1   : > { %v390_v12 = vpop.xlane.xlu0 %389 }
  0xa2   : > { %v394_v13 = vmul.f32 0.0078125, %v390_v12  ;;  %v1395_v12 = vld [vmem:[%s1746_s6 + $0x58] sm:$0xff]  }
  0xa4   : > { %v1523_v14 = vsub.f32 %v385_v3, %v394_v13  ;;  %v1396_v13 = vld [vmem:[%s1746_s6 + $0xd8] sm:$0xff]  }
  0xa5   : > { %v392_v15 = vpop.xlane.xlu0 %391 }
  0xa6   : > { %v395_v16 = vmul.f32 0.0078125, %v392_v15  ;;  %v398_v17 = vmul.f32 %v1523_v14, %v1523_v14  ;;  %v1398_v15 = vld [vmem:[%s1746_s6 + $0x98] sm:$0xff]  }
  0xa8   : > { %v1527_v18 = vsub.f32 %v386_v5, %v395_v16  ;;  %400 = vadd.xlane.f32.xlu1 %v398_v17  ;;  %v1388_v5 = vld [vmem:[%s1746_s6 + $0xc8] sm:$0xff]   ;;  %v1399_v16 = vld [vmem:[%s1746_s6 + $0x60] sm:$0xff]  }
  0xa9   : > { %v1400_v17 = vld [vmem:[%s1746_s6 + $0xe0] sm:$0xff]  }
  0xaa   : > { %v399_v19 = vmul.f32 %v1527_v18, %v1527_v18 }
  0xac   : > { %402 = vadd.xlane.f32.xlu1 %v399_v19  ;;  %v1402_v19 = vld [vmem:[%s1746_s6 + $0xa0] sm:$0xff]  }
 0x135   : > { %v401_v49 = vpop.xlane.xlu1 %400 }
 0x136   : > { %v404_v50 = vmul.f32 0.0078125, %v401_v49 }
 0x138   : > { %v406_v51 = vadd.f32 1e-05, %v404_v50 }
 0x139   : > { %v403_v52 = vpop.xlane.xlu1 %402 }
 0x13a   : > { %1415 = vrsqrt.f32 %v406_v51  ;;  %v405_v53 = vmul.f32 0.0078125, %v403_v52 }
 0x13c   : > { %v407_v54 = vadd.f32 1e-05, %v405_v53 }
 0x13e   : > { %1417 = vrsqrt.f32 %v407_v54 }
 0x144   : > { %v1416_v55 = vpop.eup %1415 }
 0x145   : > { %v410_v56 = vmul.f32 %v1416_v55, %v1523_v14  ;;  %v1397_v14 = vld [vmem:[%s1746_s6 + $0x18] sm:$0xff]  }
 0x147   : > { %v418_v60 = vmul.f32 %v1208_v57, %v410_v56 }
 0x148   : > { %v1418_v58 = vpop.eup %1417 }
 0x149   : > { %v411_v59 = vmul.f32 %v1418_v58, %v1527_v18  ;;  %v1623_v63 = vadd.f32 %v1209_v61, %v418_v60  ;;  %v1401_v18 = vld [vmem:[%s1746_s6 + $0x20] sm:$0xff]  }
 0x14b   : > { %v419_v62 = vmul.f32 %v1208_v57, %v411_v59 }
 0x14d   : > { %v1625_v0 = vadd.f32 %v1209_v61, %v419_v62 }
 0x14f   : > { %v428_v3 = vpack.c.bf16 %v1625_v0, %v1623_v63 }
 0x151   : > { %676 = vmatmul.mubr.bf16.vlgmr.msra.gmra.mrb[0].mxu0 %v428_v3  ;;  %719 = vmatmul.mubr.bf16.vlgmr.msra.gmra.mrb[0].mxu1 %v428_v3 }
 0x152   : > { %1283 = vmatpush3.bf16.msra.mxu0 %v1385_v1  ;;  %1305 = vmatpush3.bf16.msra.mxu1 %v1386_v2 }
 0x153   : > { %1284 = vmatprep.subr.bf16.mxu0 %v1387_v4  ;;  %1306 = vmatprep.subr.bf16.mxu1 %v1388_v5 }
 0x156   : > { %1285 = vmatpush3.bf16.msra.mxu0 %v1389_v6  ;;  %1307 = vmatpush3.bf16.msra.mxu1 %v1390_v7 }
 0x157   : > { %1286 = vmatprep.subr.bf16.mxu0 %v1391_v8  ;;  %1308 = vmatprep.subr.bf16.mxu1 %v1392_v9 }
 0x15a   : > { %1287 = vmatpush3.bf16.msra.mxu0 %v1393_v10  ;;  %1309 = vmatpush3.bf16.msra.mxu1 %v1394_v11  ;;  %v1242_v11 = vld [vmem:[%s1747_s7] ss:$0 sm:$0xff] }
 0x15b   : > { %1288 = vmatprep.subr.bf16.mxu0 %v1395_v12  ;;  %1310 = vmatprep.subr.bf16.mxu1 %v1396_v13 }
 0x15e   : > { %1289 = vmatpush3.bf16.msra.mxu0 %v1397_v14  ;;  %1311 = vmatpush3.bf16.msra.mxu1 %v1398_v15 }
 0x15f   : > { %1290 = vmatprep.subr.bf16.mxu0 %v1399_v16  ;;  %1312 = vmatprep.subr.bf16.mxu1 %v1400_v17 }
 0x162   : > { %1291 = vmatpush3.bf16.msra.mxu0 %v1401_v18  ;;  %1313 = vmatpush3.bf16.msra.mxu1 %v1402_v19 }
 0x163   : > { %1292 = vmatprep.subr.bf16.mxu0 %v1403_v20  ;;  %1314 = vmatprep.subr.bf16.mxu1 %v1404_v21 }
 0x166   : > { %1293 = vmatpush3.bf16.msra.mxu0 %v1405_v22  ;;  %1315 = vmatpush3.bf16.msra.mxu1 %v1406_v23 }
 0x167   : > { %1294 = vmatprep.subr.bf16.mxu0 %v1407_v24  ;;  %1316 = vmatprep.subr.bf16.mxu1 %v1408_v25 }
 0x16a   : > { %1295 = vmatpush3.bf16.msra.mxu0 %v1409_v26  ;;  %1317 = vmatpush3.bf16.msra.mxu1 %v1410_v27 }
 0x16b   : > { %1296 = vmatprep.subr.bf16.mxu0 %v1411_v28  ;;  %1318 = vmatprep.subr.bf16.mxu1 %v1412_v29 }
 0x16e   : > { %1297 = vmatpush3.bf16.msra.mxu0 %v1413_v30  ;;  %1319 = vmatpush3.bf16.msra.mxu1 %v1414_v31 }
 0x224   : > { %v677_v43 = vpop.f32.mrb[0].mxu0  ;;  %v720_v44 = vpop.f32.mrb[0].mxu1 }
 0x225   : > { %v678_v45 = vadd.f32 %v677_v43, %v466_v39  ;;  %v721_v46 = vadd.f32 %v720_v44, %v474_v40  ;;  %v679_v47 = vpop.f32.mrb[1].mxu0  ;;  %v722_v48 = vpop.f32.mrb[1].mxu1  ;;  %v1276_v44 = vld [vmem:[%s1749_s9] ss:$0 sm:$0xff] }
 0x226   : > { %v680_v49 = vadd.f32 %v679_v47, %v470_v41  ;;  %v723_v50 = vadd.f32 %v722_v48, %v478_v42  ;;  %v681_v51 = vpop.f32.mrb[2].mxu0  ;;  %v724_v52 = vpop.f32.mrb[2].mxu1 }
 0x227   : > { %v682_v53 = vadd.f32 %v681_v51, %v466_v39  ;;  %v725_v54 = vadd.f32 %v724_v52, %v474_v40  ;;  %v683_v55 = vpop.f32.mrb[3].mxu0  ;;  %v726_v56 = vpop.f32.mrb[3].mxu1  ;;  %v729_v59 = vmax.f32 %v678_v45, 0.0  ;;  %v731_v60 = vmax.f32 %v721_v46, 0.0 }
 0x228   : > { %v684_v57 = vadd.f32 %v683_v55, %v470_v41  ;;  %v727_v58 = vadd.f32 %v726_v56, %v478_v42  ;;  %v730_v1 = vmax.f32 %v680_v49, 0.0  ;;  %v732_v2 = vmax.f32 %v723_v50, 0.0  ;;  %v1275_v41 = vld [vmem:[%s1748_s8] ss:$0 sm:$0xff] }
 0x229   : > { %v733_v61 = vmax.f32 %v682_v53, 0.0  ;;  %v735_v62 = vmax.f32 %v725_v54, 0.0 }
 0x22a   : > { %v734_v3 = vmax.f32 %v684_v57, 0.0  ;;  %v736_v4 = vmax.f32 %v727_v58, 0.0 }
 0x22b   : > { %v737_v5 = vpack.c.bf16 %v733_v61, %v729_v59  ;;  %v739_v6 = vpack.c.bf16 %v735_v62, %v731_v60 }
 0x22c   : > { %v738_v7 = vpack.c.bf16 %v734_v3, %v730_v1  ;;  %v740_v8 = vpack.c.bf16 %v736_v4, %v732_v2 }
 0x22e   : > { %1036 = vmatprep.mubr.bf16.mxu0 %v738_v7  ;;  %1077 = vmatprep.mubr.bf16.mxu1 %v740_v8 }
 0x22f   : > { %1037 = vmatmul.mubr.bf16.vlgmr.msra.gmra.mrb[4].mxu0 %v737_v5  ;;  %1078 = vmatmul.mubr.bf16.vlgmr.msra.gmra.mrb[4].mxu1 %v739_v6 }
 0x302   : > { %v1298_v9 = vpop.f32.mrb[4].mxu0  ;;  %v1320_v10 = vpop.f32.mrb[4].mxu1 }
 0x303   : > { %v1299_v12 = vpop.f32.mrb[5].mxu0  ;;  %v1321_v13 = vpop.f32.mrb[5].mxu1 }
 0x304   : > { %v1300_v14 = vadd.f32 %v1299_v12, %v1298_v9  ;;  %v1322_v15 = vadd.f32 %v1321_v13, %v1320_v10  ;;  %v1301_v16 = vpop.f32.mrb[6].mxu0  ;;  %v1323_v17 = vpop.f32.mrb[6].mxu1 }
 0x305   : > { %v1302_v18 = vpop.f32.mrb[7].mxu0  ;;  %v1324_v19 = vpop.f32.mrb[7].mxu1 }
 0x306   : > { %v1039_v20 = vadd.f32 %v1300_v14, %v1242_v11  ;;  %v1303_v21 = vadd.f32 %v1302_v18, %v1301_v16  ;;  %v1325_v22 = vadd.f32 %v1324_v19, %v1323_v17 }
 0x308   : > { %v1080_v23 = vadd.f32 %v1322_v15, %v1039_v20  ;;  %v1042_v24 = vadd.f32 %v1303_v21, %v1242_v11 }
 0x30a   : > { %v1083_v25 = vadd.f32 %v1325_v22, %v1042_v24  ;;  %v1086_v26 = vadd.f32 %v1080_v23, %v1623_v63 }
 0x30c   : > { %1090 = vadd.xlane.f32.xlu0 %v1086_v26  ;;  %v1087_v27 = vadd.f32 %v1083_v25, %v1625_v0 }
 0x30e   : > { %1092 = vadd.xlane.f32.xlu1 %v1087_v27 }
 0x399   : > { %v1091_v28 = vpop.xlane.xlu0 %1090 }
 0x39a   : > { %v1094_v29 = vmul.f32 0.0078125, %v1091_v28 }
 0x39b   : > { %v1093_v30 = vpop.xlane.xlu1 %1092 }
 0x39c   : > { %v1096_v31 = vsub.f32 %v1086_v26, %v1094_v29  ;;  %v1095_v32 = vmul.f32 0.0078125, %v1093_v30 }
 0x39e   : > { %v1097_v33 = vsub.f32 %v1087_v27, %v1095_v32  ;;  %v1098_v34 = vmul.f32 %v1096_v31, %v1096_v31 }
 0x3a0   : > { %1100 = vadd.xlane.f32.xlu0 %v1098_v34  ;;  %v1099_v35 = vmul.f32 %v1097_v33, %v1097_v33 }
 0x3a2   : > { %1102 = vadd.xlane.f32.xlu1 %v1099_v35 }
 0x42d   : > { %v1101_v36 = vpop.xlane.xlu0 %1100 }
 0x42e   : > { %v1104_v37 = vmul.f32 0.0078125, %v1101_v36 }
 0x42f   : > { %v1103_v38 = vpop.xlane.xlu1 %1102 }
 0x430   : > { %v1106_v39 = vadd.f32 1e-05, %v1104_v37  ;;  %v1105_v63 = vmul.f32 0.0078125, %v1103_v38 }
 0x432   : > { %1419 = vrsqrt.f32 %v1106_v39  ;;  %v1107_v40 = vadd.f32 1e-05, %v1105_v63 }
 0x434   : > { %1421 = vrsqrt.f32 %v1107_v40 }
 0x43c   : > { %v1420_v0 = vpop.eup %1419 }
 0x43d   : > { %v1110_v42 = vmul.f32 %v1420_v0, %v1096_v31 }
 0x43e   : > { %v1422_v43 = vpop.eup %1421 }
 0x43f   : > { %v1118_v45 = vmul.f32 %v1275_v41, %v1110_v42  ;;  %v1111_v46 = vmul.f32 %v1422_v43, %v1097_v33 }
 0x441   : > { %v1126_v47 = vadd.f32 %v1276_v44, %v1118_v45  ;;  %v1119_v48 = vmul.f32 %v1275_v41, %v1111_v46 }
 0x443   : > { %1128 = vst [vmem:[%s379_s20] sm:$0xff] %v1126_v47  ;;  %v1127_v49 = vadd.f32 %v1276_v44, %v1119_v48 }
 0x445   : > { %1129 = vst [vmem:[%s379_s20 + $0x8] sm:$0xff] %v1127_v49 }
 0x446 PF: > { %s20_s13 = sadd.s32 1, %s1429_s13  }
 0x447   : > { %p17_p4 = scmp.ge.s32.totalorder %s20_s13, 4  }
 0x449   :  { %19 = sbr.rel (!%p17_p4) target bundleno = 1 (0x1), region = 93 }

// kernel: transformer_forward.13
= control target key start
LH: loop header
LB: loop body
LE: loop exit
PB: predicated region body
PF: predicated region fallthrough
CT: control target
= control target key end

     0   :  { %s1975_s30 = smov 0   ;;  %s2268_s0 = inlined_call_operand.vmem [shape: f32[2,16,128], index: 0, kind: input, shape index: {}, may-alias: {0,1,2}]   ;;  %s2269_s1 = inlined_call_operand.vmem [shape: f32[2,16,128], index: 1, kind: input, shape index: {}, may-alias: {0,1,2}]   ;;  %s2270_s2 = inlined_call_operand.vmem [shape: f32[2,16,128], index: 2, kind: input, shape index: {}, may-alias: {0,1,2}]   ;;  %s2271_s3 = inlined_call_operand.vmem [shape: f32[2,16,16], index: 3, kind: input, shape index: {}]   ;;  %s2272_s4 = inlined_call_operand.vmem [shape: bf16[128,128], index: 4, kind: input, shape index: {}]   ;;  %s2273_s5 = inlined_call_operand.vmem [shape: bf16[128,128], index: 5, kind: input, shape index: {}]   ;;  %s2274_s6 = inlined_call_operand.vmem [shape: bf16[128,128], index: 6, kind: input, shape index: {}]   ;;  %s2275_s7 = inlined_call_operand.vmem [shape: bf16[128,128], index: 7, kind: input, shape index: {}]   ;;  %s2276_s8 = inlined_call_operand.vmem [shape: f32[1,128], index: 8, kind: input, shape index: {}]   ;;  %s2277_s9 = inlined_call_operand.vmem [shape: f32[2,16,128], index: 9, kind: output, shape index: {}]  }
   0x1 LB: > { %s1573_s10 = sadd.s32 4294967295, %s1918_s30   ;;  %p1577_p0 = scmp.ge.s32.totalorder %s1918_s30, 1  ;;  %s1918_s30 = sphi %s1975_s30, %s19_s30  }
   0x2   : > { %p317_p1 = scmp.lt.s32.totalorder %s1918_s30, 3 }
   0x4   : > { %p318_p2 = pnand %p1577_p0, %p317_p1 }
   0x5   : > { %v1848_v0 = vld [vmem:[%s2272_s4] sm:$0xff] (!%p318_p2)   ;;  %v1920_v1 = vmov (!%p318_p2), 0.0   ;;  %v1849_v2 = vld [vmem:[%s2272_s4 + $0x8] sm:$0xff] (!%p318_p2)   ;;  %vm1921_vm0 = vmmov (!%p318_p2), 0   ;;  %v1850_v3 = vld [vmem:[%s2272_s4 + $0x10] sm:$0xff] (!%p318_p2)   ;;  %p368_p3 = scmp.lt.s32.totalorder (!%p318_p2), %s1573_s10, 1 }
   0x6   : > { %321 = sbr.rel (%p318_p2) target bundleno = 3097 (0xc19), region = 56  ;;  %1695 = vmatprep.subr.bf16.mxu0 (!%p318_p2), %v1920_v1  ;;  %1715 = vmatprep.subr.bf16.mxu1 (!%p318_p2), %v1920_v1  ;;  %v1854_v4 = vld [vmem:[%s2273_s5] sm:$0xff] (!%p318_p2)   ;;  %v1856_v5 = vld [vmem:[%s2273_s5 + $0x8] sm:$0xff] (!%p318_p2)   ;;  %v1851_v6 = vld [vmem:[%s2272_s4 + $0x18] sm:$0xff] (!%p318_p2)   ;;  %vm725_vm1 = vcmask (!%p318_p2), 261120   ;;  %vm777_vm4 = vcmask (!%p318_p2), 130048  }
   0x7   : > { %1696 = vmatpush3.bf16.msra.mxu0 (!%p318_p2), %v1848_v0  ;;  %1711 = vmatprep.mubr.msk.bf16.mxu0 (!%p318_p2), %vm1921_vm0, %v1920_v1  ;;  %v1858_v7 = vld [vmem:[%s2273_s5 + $0x10] sm:$0xff] (!%p318_p2)   ;;  %v1852_v8 = vld [vmem:[%s2272_s4 + $0x20] sm:$0xff] (!%p318_p2)   ;;  %v1859_v9 = vld [vmem:[%s2273_s5 + $0x18] sm:$0xff] (!%p318_p2)   ;;  %s1922_s15 = smov (!%p318_p2), 96   ;;  %s1923_s16 = smov (!%p318_p2), 64  }
   0x8   : > { %1697 = vmatprep.subr.bf16.mxu0 (!%p318_p2), %v1920_v1  ;;  %1731 = vmatprep.mubr.msk.bf16.mxu1 (!%p318_p2), %vm1921_vm0, %v1920_v1  ;;  %v1853_v10 = vld [vmem:[%s2272_s4 + $0x28] sm:$0xff] (!%p318_p2)   ;;  %v1861_v11 = vld [vmem:[%s2273_s5 + $0x20] sm:$0xff] (!%p318_p2)   ;;  %v1855_v12 = vld [vmem:[%s2272_s4 + $0x30] sm:$0xff] (!%p318_p2)   ;;  %s1924_s24 = smov (!%p318_p2), 32  }
   0x9   : > { %1716 = vmatpush3.bf16.msra.mxu1 (!%p318_p2), %v1854_v4  ;;  %v1863_v13 = vld [vmem:[%s2273_s5 + $0x28] sm:$0xff] (!%p318_p2)   ;;  %v1857_v14 = vld [vmem:[%s2272_s4 + $0x38] sm:$0xff] (!%p318_p2)   ;;  %v1865_v17 = vld [vmem:[%s2273_s5 + $0x30] sm:$0xff] (!%p318_p2)  }
   0xa   : > { %1717 = vmatprep.subr.bf16.mxu1 (!%p318_p2), %v1920_v1  ;;  %v1860_v18 = vld [vmem:[%s2274_s6] sm:$0xff] (!%p318_p2)   ;;  %v1867_v20 = vld [vmem:[%s2273_s5 + $0x38] sm:$0xff] (!%p318_p2)   ;;  %v1862_v23 = vld [vmem:[%s2274_s6 + $0x8] sm:$0xff] (!%p318_p2)  }
   0xb   : > { %1698 = vmatpush3.bf16.msra.mxu0 (!%p318_p2), %v1849_v2  ;;  %v1864_v25 = vld [vmem:[%s2274_s6 + $0x10] sm:$0xff] (!%p318_p2)   ;;  %v1866_v26 = vld [vmem:[%s2274_s6 + $0x18] sm:$0xff] (!%p318_p2)   ;;  %v1868_v27 = vld [vmem:[%s2274_s6 + $0x20] sm:$0xff] (!%p318_p2)  }
   0xc   : > { %1699 = vmatprep.subr.bf16.mxu0 (!%p318_p2), %v1920_v1  ;;  %v1869_v28 = vld [vmem:[%s2274_s6 + $0x28] sm:$0xff] (!%p318_p2)   ;;  %v1870_v29 = vld [vmem:[%s2274_s6 + $0x30] sm:$0xff] (!%p318_p2)   ;;  %v1871_v30 = vld [vmem:[%s2274_s6 + $0x38] sm:$0xff] (!%p318_p2)  }
   0xd   : > { %1718 = vmatpush3.bf16.msra.mxu1 %v1856_v5  ;;  %s2279_s10 = smov (!%p368_p3, %s1573_s10), 1 }
   0xe   : > { %1719 = vmatprep.subr.bf16.mxu1 %v1920_v1  ;;  %s2031_s12 = sshll.u32 %s2279_s10, 4 }
   0xf   : > { %1700 = vmatpush3.bf16.msra.mxu0 %v1850_v3  ;;  %s372_s19 = scalar_lea.vmem %s2268_s0, %s2031_s12  ;;  %s377_s29 = scalar_lea.vmem %s2269_s1, %s2031_s12 }
  0x10   : > { %1701 = vmatprep.subr.bf16.mxu0 %v1920_v1  ;;  %v394_v15 = vld [vmem:[%s372_s19] sm:$0xff]  ;;  %v395_v16 = vld [vmem:[%s372_s19 + $0x8] sm:$0xff]  ;;  %s382_s27 = scalar_lea.vmem %s2270_s2, %s2031_s12  ;;  %s387_s14 = scalar_lea.vmem %s2271_s3, %s2031_s12 }
  0x11   : > { %1720 = vmatpush3.bf16.msra.mxu1 %v1858_v7  ;;  %v396_v19 = vpack.c.bf16 %v395_v16, %v394_v15  ;;  %v502_v21 = vld [vmem:[%s377_s29] sm:$0xff]  ;;  %v503_v22 = vld [vmem:[%s377_s29 + $0x8] sm:$0xff]  ;;  %s392_s19 = scalar_lea.vmem %s2277_s9, %s2031_s12 }
  0x12   : > { %1721 = vmatprep.subr.bf16.mxu1 %v1920_v1  ;;  %v504_v24 = vpack.c.bf16 %v503_v22, %v502_v21  ;;  %v610_v31 = vld [vmem:[%s382_s27] sm:$0xff]  ;;  %v611_v32 = vld [vmem:[%s382_s27 + $0x8] sm:$0xff] }
  0x13   : > { %1702 = vmatpush3.bf16.msra.mxu0 %v1851_v6  ;;  %v612_v33 = vpack.c.bf16 %v611_v32, %v610_v31  ;;  %v2128_v50 = vld [vmem:[%s387_s14] sm:$0xff]  ;;  %v2130_v51 = vld [vmem:[%s387_s14 + $0x8] sm:$0xff] }
  0x14   : > { %1703 = vmatprep.subr.bf16.mxu0 %v1920_v1  ;;  %vm720_vm2 = vcmp.eq.f32.partialorder %v2128_v50, 0.0  ;;  %vm721_vm3 = vcmp.eq.f32.partialorder %v2130_v51, 0.0 }
  0x15   : > { %1722 = vmatpush3.bf16.msra.mxu1 %v1859_v9 }
  0x16   : > { %1723 = vmatprep.subr.bf16.mxu1 %v1920_v1 }
  0x17   : > { %1704 = vmatpush3.bf16.msra.mxu0 %v1852_v8 }
  0x18   : > { %1705 = vmatprep.subr.bf16.mxu0 %v1920_v1 }
  0x19   : > { %1724 = vmatpush3.bf16.msra.mxu1 %v1861_v11 }
  0x1a   : > { %1725 = vmatprep.subr.bf16.mxu1 %v1920_v1 }
  0x1b   : > { %1706 = vmatpush3.bf16.msra.mxu0 %v1853_v10 }
  0x1c   : > { %1707 = vmatprep.subr.bf16.mxu0 %v1920_v1 }
  0x1d   : > { %1726 = vmatpush3.bf16.msra.mxu1 %v1863_v13 }
  0x1e   : > { %1727 = vmatprep.subr.bf16.mxu1 %v1920_v1 }
  0x1f   : > { %1708 = vmatpush3.bf16.msra.mxu0 %v1855_v12 }
  0x20   : > { %1709 = vmatprep.subr.bf16.mxu0 %v1920_v1 }
  0x21   : > { %1728 = vmatpush3.bf16.msra.mxu1 %v1865_v17 }
  0x22   : > { %1729 = vmatprep.subr.bf16.mxu1 %v1920_v1 }
  0x23   : > { %1710 = vmatpush3.bf16.msra.mxu0 %v1857_v14 }
  0x24   : > { %1735 = vmatprep.subr.bf16.mxu0 %v1920_v1 }
  0x25   : > { %1730 = vmatpush3.bf16.msra.mxu1 %v1867_v20 }
  0x26   : > { %1712 = vmatmul.mubr.bf16.vlgmr.msra.gmra.mrb[0].mxu0 %v396_v19  ;;  %1755 = vmatprep.subr.bf16.mxu1 %v1920_v1 }
  0x27   : > { %1736 = vmatpush3.bf16.msra.mxu0 %v1860_v18  ;;  %1751 = vmatprep.mubr.msk.bf16.mxu0 %vm1921_vm0, %v1920_v1 }
  0x28   : > { %1737 = vmatprep.subr.bf16.mxu0 %v1920_v1  ;;  %1732 = vmatmul.mubr.bf16.vlgmr.msra.gmra.mrb[0].mxu1 %v504_v24 }
  0x29   : > { %1757 = vmatprep.mubr.msk.bf16.mxu1 %vm1921_vm0, %v1920_v1 }
  0x2b   : > { %1738 = vmatpush3.bf16.msra.mxu0 %v1862_v23 }
  0x2c   : > { %1739 = vmatprep.subr.bf16.mxu0 %v1920_v1 }
  0x2f   : > { %1740 = vmatpush3.bf16.msra.mxu0 %v1864_v25 }
  0x30   : > { %1741 = vmatprep.subr.bf16.mxu0 %v1920_v1 }
  0x33   : > { %1742 = vmatpush3.bf16.msra.mxu0 %v1866_v26 }
  0x34   : > { %1743 = vmatprep.subr.bf16.mxu0 %v1920_v1 }
  0x37   : > { %1744 = vmatpush3.bf16.msra.mxu0 %v1868_v27 }
  0x38   : > { %1745 = vmatprep.subr.bf16.mxu0 %v1920_v1 }
  0x3b   : > { %1746 = vmatpush3.bf16.msra.mxu0 %v1869_v28 }
  0x3c   : > { %1747 = vmatprep.subr.bf16.mxu0 %v1920_v1 }
  0x3f   : > { %1748 = vmatpush3.bf16.msra.mxu0 %v1870_v29 }
  0x40   : > { %1749 = vmatprep.subr.bf16.mxu0 %v1920_v1 }
  0x43   : > { %1750 = vmatpush3.bf16.msra.mxu0 %v1871_v30 }
  0x44   : > { %1779 = vmatprep.subr.bf16.mxu0 %v1920_v1 }
  0x46   : > { %1752 = vmatmul.mubr.bf16.vlgmr.msra.gmra.mrb[4].mxu0 %v612_v33 }
  0x47   : > { %1783 = vmatprep.mubr.msk.bf16.mxu0 %vm1921_vm0, %v1920_v1 }
  0xf9   : > { %v495_v34 = vpop.f32.mrb[0].mxu0 }
  0xfa   : > { %v1713_v35 = vpop.f32.mrb[1].mxu0 }
  0xfb   : > { %v498_v36 = vpop.f32.mrb[2].mxu0  ;;  %v603_v39 = vpop.f32.mrb[0].mxu1 }
  0xfc   : > { %v2109_v37 = vpack.c.bf16 %v498_v36, %v495_v34  ;;  %v1714_v38 = vpop.f32.mrb[3].mxu0  ;;  %v1733_v40 = vpop.f32.mrb[1].mxu1 }
  0xfd   : > { %v606_v41 = vpop.f32.mrb[2].mxu1 }
  0xfe   : > { %v2111_v42 = vpack.c.bf16 %v606_v41, %v603_v39  ;;  %v1734_v43 = vpop.f32.mrb[3].mxu1 }
 0x100   : > { %v730_v44 = vsel %vm725_vm1, %v2111_v42, 0 }
 0x101   : > { %1756 = vmatpush3.bf16.xpose.msra.mxu1 %v730_v44 }
 0x102   : > { %1761 = vmatprep.subr.bf16.mxu1 %v1920_v1 }
 0x119   : > { %v711_v45 = vpop.f32.mrb[4].mxu0 }
 0x11a   : > { %v1753_v46 = vpop.f32.mrb[5].mxu0 }
 0x11b   : > { %v714_v47 = vpop.f32.mrb[6].mxu0  ;;  %v1874_v46 = vld [vmem:[%s2275_s7 + $0x10] sm:$0xff]  }
 0x11c   : > { %v2116_v48 = vpack.c.bf16 %v714_v47, %v711_v45  ;;  %v1754_v49 = vpop.f32.mrb[7].mxu0  ;;  %1780 = vmatpush3.bf16.msra.mxu0 %v1874_v46  ;;  %v1875_v47 = vld [vmem:[%s2275_s7 + $0x18] sm:$0xff]  }
 0x11d   : > { %1781 = vmatprep.subr.bf16.mxu0 %v1920_v1 }
 0x11e   : > { %1758 = vmatmul.mubr.msk.bf16.vlgmr.msra.gmra.mrb[4].mxu1 %vm725_vm1, %v2116_v48 }
 0x11f   : > { %1762 = vmatpush3.bf16.msra.mxu1 %v2109_v37  ;;  %1763 = vmatprep.mubr.msk.bf16.mxu1 %vm1921_vm0, %v1920_v1 }
 0x120   : > { %1767 = vmatprep.subr.bf16.mxu1 %v1920_v1  ;;  %1782 = vmatpush3.bf16.msra.mxu0 %v1875_v47 }
 0x121   : > { %1795 = vmatprep.subr.bf16.mxu0 %v1920_v1 }
 0x1f1   : > { %v766_v52 = vpop.f32.mrb[4].mxu1 }
 0x1f2   : > { %v773_v53 = vsel %vm720_vm2, -1e+20, %v766_v52  ;;  %v1759_v54 = vpop.f32.mrb[5].mxu1 }
 0x1f3   : > { %v775_v55 = vmul.f32 0.088388346, %v773_v53  ;;  %v769_v56 = vpop.f32.mrb[6].mxu1 }
 0x1f4   : > { %v774_v57 = vsel %vm721_vm3, -1e+20, %v769_v56  ;;  %v1760_v58 = vpop.f32.mrb[7].mxu1 }
 0x1f5   : > { %v776_v59 = vmul.f32 0.088388346, %v774_v57  ;;  %v778_v60 = vsel %vm777_vm4, %v775_v55, -inf  ;;  %v1872_v58 = vld [vmem:[%s2275_s7] sm:$0xff]  }
 0x1f6   : > { %779 = vmax.xlane.f32.xlu0 %v778_v60  ;;  %v1873_v60 = vld [vmem:[%s2275_s7 + $0x8] sm:$0xff]  }
 0x1f7   : > { %v781_v61 = vsel %vm777_vm4, %v776_v59, -inf }
 0x1fa   : > { %782 = vmax.xlane.f32.xlu0 %v781_v61 }
 0x210   : > { %854 = vrot.lane.b32.xlu0 %v2111_v42, %s1922_s15 }
 0x283   : > { %v780_v62 = vpop.xlane.xlu0 %779 }
 0x284   : > { %v784_v63 = vsub.f32 %v775_v55, %v780_v62 }
 0x286   : > { %v786_v0 = vmul.f32 1.442695, %v784_v63 }
 0x287   : > { %v783_v2 = vpop.xlane.xlu0 %782 }
 0x288   : > { %1880 = vpow2.f32 %v786_v0  ;;  %v785_v3 = vsub.f32 %v776_v59, %v783_v2 }
 0x28a   : > { %v788_v4 = vmul.f32 1.442695, %v785_v3 }
 0x28b   : > { %v855_v15 = vpop.permute.xlu0 %854 }
 0x28c   : > { %1882 = vpow2.f32 %v788_v4  ;;  %v860_v17 = vsel %vm725_vm1, %v855_v15, 0 }
 0x292   : > { %v1881_v5 = vpop.eup %1880 }
 0x293   : > { %v790_v6 = vsel %vm777_vm4, %v1881_v5, 0.0 }
 0x294   : > { %791 = vadd.xlane.f32.xlu1 %v790_v6 }
 0x296   : > { %v1883_v7 = vpop.eup %1882 }
 0x297   : > { %v793_v8 = vsel %vm777_vm4, %v1883_v7, 0.0 }
 0x298   : > { %794 = vadd.xlane.f32.xlu1 %v793_v8 }
 0x2a9   : > { %851 = vrot.lane.b32.xlu1 %v2116_v48, %s1922_s15 }
 0x321   : > { %v792_v9 = vpop.xlane.xlu1 %791 }
 0x322   : > { %1884 = vrcp.f32 %v792_v9 }
 0x325   : > { %v795_v10 = vpop.xlane.xlu1 %794 }
 0x326   : > { %1886 = vrcp.f32 %v795_v10 }
 0x329   : > { %v852_v18 = vpop.permute.xlu1 %851 }
 0x32c   : > { %v1885_v11 = vpop.eup %1884 }
 0x32d   : > { %v798_v13 = vmul.f32 %v1885_v11, %v1881_v5 }
 0x330   : > { %v1887_v12 = vpop.eup %1886 }
 0x331   : > { %v799_v14 = vmul.f32 %v1887_v12, %v1883_v7 }
 0x333   : > { %v800_v16 = vpack.c.bf16 %v799_v14, %v798_v13 }
 0x335   : > { %1764 = vmatmul.mubr.msk.bf16.vlgmr.msra.gmra.mrb[8].mxu1 %vm777_vm4, %v800_v16 }
 0x336   : > { %1768 = vmatpush3.bf16.xpose.msra.mxu1 %v860_v17  ;;  %1769 = vmatprep.mubr.msk.bf16.mxu1 %vm1921_vm0, %v1920_v1 }
 0x337   : > { %1773 = vmatprep.subr.bf16.mxu1 %v1920_v1 }
 0x33d   : > { %1770 = vmatmul.mubr.msk.bf16.vlgmr.msra.gmra.mrb[12].mxu1 %vm725_vm1, %v852_v18 }
 0x33e   : > { %1775 = vmatprep.mubr.msk.bf16.mxu1 %vm1921_vm0, %v1920_v1 }
 0x408   : > { %v838_v19 = vpop.f32.mrb[8].mxu1 }
 0x409   : > { %v1765_v20 = vpop.f32.mrb[9].mxu1 }
 0x40a   : > { %v841_v21 = vpop.f32.mrb[10].mxu1 }
 0x40b   : > { %v845_v22 = vpack.c.bf16 %v841_v21, %v838_v19  ;;  %v1766_v23 = vpop.f32.mrb[11].mxu1 }
 0x410   : > { %v896_v24 = vpop.f32.mrb[12].mxu1 }
 0x411   : > { %v903_v25 = vsel %vm720_vm2, -1e+20, %v896_v24  ;;  %v1771_v26 = vpop.f32.mrb[13].mxu1 }
 0x412   : > { %v905_v27 = vmul.f32 0.088388346, %v903_v25  ;;  %v899_v28 = vpop.f32.mrb[14].mxu1 }
 0x413   : > { %v904_v29 = vsel %vm721_vm3, -1e+20, %v899_v28  ;;  %v1772_v30 = vpop.f32.mrb[15].mxu1 }
 0x414   : > { %v906_v31 = vmul.f32 0.088388346, %v904_v29  ;;  %v907_v32 = vsel %vm777_vm4, %v905_v27, -inf }
 0x415   : > { %908 = vmax.xlane.f32.xlu1 %v907_v32 }
 0x416   : > { %v910_v33 = vsel %vm777_vm4, %v906_v31, -inf }
 0x417   : > { %911 = vmax.xlane.f32.xlu0 %v910_v33 }
 0x4a2   : > { %v909_v34 = vpop.xlane.xlu1 %908 }
 0x4a3   : > { %v913_v35 = vsub.f32 %v905_v27, %v909_v34 }
 0x4a4   : > { %v912_v36 = vpop.xlane.xlu0 %911 }
 0x4a5   : > { %v915_v38 = vmul.f32 1.442695, %v913_v35  ;;  %v914_v39 = vsub.f32 %v906_v31, %v912_v36 }
 0x4a7   : > { %1888 = vpow2.f32 %v915_v38  ;;  %v917_v40 = vmul.f32 1.442695, %v914_v39 }
 0x4a9   : > { %1890 = vpow2.f32 %v917_v40 }
 0x4b1   : > { %v1889_v41 = vpop.eup %1888 }
 0x4b2   : > { %v919_v43 = vsel %vm777_vm4, %v1889_v41, 0.0 }
 0x4b3   : > { %v1891_v44 = vpop.eup %1890  ;;  %920 = vadd.xlane.f32.xlu0 %v919_v43 }
 0x4b4   : > { %v922_v45 = vsel %vm777_vm4, %v1891_v44, 0.0 }
 0x4b5   : > { %923 = vadd.xlane.f32.xlu1 %v922_v45 }
 0x4c6   : > { %1097 = vrot.lane.b32.xlu1 %v2111_v42, %s1923_s16 }
 0x4c9   : > { %931 = vrot.lane.b32.xlu0 %v2109_v37, %s1922_s15 }
 0x4ca   : > { %1095 = vrot.lane.b32.xlu1 %v2116_v48, %s1923_s16 }
 0x540   : > { %v921_v49 = vpop.xlane.xlu0 %920 }
 0x541   : > { %1892 = vrcp.f32 %v921_v49  ;;  %v1877_v49 = vld [vmem:[%s2275_s7 + $0x28] sm:$0xff]  }
 0x542   : > { %v924_v52 = vpop.xlane.xlu1 %923 }
 0x543   : > { %1894 = vrcp.f32 %v924_v52 }
 0x544   : > { %v932_v53 = vpop.permute.xlu0 %931 }
 0x545   : > { %1774 = vmatpush3.bf16.msra.mxu1 %v932_v53 }
 0x546   : > { %1787 = vmatprep.subr.bf16.mxu1 %v1920_v1  ;;  %v1098_v63 = vpop.permute.xlu1 %1097 }
 0x547   : > { %v1103_v4 = vsel %vm725_vm1, %v1098_v63, 0 }
 0x54a   : > { %v1096_v9 = vpop.permute.xlu1 %1095 }
 0x54b   : > { %v1893_v54 = vpop.eup %1892 }
 0x54c   : > { %v927_v56 = vmul.f32 %v1893_v54, %v1889_v41 }
 0x54d   : > { %v1895_v55 = vpop.eup %1894 }
 0x54e   : > { %v928_v57 = vmul.f32 %v1895_v55, %v1891_v44 }
 0x550   : > { %v929_v59 = vpack.c.bf16 %v928_v57, %v927_v56 }
 0x552   : > { %1776 = vmatmul.mubr.msk.bf16.vlgmr.msra.gmra.mrb[16].mxu1 %vm777_vm4, %v929_v59 }
 0x553   : > { %1788 = vmatpush3.bf16.msra.mxu1 %v1872_v58  ;;  %1791 = vmatprep.mubr.msk.bf16.mxu1 %vm1921_vm0, %v1920_v1 }
 0x554   : > { %1789 = vmatprep.subr.bf16.mxu1 %v1920_v1 }
 0x557   : > { %1790 = vmatpush3.bf16.msra.mxu1 %v1873_v60 }
 0x558   : > { %1801 = vmatprep.subr.bf16.mxu1 %v1920_v1 }
 0x55a   : > { %1792 = vmatmul.mubr.msk.bf16.vlgmr.msra.gmra.mrb[20].mxu1 %vm725_vm1, %v845_v22 }
 0x55b   : > { %1803 = vmatprep.mubr.msk.bf16.mxu1 %vm1921_vm0, %v1920_v1 }
 0x625   : > { %v971_v61 = vpop.f32.mrb[16].mxu1 }
 0x626   : > { %v1777_v62 = vpop.f32.mrb[17].mxu1 }
 0x627   : > { %v974_v0 = vpop.f32.mrb[18].mxu1 }
 0x628   : > { %v978_v2 = vpack.c.bf16 %v974_v0, %v971_v61  ;;  %v1778_v3 = vpop.f32.mrb[19].mxu1 }
 0x62a   : > { %1784 = vmatmul.mubr.msk.bf16.vlgmr.msra.gmra.mrb[8].mxu0 %vm725_vm1, %v978_v2 }
 0x62b   : > { %1796 = vmatpush3.bf16.xpose.msra.mxu0 %v1103_v4  ;;  %1797 = vmatprep.mubr.msk.bf16.mxu0 %vm1921_vm0, %v1920_v1 }
 0x62c   : > { %1807 = vmatprep.subr.bf16.mxu0 %v1920_v1 }
 0x62d   : > { %v1088_v5 = vpop.f32.mrb[20].mxu1 }
 0x62e   : > { %v1793_v6 = vpop.f32.mrb[21].mxu1 }
 0x62f   : > { %v1091_v7 = vpop.f32.mrb[22].mxu1 }
 0x630   : > { %v1794_v8 = vpop.f32.mrb[23].mxu1 }
 0x632   : > { %1798 = vmatmul.mubr.msk.bf16.vlgmr.msra.gmra.mrb[12].mxu0 %vm725_vm1, %v1096_v9 }
 0x633   : > { %1811 = vmatprep.mubr.msk.bf16.mxu0 %vm1921_vm0, %v1920_v1 }
 0x6fd   : > { %v1032_v10 = vpop.f32.mrb[8].mxu0 }
 0x6fe   : > { %v2199_v11 = vadd.f32 %v1088_v5, %v1032_v10  ;;  %v1785_v12 = vpop.f32.mrb[9].mxu0 }
 0x6ff   : > { %v1035_v13 = vpop.f32.mrb[10].mxu0 }
 0x700   : > { %v2201_v14 = vadd.f32 %v1091_v7, %v1035_v13  ;;  %v1786_v15 = vpop.f32.mrb[11].mxu0  ;;  %v1878_v13 = vld [vmem:[%s2275_s7 + $0x30] sm:$0xff]  }
 0x705   : > { %v1139_v16 = vpop.f32.mrb[12].mxu0 }
 0x706   : > { %v1146_v17 = vsel %vm720_vm2, -1e+20, %v1139_v16  ;;  %v1799_v18 = vpop.f32.mrb[13].mxu0 }
 0x707   : > { %v1148_v19 = vmul.f32 0.088388346, %v1146_v17  ;;  %v1142_v20 = vpop.f32.mrb[14].mxu0 }
 0x708   : > { %v1147_v21 = vsel %vm721_vm3, -1e+20, %v1142_v20  ;;  %v1800_v22 = vpop.f32.mrb[15].mxu0 }
 0x709   : > { %v1149_v23 = vmul.f32 0.088388346, %v1147_v21  ;;  %v1150_v24 = vsel %vm777_vm4, %v1148_v19, -inf }
 0x70a   : > { %1151 = vmax.xlane.f32.xlu1 %v1150_v24 }
 0x70b   : > { %v1153_v25 = vsel %vm777_vm4, %v1149_v23, -inf }
 0x70c   : > { %1154 = vmax.xlane.f32.xlu0 %v1153_v25 }
 0x71b   : > { %1173 = vrot.lane.b32.xlu1 %v2109_v37, %s1923_s16 }
 0x71f   : > { %1283 = vrot.lane.b32.xlu1 %v2116_v48, %s1924_s24  ;;  %v1876_v48 = vld [vmem:[%s2275_s7 + $0x20] sm:$0xff]  }
 0x720   : > { %1808 = vmatpush3.bf16.msra.mxu0 %v1876_v48 }
 0x721   : > { %1809 = vmatprep.subr.bf16.mxu0 %v1920_v1 }
 0x724   : > { %1810 = vmatpush3.bf16.msra.mxu0 %v1877_v49 }
 0x725   : > { %1821 = vmatprep.subr.bf16.mxu0 %v1920_v1 }
 0x797   : > { %v1152_v26 = vpop.xlane.xlu1 %1151 }
 0x798   : > { %v1156_v27 = vsub.f32 %v1148_v19, %v1152_v26 }
 0x799   : > { %v1155_v28 = vpop.xlane.xlu0 %1154 }
 0x79a   : > { %v1158_v29 = vmul.f32 1.442695, %v1156_v27  ;;  %v1157_v30 = vsub.f32 %v1149_v23, %v1155_v28 }
 0x79b   : > { %v1174_v31 = vpop.permute.xlu1 %1173 }
 0x79c   : > { %1896 = vpow2.f32 %v1158_v29  ;;  %v1160_v32 = vmul.f32 1.442695, %v1157_v30  ;;  %1802 = vmatpush3.bf16.msra.mxu1 %v1174_v31 }
 0x79d   : > { %1815 = vmatprep.subr.bf16.mxu1 %v1920_v1 }
 0x79e   : > { %1898 = vpow2.f32 %v1160_v32  ;;  %v1632_v32 = vld [vmem:[%s2276_s8] ss:$0 sm:$0xff] }
 0x7a6   : > { %v1897_v33 = vpop.eup %1896 }
 0x7a7   : > { %v1162_v34 = vsel %vm777_vm4, %v1897_v33, 0.0 }
 0x7a8   : > { %v1899_v35 = vpop.eup %1898  ;;  %1163 = vadd.xlane.f32.xlu0 %v1162_v34 }
 0x7a9   : > { %v1165_v36 = vsel %vm777_vm4, %v1899_v35, 0.0 }
 0x7ac   : > { %1166 = vadd.xlane.f32.xlu0 %v1165_v36 }
 0x7c2   : > { %1285 = vrot.lane.b32.xlu0 %v2111_v42, %s1924_s24  ;;  %v1284_v42 = vpop.permute.xlu1 %1283 }
 0x835   : > { %v1164_v38 = vpop.xlane.xlu0 %1163 }
 0x836   : > { %1900 = vrcp.f32 %v1164_v38 }
 0x839   : > { %v1167_v39 = vpop.xlane.xlu0 %1166 }
 0x83a   : > { %1902 = vrcp.f32 %v1167_v39 }
 0x83d   : > { %v1286_v45 = vpop.permute.xlu0 %1285 }
 0x83e   : > { %v1291_v47 = vsel %vm725_vm1, %v1286_v45, 0 }
 0x840   : > { %v1901_v40 = vpop.eup %1900 }
 0x841   : > { %v1170_v43 = vmul.f32 %v1901_v40, %v1897_v33 }
 0x844   : > { %v1903_v41 = vpop.eup %1902 }
 0x845   : > { %v1171_v44 = vmul.f32 %v1903_v41, %v1899_v35 }
 0x847   : > { %v1172_v46 = vpack.c.bf16 %v1171_v44, %v1170_v43 }
 0x849   : > { %1804 = vmatmul.mubr.msk.bf16.vlgmr.msra.gmra.mrb[24].mxu1 %vm777_vm4, %v1172_v46 }
 0x84a   : > { %1816 = vmatpush3.bf16.xpose.msra.mxu1 %v1291_v47  ;;  %1817 = vmatprep.mubr.msk.bf16.mxu1 %vm1921_vm0, %v1920_v1 }
 0x84b   : > { %1827 = vmatprep.subr.bf16.mxu1 %v1920_v1 }
 0x851   : > { %1818 = vmatmul.mubr.msk.bf16.vlgmr.msra.gmra.mrb[28].mxu1 %vm725_vm1, %v1284_v42 }
 0x852   : > { %1831 = vmatprep.mubr.msk.bf16.mxu1 %vm1921_vm0, %v1920_v1  ;;  %1828 = vmatpush3.bf16.msra.mxu1 %v1878_v13 }
 0x853   : > { %1829 = vmatprep.subr.bf16.mxu1 %v1920_v1 }
 0x91c   : > { %v1213_v52 = vpop.f32.mrb[24].mxu1 }
 0x91d   : > { %v1805_v53 = vpop.f32.mrb[25].mxu1 }
 0x91e   : > { %v1216_v54 = vpop.f32.mrb[26].mxu1 }
 0x91f   : > { %v1220_v55 = vpack.c.bf16 %v1216_v54, %v1213_v52  ;;  %v1806_v56 = vpop.f32.mrb[27].mxu1 }
 0x921   : > { %1812 = vmatmul.mubr.msk.bf16.vlgmr.msra.gmra.mrb[16].mxu0 %vm725_vm1, %v1220_v55 }
 0x922   : > { %1823 = vmatprep.mubr.msk.bf16.mxu0 %vm1921_vm0, %v1920_v1 }
 0x924   : > { %v1327_v57 = vpop.f32.mrb[28].mxu1 }
 0x925   : > { %v1334_v58 = vsel %vm720_vm2, -1e+20, %v1327_v57  ;;  %v1819_v59 = vpop.f32.mrb[29].mxu1 }
 0x926   : > { %v1336_v60 = vmul.f32 0.088388346, %v1334_v58  ;;  %v1330_v61 = vpop.f32.mrb[30].mxu1 }
 0x927   : > { %v1335_v62 = vsel %vm721_vm3, -1e+20, %v1330_v61  ;;  %v1820_v63 = vpop.f32.mrb[31].mxu1 }
 0x928   : > { %v1337_v0 = vmul.f32 0.088388346, %v1335_v62  ;;  %v1338_v2 = vsel %vm777_vm4, %v1336_v60, -inf }
 0x929   : > { %1339 = vmax.xlane.f32.xlu1 %v1338_v2 }
 0x92a   : > { %v1341_v3 = vsel %vm777_vm4, %v1337_v0, -inf }
 0x92b   : > { %1342 = vmax.xlane.f32.xlu0 %v1341_v3 }
 0x9b6   : > { %v1340_v4 = vpop.xlane.xlu1 %1339 }
 0x9b7   : > { %v1344_v5 = vsub.f32 %v1336_v60, %v1340_v4 }
 0x9b8   : > { %v1343_v6 = vpop.xlane.xlu0 %1342 }
 0x9b9   : > { %v1346_v7 = vmul.f32 1.442695, %v1344_v5  ;;  %v1345_v50 = vsub.f32 %v1337_v0, %v1343_v6 }
 0x9bb   : > { %1904 = vpow2.f32 %v1346_v7  ;;  %v1348_v8 = vmul.f32 1.442695, %v1345_v50 }
 0x9bd   : > { %1906 = vpow2.f32 %v1348_v8 }
 0x9c5   : > { %v1905_v9 = vpop.eup %1904 }
 0x9c6   : > { %v1350_v51 = vsel %vm777_vm4, %v1905_v9, 0.0 }
 0x9c7   : > { %v1907_v10 = vpop.eup %1906  ;;  %1351 = vadd.xlane.f32.xlu0 %v1350_v51 }
 0x9c8   : > { %v1353_v12 = vsel %vm777_vm4, %v1907_v10, 0.0 }
 0x9c9   : > { %1354 = vadd.xlane.f32.xlu1 %v1353_v12 }
 0x9dd   : > { %1361 = vrot.lane.b32.xlu0 %v2109_v37, %s1924_s24 }
 0x9f4   : > { %v1274_v15 = vpop.f32.mrb[16].mxu0 }
 0x9f5   : > { %v1281_v16 = vadd.f32 %v1274_v15, %v2199_v11  ;;  %v1813_v17 = vpop.f32.mrb[17].mxu0  ;;  %v1879_v11 = vld [vmem:[%s2275_s7 + $0x38] sm:$0xff]  }
 0x9f6   : > { %v1277_v18 = vpop.f32.mrb[18].mxu0  ;;  %1830 = vmatpush3.bf16.msra.mxu1 %v1879_v11 }
 0x9f7   : > { %v1282_v19 = vadd.f32 %v1277_v18, %v2201_v14  ;;  %v1814_v20 = vpop.f32.mrb[19].mxu0 }
 0xa54   : > { %v1352_v21 = vpop.xlane.xlu0 %1351 }
 0xa55   : > { %1908 = vrcp.f32 %v1352_v21 }
 0xa56   : > { %v1355_v22 = vpop.xlane.xlu1 %1354 }
 0xa57   : > { %1910 = vrcp.f32 %v1355_v22 }
 0xa58   : > { %v1362_v37 = vpop.permute.xlu0 %1361 }
 0xa59   : > { %1822 = vmatpush3.bf16.msra.mxu0 %v1362_v37 }
 0xa5f   : > { %v1909_v23 = vpop.eup %1908 }
 0xa60   : > { %v1358_v25 = vmul.f32 %v1909_v23, %v1905_v9 }
 0xa61   : > { %v1911_v24 = vpop.eup %1910 }
 0xa62   : > { %v1359_v26 = vmul.f32 %v1911_v24, %v1907_v10 }
 0xa64   : > { %v1360_v1 = vpack.c.bf16 %v1359_v26, %v1358_v25 }
 0xa66   : > { %1824 = vmatmul.mubr.msk.bf16.vlgmr.msra.gmra.mrb[20].mxu0 %vm777_vm4, %v1360_v1 }
 0xb39   : > { %v1401_v14 = vpop.f32.mrb[20].mxu0 }
 0xb3a   : > { %v1825_v27 = vpop.f32.mrb[21].mxu0 }
 0xb3b   : > { %v1404_v28 = vpop.f32.mrb[22].mxu0 }
 0xb3c   : > { %v1408_v29 = vpack.c.bf16 %v1404_v28, %v1401_v14  ;;  %v1826_v30 = vpop.f32.mrb[23].mxu0 }
 0xb3e   : > { %1832 = vmatmul.mubr.msk.bf16.vlgmr.msra.gmra.mrb[32].mxu1 %vm725_vm1, %v1408_v29 }
 0xc11   : > { %v1462_v31 = vpop.f32.mrb[32].mxu1 }
 0xc12   : > { %v1469_v33 = vadd.f32 %v1462_v31, %v1281_v16  ;;  %v1833_v34 = vpop.f32.mrb[33].mxu1 }
 0xc13   : > { %v1465_v35 = vpop.f32.mrb[34].mxu1 }
 0xc14   : > { %v1478_v36 = vadd.f32 %v1632_v32, %v1469_v33  ;;  %v1470_v48 = vadd.f32 %v1465_v35, %v1282_v19  ;;  %v1834_v38 = vpop.f32.mrb[35].mxu1 }
 0xc16   : > { %1480 = vst [vmem:[%s392_s19] sm:$0xff] %v1478_v36  ;;  %v1479_v39 = vadd.f32 %v1632_v32, %v1470_v48 }
 0xc18   : > { %1481 = vst [vmem:[%s392_s19 + $0x8] sm:$0xff] %v1479_v39 }
 0xc19 PF: > { %s19_s30 = sadd.s32 1, %s1918_s30  }
 0xc1a   : > { %p16_p4 = scmp.ge.s32.totalorder %s19_s30, 4  }
 0xc1c   :  { %18 = sbr.rel (!%p16_p4) target bundleno = 1 (0x1), region = 95 }

// kernel: transformer_forward.17
= control target key start
LH: loop header
LB: loop body
LE: loop exit
PB: predicated region body
PF: predicated region fallthrough
CT: control target
= control target key end

     0   :  { %s1867_s30 = smov 0   ;;  %s2139_s0 = inlined_call_operand.vmem [shape: f32[2,8,128], index: 0, kind: input, shape index: {}, may-alias: {0,1,2}]   ;;  %s2140_s1 = inlined_call_operand.vmem [shape: f32[2,8,128], index: 1, kind: input, shape index: {}, may-alias: {0,1,2}]   ;;  %s2141_s2 = inlined_call_operand.vmem [shape: f32[2,8,128], index: 2, kind: input, shape index: {}, may-alias: {0,1,2}]   ;;  %s2142_s3 = inlined_call_operand.vmem [shape: f32[2,8,8], index: 3, kind: input, shape index: {}]   ;;  %s2143_s4 = inlined_call_operand.vmem [shape: bf16[128,128], index: 4, kind: input, shape index: {}]   ;;  %s2144_s5 = inlined_call_operand.vmem [shape: bf16[128,128], index: 5, kind: input, shape index: {}]   ;;  %s2145_s6 = inlined_call_operand.vmem [shape: bf16[128,128], index: 6, kind: input, shape index: {}]   ;;  %s2146_s7 = inlined_call_operand.vmem [shape: bf16[128,128], index: 7, kind: input, shape index: {}]   ;;  %s2147_s8 = inlined_call_operand.vmem [shape: f32[1,128], index: 8, kind: input, shape index: {}]   ;;  %s2148_s9 = inlined_call_operand.vmem [shape: f32[2,8,128], index: 9, kind: output, shape index: {}]  }
   0x1 LB: > { %s1491_s10 = sadd.s32 4294967295, %s1810_s30   ;;  %p1495_p0 = scmp.ge.s32.totalorder %s1810_s30, 1  ;;  %s1810_s30 = sphi %s1867_s30, %s19_s30  }
   0x2   : > { %p313_p1 = scmp.lt.s32.totalorder %s1810_s30, 3 }
   0x4   : > { %p314_p2 = pnand %p1495_p0, %p313_p1 }
   0x5   : > { %v1756_v0 = vld [vmem:[%s2143_s4] sm:$0xff] (!%p314_p2)   ;;  %v1812_v1 = vmov (!%p314_p2), 0.0   ;;  %v1757_v2 = vld [vmem:[%s2143_s4 + $0x8] sm:$0xff] (!%p314_p2)   ;;  %vm1813_vm0 = vmmov (!%p314_p2), 0   ;;  %v1758_v3 = vld [vmem:[%s2143_s4 + $0x10] sm:$0xff] (!%p314_p2)   ;;  %p359_p3 = scmp.lt.s32.totalorder (!%p314_p2), %s1491_s10, 1 }
   0x6   : > { %317 = sbr.rel (%p314_p2) target bundleno = 3077 (0xc05), region = 56  ;;  %1603 = vmatprep.subr.bf16.mxu0 (!%p314_p2), %v1812_v1  ;;  %1623 = vmatprep.subr.bf16.mxu1 (!%p314_p2), %v1812_v1  ;;  %v1762_v4 = vld [vmem:[%s2144_s5] sm:$0xff] (!%p314_p2)   ;;  %v1764_v5 = vld [vmem:[%s2144_s5 + $0x8] sm:$0xff] (!%p314_p2)   ;;  %v1759_v6 = vld [vmem:[%s2143_s4 + $0x18] sm:$0xff] (!%p314_p2)   ;;  %vm703_vm1 = vcmask (!%p314_p2), 261120   ;;  %s1814_s11 = smov (!%p314_p2), 96  }
   0x7   : > { %1604 = vmatpush3.bf16.msra.mxu0 (!%p314_p2), %v1756_v0  ;;  %1619 = vmatprep.mubr.msk.bf16.mxu0 (!%p314_p2), %vm1813_vm0, %v1812_v1  ;;  %v1766_v7 = vld [vmem:[%s2144_s5 + $0x10] sm:$0xff] (!%p314_p2)   ;;  %v1760_v8 = vld [vmem:[%s2143_s4 + $0x20] sm:$0xff] (!%p314_p2)   ;;  %v1767_v9 = vld [vmem:[%s2144_s5 + $0x18] sm:$0xff] (!%p314_p2)   ;;  %vm768_vm2 = vcmask (!%p314_p2), 1043456   ;;  %vm752_vm4 = vcmask (!%p314_p2), 64512   ;;  %s1815_s16 = smov (!%p314_p2), 64  }
   0x8   : > { %1605 = vmatprep.subr.bf16.mxu0 (!%p314_p2), %v1812_v1  ;;  %1639 = vmatprep.mubr.msk.bf16.mxu1 (!%p314_p2), %vm1813_vm0, %v1812_v1  ;;  %v1761_v10 = vld [vmem:[%s2143_s4 + $0x28] sm:$0xff] (!%p314_p2)   ;;  %v1769_v11 = vld [vmem:[%s2144_s5 + $0x20] sm:$0xff] (!%p314_p2)   ;;  %v1763_v12 = vld [vmem:[%s2143_s4 + $0x30] sm:$0xff] (!%p314_p2)   ;;  %s1816_s24 = smov (!%p314_p2), 32  }
   0x9   : > { %1624 = vmatpush3.bf16.msra.mxu1 (!%p314_p2), %v1762_v4  ;;  %v1765_v13 = vld [vmem:[%s2143_s4 + $0x38] sm:$0xff] (!%p314_p2)   ;;  %v1771_v15 = vld [vmem:[%s2144_s5 + $0x28] sm:$0xff] (!%p314_p2)   ;;  %v1773_v16 = vld [vmem:[%s2144_s5 + $0x30] sm:$0xff] (!%p314_p2)  }
   0xa   : > { %1625 = vmatprep.subr.bf16.mxu1 (!%p314_p2), %v1812_v1  ;;  %v1768_v18 = vld [vmem:[%s2145_s6] sm:$0xff] (!%p314_p2)   ;;  %v1775_v19 = vld [vmem:[%s2144_s5 + $0x38] sm:$0xff] (!%p314_p2)   ;;  %v1770_v21 = vld [vmem:[%s2145_s6 + $0x8] sm:$0xff] (!%p314_p2)  }
   0xb   : > { %1606 = vmatpush3.bf16.msra.mxu0 (!%p314_p2), %v1757_v2  ;;  %v1772_v23 = vld [vmem:[%s2145_s6 + $0x10] sm:$0xff] (!%p314_p2)   ;;  %v1774_v24 = vld [vmem:[%s2145_s6 + $0x18] sm:$0xff] (!%p314_p2)   ;;  %v1776_v25 = vld [vmem:[%s2145_s6 + $0x20] sm:$0xff] (!%p314_p2)  }
   0xc   : > { %1607 = vmatprep.subr.bf16.mxu0 (!%p314_p2), %v1812_v1  ;;  %v1777_v26 = vld [vmem:[%s2145_s6 + $0x28] sm:$0xff] (!%p314_p2)   ;;  %v1778_v27 = vld [vmem:[%s2145_s6 + $0x30] sm:$0xff] (!%p314_p2)   ;;  %v1779_v28 = vld [vmem:[%s2145_s6 + $0x38] sm:$0xff] (!%p314_p2)  }
   0xd   : > { %1626 = vmatpush3.bf16.msra.mxu1 %v1764_v5  ;;  %s2150_s10 = smov (!%p359_p3, %s1491_s10), 1 }
   0xe   : > { %1627 = vmatprep.subr.bf16.mxu1 %v1812_v1  ;;  %s1922_s12 = sshll.u32 %s2150_s10, 3 }
   0xf   : > { %1608 = vmatpush3.bf16.msra.mxu0 %v1758_v3  ;;  %s362_s17 = scalar_lea.vmem %s2139_s0, %s1922_s12  ;;  %s366_s27 = scalar_lea.vmem %s2140_s1, %s1922_s12 }
  0x10   : > { %1609 = vmatprep.subr.bf16.mxu0 %v1812_v1  ;;  %v380_v14 = vld [vmem:[%s362_s17] sm:$0xff]  ;;  %s374_s15 = scalar_lea.vmem %s2142_s3, %s1922_s12  ;;  %s378_s19 = scalar_lea.vmem %s2148_s9, %s1922_s12 }
  0x11   : > { %1628 = vmatpush3.bf16.msra.mxu1 %v1766_v7  ;;  %v381_v17 = vpack.c.bf16 %v380_v14, %v380_v14  ;;  %v486_v20 = vld [vmem:[%s366_s27] sm:$0xff]  ;;  %s370_s27 = scalar_lea.vmem %s2141_s2, %s1922_s12 }
  0x12   : > { %1629 = vmatprep.subr.bf16.mxu1 %v1812_v1  ;;  %v487_v22 = vpack.c.bf16 %v486_v20, %v486_v20  ;;  %v592_v29 = vld [vmem:[%s370_s27] sm:$0xff] }
  0x13   : > { %1610 = vmatpush3.bf16.msra.mxu0 %v1759_v6  ;;  %v593_v30 = vpack.c.bf16 %v592_v29, %v592_v29  ;;  %v2025_v48 = vld [vmem:[%s374_s15] sm:$0xff] }
  0x14   : > { %1611 = vmatprep.subr.bf16.mxu0 %v1812_v1  ;;  %vm699_vm3 = vcmp.eq.f32.partialorder %v2025_v48, 0.0 }
  0x15   : > { %1630 = vmatpush3.bf16.msra.mxu1 %v1767_v9 }
  0x16   : > { %1631 = vmatprep.subr.bf16.mxu1 %v1812_v1 }
  0x17   : > { %1612 = vmatpush3.bf16.msra.mxu0 %v1760_v8 }
  0x18   : > { %1613 = vmatprep.subr.bf16.mxu0 %v1812_v1 }
  0x19   : > { %1632 = vmatpush3.bf16.msra.mxu1 %v1769_v11 }
  0x1a   : > { %1633 = vmatprep.subr.bf16.mxu1 %v1812_v1 }
  0x1b   : > { %1614 = vmatpush3.bf16.msra.mxu0 %v1761_v10 }
  0x1c   : > { %1615 = vmatprep.subr.bf16.mxu0 %v1812_v1 }
  0x1d   : > { %1634 = vmatpush3.bf16.msra.mxu1 %v1771_v15 }
  0x1e   : > { %1635 = vmatprep.subr.bf16.mxu1 %v1812_v1 }
  0x1f   : > { %1616 = vmatpush3.bf16.msra.mxu0 %v1763_v12 }
  0x20   : > { %1617 = vmatprep.subr.bf16.mxu0 %v1812_v1 }
  0x21   : > { %1636 = vmatpush3.bf16.msra.mxu1 %v1773_v16 }
  0x22   : > { %1637 = vmatprep.subr.bf16.mxu1 %v1812_v1 }
  0x23   : > { %1618 = vmatpush3.bf16.msra.mxu0 %v1765_v13 }
  0x24   : > { %1643 = vmatprep.subr.bf16.mxu0 %v1812_v1 }
  0x25   : > { %1638 = vmatpush3.bf16.msra.mxu1 %v1775_v19 }
  0x26   : > { %1620 = vmatmul.mubr.bf16.vlgmr.msra.gmra.mrb[0].mxu0 %v381_v17  ;;  %1663 = vmatprep.subr.bf16.mxu1 %v1812_v1 }
  0x27   : > { %1644 = vmatpush3.bf16.msra.mxu0 %v1768_v18  ;;  %1659 = vmatprep.mubr.msk.bf16.mxu0 %vm1813_vm0, %v1812_v1 }
  0x28   : > { %1645 = vmatprep.subr.bf16.mxu0 %v1812_v1  ;;  %1640 = vmatmul.mubr.bf16.vlgmr.msra.gmra.mrb[0].mxu1 %v487_v22 }
  0x29   : > { %1665 = vmatprep.mubr.msk.bf16.mxu1 %vm1813_vm0, %v1812_v1 }
  0x2b   : > { %1646 = vmatpush3.bf16.msra.mxu0 %v1770_v21 }
  0x2c   : > { %1647 = vmatprep.subr.bf16.mxu0 %v1812_v1 }
  0x2f   : > { %1648 = vmatpush3.bf16.msra.mxu0 %v1772_v23  ;;  %v1782_v23 = vld [vmem:[%s2146_s7 + $0x10] sm:$0xff]  }
  0x30   : > { %1649 = vmatprep.subr.bf16.mxu0 %v1812_v1 }
  0x33   : > { %1650 = vmatpush3.bf16.msra.mxu0 %v1774_v24  ;;  %v1783_v24 = vld [vmem:[%s2146_s7 + $0x18] sm:$0xff]  }
  0x34   : > { %1651 = vmatprep.subr.bf16.mxu0 %v1812_v1 }
  0x37   : > { %1652 = vmatpush3.bf16.msra.mxu0 %v1776_v25 }
  0x38   : > { %1653 = vmatprep.subr.bf16.mxu0 %v1812_v1 }
  0x3b   : > { %1654 = vmatpush3.bf16.msra.mxu0 %v1777_v26 }
  0x3c   : > { %1655 = vmatprep.subr.bf16.mxu0 %v1812_v1 }
  0x3f   : > { %1656 = vmatpush3.bf16.msra.mxu0 %v1778_v27 }
  0x40   : > { %1657 = vmatprep.subr.bf16.mxu0 %v1812_v1 }
  0x43   : > { %1658 = vmatpush3.bf16.msra.mxu0 %v1779_v28  ;;  %v1780_v28 = vld [vmem:[%s2146_s7] sm:$0xff]  }
  0x44   : > { %1687 = vmatprep.subr.bf16.mxu0 %v1812_v1 }
  0x46   : > { %1660 = vmatmul.mubr.bf16.vlgmr.msra.gmra.mrb[4].mxu0 %v593_v30  ;;  %v1781_v30 = vld [vmem:[%s2146_s7 + $0x8] sm:$0xff]  }
  0x47   : > { %1691 = vmatprep.mubr.msk.bf16.mxu0 %vm1813_vm0, %v1812_v1  ;;  %1688 = vmatpush3.bf16.msra.mxu0 %v1782_v23 }
  0x48   : > { %1689 = vmatprep.subr.bf16.mxu0 %v1812_v1 }
  0x4b   : > { %1690 = vmatpush3.bf16.msra.mxu0 %v1783_v24 }
  0x4c   : > { %1703 = vmatprep.subr.bf16.mxu0 %v1812_v1 }
  0xf9   : > { %v480_v31 = vpop.f32.mrb[0].mxu0 }
  0xfa   : > { %v1621_v32 = vpop.f32.mrb[1].mxu0  ;;  %v2008_v41 = vpack.c.bf16 %v480_v31, %v480_v31 }
  0xfb   : > { %v483_v33 = vpop.f32.mrb[2].mxu0  ;;  %v586_v35 = vpop.f32.mrb[0].mxu1 }
  0xfc   : > { %v1622_v34 = vpop.f32.mrb[3].mxu0  ;;  %v2001_v36 = vpack.c.bf16 %v586_v35, %v586_v35  ;;  %v1641_v37 = vpop.f32.mrb[1].mxu1  ;;  %v770_v47 = vsel %vm768_vm2, %v2008_v41, 0 }
  0xfd   : > { %v589_v38 = vpop.f32.mrb[2].mxu1 }
  0xfe   : > { %v1642_v39 = vpop.f32.mrb[3].mxu1  ;;  %821 = vrot.lane.b32.xlu1 %v2001_v36, %s1814_s11  ;;  %v708_v40 = vsel %vm703_vm1, %v2001_v36, 0 }
  0xff   : > { %1664 = vmatpush3.bf16.xpose.msra.mxu1 %v708_v40 }
 0x100   : > { %1669 = vmatprep.subr.bf16.mxu1 %v1812_v1 }
 0x119   : > { %v692_v42 = vpop.f32.mrb[4].mxu0 }
 0x11a   : > { %v2010_v43 = vpack.c.bf16 %v692_v42, %v692_v42  ;;  %v1661_v44 = vpop.f32.mrb[5].mxu0 }
 0x11b   : > { %v695_v45 = vpop.f32.mrb[6].mxu0 }
 0x11c   : > { %818 = vrot.lane.b32.xlu1 %v2010_v43, %s1814_s11  ;;  %v1662_v46 = vpop.f32.mrb[7].mxu0  ;;  %1666 = vmatmul.mubr.msk.bf16.vlgmr.msra.gmra.mrb[4].mxu1 %vm703_vm1, %v2010_v43 }
 0x11d   : > { %1670 = vmatpush3.bf16.msra.mxu1 %v770_v47  ;;  %1671 = vmatprep.mubr.msk.bf16.mxu1 %vm1813_vm0, %v1812_v1 }
 0x11e   : > { %1675 = vmatprep.subr.bf16.mxu1 %v1812_v1 }
 0x170   : > { %v822_v0 = vpop.permute.xlu1 %821 }
 0x171   : > { %v827_v3 = vsel %vm703_vm1, %v822_v0, 0 }
 0x18e   : > { %v819_v4 = vpop.permute.xlu1 %818 }
 0x1ef   : > { %v744_v49 = vpop.f32.mrb[4].mxu1 }
 0x1f0   : > { %v750_v50 = vsel %vm699_vm3, -1e+20, %v744_v49  ;;  %v1667_v51 = vpop.f32.mrb[5].mxu1 }
 0x1f1   : > { %v751_v52 = vmul.f32 0.088388346, %v750_v50  ;;  %v747_v53 = vpop.f32.mrb[6].mxu1 }
 0x1f2   : > { %v1668_v54 = vpop.f32.mrb[7].mxu1 }
 0x1f3   : > { %v753_v55 = vsel %vm752_vm4, %v751_v52, -inf }
 0x1f4   : > { %754 = vmax.xlane.f32.xlu0 %v753_v55 }
 0x281   : > { %v755_v56 = vpop.xlane.xlu0 %754 }
 0x282   : > { %v756_v57 = vsub.f32 %v751_v52, %v755_v56 }
 0x284   : > { %v757_v58 = vmul.f32 1.442695, %v756_v57 }
 0x286   : > { %1788 = vpow2.f32 %v757_v58 }
 0x290   : > { %v1789_v59 = vpop.eup %1788 }
 0x291   : > { %v759_v60 = vsel %vm752_vm4, %v1789_v59, 0.0 }
 0x292   : > { %760 = vadd.xlane.f32.xlu0 %v759_v60 }
 0x31f   : > { %v761_v61 = vpop.xlane.xlu0 %760 }
 0x320   : > { %1790 = vrcp.f32 %v761_v61 }
 0x32a   : > { %v1791_v62 = vpop.eup %1790 }
 0x32b   : > { %v763_v63 = vmul.f32 %v1791_v62, %v1789_v59 }
 0x32d   : > { %v764_v2 = vpack.c.bf16 %v763_v63, %v763_v63 }
 0x32f   : > { %1672 = vmatmul.mubr.msk.bf16.vlgmr.msra.gmra.mrb[8].mxu1 %vm752_vm4, %v764_v2 }
 0x330   : > { %1676 = vmatpush3.bf16.xpose.msra.mxu1 %v827_v3  ;;  %1677 = vmatprep.mubr.msk.bf16.mxu1 %vm1813_vm0, %v1812_v1 }
 0x331   : > { %1681 = vmatprep.subr.bf16.mxu1 %v1812_v1 }
 0x337   : > { %1678 = vmatmul.mubr.msk.bf16.vlgmr.msra.gmra.mrb[12].mxu1 %vm703_vm1, %v819_v4  ;;  %v1784_v4 = vld [vmem:[%s2146_s7 + $0x20] sm:$0xff]  }
 0x338   : > { %1683 = vmatprep.mubr.msk.bf16.mxu1 %vm1813_vm0, %v1812_v1 }
 0x402   : > { %v806_v5 = vpop.f32.mrb[8].mxu1 }
 0x403   : > { %v1673_v6 = vpop.f32.mrb[9].mxu1  ;;  %v812_v32 = vpack.c.bf16 %v806_v5, %v806_v5 }
 0x404   : > { %v809_v7 = vpop.f32.mrb[10].mxu1 }
 0x405   : > { %v1674_v8 = vpop.f32.mrb[11].mxu1 }
 0x40a   : > { %v863_v9 = vpop.f32.mrb[12].mxu1 }
 0x40b   : > { %v869_v10 = vsel %vm699_vm3, -1e+20, %v863_v9  ;;  %v1679_v11 = vpop.f32.mrb[13].mxu1 }
 0x40c   : > { %v870_v12 = vmul.f32 0.088388346, %v869_v10  ;;  %v866_v13 = vpop.f32.mrb[14].mxu1 }
 0x40d   : > { %v1680_v14 = vpop.f32.mrb[15].mxu1 }
 0x40e   : > { %v871_v15 = vsel %vm752_vm4, %v870_v12, -inf }
 0x40f   : > { %872 = vmax.xlane.f32.xlu0 %v871_v15 }
 0x425   : > { %884 = vrot.lane.b32.xlu0 %v2008_v41, %s1814_s11 }
 0x429   : > { %1049 = vrot.lane.b32.xlu0 %v2001_v36, %s1815_s16 }
 0x42d   : > { %1047 = vrot.lane.b32.xlu0 %v2010_v43, %s1815_s16 }
 0x49c   : > { %v873_v16 = vpop.xlane.xlu0 %872 }
 0x49d   : > { %v874_v17 = vsub.f32 %v870_v12, %v873_v16 }
 0x49f   : > { %v875_v18 = vmul.f32 1.442695, %v874_v17 }
 0x4a0   : > { %v885_v19 = vpop.permute.xlu0 %884 }
 0x4a1   : > { %1792 = vpow2.f32 %v875_v18  ;;  %v890_v20 = vsel %vm768_vm2, %v885_v19, 0 }
 0x4a2   : > { %1682 = vmatpush3.bf16.msra.mxu1 %v890_v20 }
 0x4a3   : > { %1695 = vmatprep.subr.bf16.mxu1 %v1812_v1 }
 0x4a4   : > { %v1050_v34 = vpop.permute.xlu0 %1049 }
 0x4a5   : > { %v1055_v40 = vsel %vm703_vm1, %v1050_v34, 0 }
 0x4a8   : > { %v1048_v46 = vpop.permute.xlu0 %1047 }
 0x4ab   : > { %v1793_v21 = vpop.eup %1792 }
 0x4ac   : > { %v877_v22 = vsel %vm752_vm4, %v1793_v21, 0.0 }
 0x4ad   : > { %878 = vadd.xlane.f32.xlu1 %v877_v22 }
 0x4be   : > { %1111 = vrot.lane.b32.xlu1 %v2008_v41, %s1815_s16 }
 0x53a   : > { %v879_v25 = vpop.xlane.xlu1 %878 }
 0x53b   : > { %1794 = vrcp.f32 %v879_v25 }
 0x53e   : > { %v1112_v31 = vpop.permute.xlu1 %1111 }
 0x53f   : > { %v1117_v33 = vsel %vm768_vm2, %v1112_v31, 0 }
 0x545   : > { %v1795_v26 = vpop.eup %1794 }
 0x546   : > { %v881_v27 = vmul.f32 %v1795_v26, %v1793_v21 }
 0x548   : > { %v882_v29 = vpack.c.bf16 %v881_v27, %v881_v27 }
 0x54a   : > { %1684 = vmatmul.mubr.msk.bf16.vlgmr.msra.gmra.mrb[16].mxu1 %vm752_vm4, %v882_v29  ;;  %v1786_v29 = vld [vmem:[%s2146_s7 + $0x30] sm:$0xff]  }
 0x54b   : > { %1696 = vmatpush3.bf16.msra.mxu1 %v1780_v28  ;;  %1699 = vmatprep.mubr.msk.bf16.mxu1 %vm1813_vm0, %v1812_v1 }
 0x54c   : > { %1697 = vmatprep.subr.bf16.mxu1 %v1812_v1 }
 0x54f   : > { %1698 = vmatpush3.bf16.msra.mxu1 %v1781_v30 }
 0x550   : > { %1709 = vmatprep.subr.bf16.mxu1 %v1812_v1 }
 0x552   : > { %1700 = vmatmul.mubr.msk.bf16.vlgmr.msra.gmra.mrb[20].mxu1 %vm703_vm1, %v812_v32 }
 0x553   : > { %1710 = vmatpush3.bf16.msra.mxu1 %v1117_v33  ;;  %1711 = vmatprep.mubr.msk.bf16.mxu1 %vm1813_vm0, %v1812_v1 }
 0x554   : > { %1723 = vmatprep.subr.bf16.mxu1 %v1812_v1 }
 0x61d   : > { %v926_v35 = vpop.f32.mrb[16].mxu1 }
 0x61e   : > { %v932_v37 = vpack.c.bf16 %v926_v35, %v926_v35  ;;  %v1685_v38 = vpop.f32.mrb[17].mxu1 }
 0x61f   : > { %v929_v39 = vpop.f32.mrb[18].mxu1 }
 0x620   : > { %v1686_v42 = vpop.f32.mrb[19].mxu1  ;;  %1692 = vmatmul.mubr.msk.bf16.vlgmr.msra.gmra.mrb[8].mxu0 %vm703_vm1, %v932_v37 }
 0x621   : > { %1704 = vmatpush3.bf16.xpose.msra.mxu0 %v1055_v40  ;;  %1705 = vmatprep.mubr.msk.bf16.mxu0 %vm1813_vm0, %v1812_v1 }
 0x622   : > { %1715 = vmatprep.subr.bf16.mxu0 %v1812_v1 }
 0x625   : > { %v1041_v44 = vpop.f32.mrb[20].mxu1 }
 0x626   : > { %v1701_v45 = vpop.f32.mrb[21].mxu1 }
 0x627   : > { %v1044_v47 = vpop.f32.mrb[22].mxu1 }
 0x628   : > { %v1702_v49 = vpop.f32.mrb[23].mxu1  ;;  %1706 = vmatmul.mubr.msk.bf16.vlgmr.msra.gmra.mrb[12].mxu0 %vm703_vm1, %v1048_v46  ;;  %v1545_v47 = vld [vmem:[%s2147_s8] ss:$0 sm:$0xff] }
 0x629   : > { %1719 = vmatprep.mubr.msk.bf16.mxu0 %vm1813_vm0, %v1812_v1  ;;  %1716 = vmatpush3.bf16.msra.mxu0 %v1784_v4 }
 0x62a   : > { %1717 = vmatprep.subr.bf16.mxu0 %v1812_v1 }
 0x6f3   : > { %v986_v50 = vpop.f32.mrb[8].mxu0 }
 0x6f4   : > { %v2083_v51 = vadd.f32 %v1041_v44, %v986_v50  ;;  %v1693_v52 = vpop.f32.mrb[9].mxu0 }
 0x6f5   : > { %v989_v53 = vpop.f32.mrb[10].mxu0 }
 0x6f6   : > { %v1694_v54 = vpop.f32.mrb[11].mxu0 }
 0x6fb   : > { %v1091_v55 = vpop.f32.mrb[12].mxu0 }
 0x6fc   : > { %v1097_v56 = vsel %vm699_vm3, -1e+20, %v1091_v55  ;;  %v1707_v57 = vpop.f32.mrb[13].mxu0 }
 0x6fd   : > { %v1098_v58 = vmul.f32 0.088388346, %v1097_v56  ;;  %v1094_v59 = vpop.f32.mrb[14].mxu0 }
 0x6fe   : > { %v1708_v60 = vpop.f32.mrb[15].mxu0 }
 0x6ff   : > { %v1099_v61 = vsel %vm752_vm4, %v1098_v58, -inf }
 0x700   : > { %1100 = vmax.xlane.f32.xlu0 %v1099_v61 }
 0x78d   : > { %v1101_v62 = vpop.xlane.xlu0 %1100 }
 0x78e   : > { %v1102_v63 = vsub.f32 %v1098_v58, %v1101_v62 }
 0x790   : > { %v1103_v0 = vmul.f32 1.442695, %v1102_v63 }
 0x792   : > { %1796 = vpow2.f32 %v1103_v0 }
 0x79c   : > { %v1797_v2 = vpop.eup %1796 }
 0x79d   : > { %v1105_v3 = vsel %vm752_vm4, %v1797_v2, 0.0 }
 0x79e   : > { %1106 = vadd.xlane.f32.xlu1 %v1105_v3 }
 0x7af   : > { %1222 = vrot.lane.b32.xlu1 %v2001_v36, %s1816_s24 }
 0x7b3   : > { %1220 = vrot.lane.b32.xlu1 %v2010_v43, %s1816_s24  ;;  %v1785_v43 = vld [vmem:[%s2146_s7 + $0x28] sm:$0xff]  }
 0x7b4   : > { %1718 = vmatpush3.bf16.msra.mxu0 %v1785_v43 }
 0x7b5   : > { %1729 = vmatprep.subr.bf16.mxu0 %v1812_v1 }
 0x82b   : > { %v1107_v5 = vpop.xlane.xlu1 %1106 }
 0x82c   : > { %1798 = vrcp.f32 %v1107_v5 }
 0x82f   : > { %v1223_v8 = vpop.permute.xlu1 %1222 }
 0x830   : > { %v1228_v10 = vsel %vm703_vm1, %v1223_v8, 0 }
 0x833   : > { %v1221_v36 = vpop.permute.xlu1 %1220 }
 0x836   : > { %v1799_v6 = vpop.eup %1798 }
 0x837   : > { %v1109_v7 = vmul.f32 %v1799_v6, %v1797_v2 }
 0x839   : > { %v1110_v9 = vpack.c.bf16 %v1109_v7, %v1109_v7 }
 0x83b   : > { %1712 = vmatmul.mubr.msk.bf16.vlgmr.msra.gmra.mrb[24].mxu1 %vm752_vm4, %v1110_v9 }
 0x83c   : > { %1724 = vmatpush3.bf16.xpose.msra.mxu1 %v1228_v10  ;;  %1725 = vmatprep.mubr.msk.bf16.mxu1 %vm1813_vm0, %v1812_v1 }
 0x83d   : > { %1735 = vmatprep.subr.bf16.mxu1 %v1812_v1 }
 0x843   : > { %1726 = vmatmul.mubr.msk.bf16.vlgmr.msra.gmra.mrb[28].mxu1 %vm703_vm1, %v1221_v36 }
 0x844   : > { %1739 = vmatprep.mubr.msk.bf16.mxu1 %vm1813_vm0, %v1812_v1  ;;  %1736 = vmatpush3.bf16.msra.mxu1 %v1786_v29 }
 0x845   : > { %1737 = vmatprep.subr.bf16.mxu1 %v1812_v1 }
 0x90e   : > { %v1153_v11 = vpop.f32.mrb[24].mxu1 }
 0x90f   : > { %v1159_v12 = vpack.c.bf16 %v1153_v11, %v1153_v11  ;;  %v1713_v13 = vpop.f32.mrb[25].mxu1 }
 0x910   : > { %v1156_v14 = vpop.f32.mrb[26].mxu1 }
 0x911   : > { %v1714_v15 = vpop.f32.mrb[27].mxu1  ;;  %1720 = vmatmul.mubr.msk.bf16.vlgmr.msra.gmra.mrb[16].mxu0 %vm703_vm1, %v1159_v12 }
 0x912   : > { %1731 = vmatprep.mubr.msk.bf16.mxu0 %vm1813_vm0, %v1812_v1 }
 0x916   : > { %v1264_v16 = vpop.f32.mrb[28].mxu1 }
 0x917   : > { %v1270_v17 = vsel %vm699_vm3, -1e+20, %v1264_v16  ;;  %v1727_v18 = vpop.f32.mrb[29].mxu1 }
 0x918   : > { %v1271_v19 = vmul.f32 0.088388346, %v1270_v17  ;;  %v1267_v20 = vpop.f32.mrb[30].mxu1 }
 0x919   : > { %v1728_v21 = vpop.f32.mrb[31].mxu1 }
 0x91a   : > { %v1272_v22 = vsel %vm752_vm4, %v1271_v19, -inf }
 0x91b   : > { %1273 = vmax.xlane.f32.xlu0 %v1272_v22 }
 0x931   : > { %1284 = vrot.lane.b32.xlu0 %v2008_v41, %s1816_s24  ;;  %v1787_v41 = vld [vmem:[%s2146_s7 + $0x38] sm:$0xff]  }
 0x932   : > { %1738 = vmatpush3.bf16.msra.mxu1 %v1787_v41 }
 0x9a8   : > { %v1274_v23 = vpop.xlane.xlu0 %1273 }
 0x9a9   : > { %v1275_v24 = vsub.f32 %v1271_v19, %v1274_v23 }
 0x9ab   : > { %v1276_v25 = vmul.f32 1.442695, %v1275_v24 }
 0x9ac   : > { %v1285_v26 = vpop.permute.xlu0 %1284 }
 0x9ad   : > { %1800 = vpow2.f32 %v1276_v25  ;;  %v1290_v27 = vsel %vm768_vm2, %v1285_v26, 0 }
 0x9ae   : > { %1730 = vmatpush3.bf16.msra.mxu0 %v1290_v27 }
 0x9b7   : > { %v1801_v48 = vpop.eup %1800 }
 0x9b8   : > { %v1278_v28 = vsel %vm752_vm4, %v1801_v48, 0.0 }
 0x9b9   : > { %1279 = vadd.xlane.f32.xlu1 %v1278_v28 }
 0x9e4   : > { %v1213_v30 = vpop.f32.mrb[16].mxu0 }
 0x9e5   : > { %v1219_v31 = vadd.f32 %v1213_v30, %v2083_v51  ;;  %v1721_v32 = vpop.f32.mrb[17].mxu0 }
 0x9e6   : > { %v1216_v33 = vpop.f32.mrb[18].mxu0 }
 0x9e7   : > { %v1722_v34 = vpop.f32.mrb[19].mxu0 }
 0xa46   : > { %v1280_v35 = vpop.xlane.xlu1 %1279 }
 0xa47   : > { %1802 = vrcp.f32 %v1280_v35 }
 0xa51   : > { %v1803_v37 = vpop.eup %1802 }
 0xa52   : > { %v1282_v38 = vmul.f32 %v1803_v37, %v1801_v48 }
 0xa54   : > { %v1283_v39 = vpack.c.bf16 %v1282_v38, %v1282_v38 }
 0xa56   : > { %1732 = vmatmul.mubr.msk.bf16.vlgmr.msra.gmra.mrb[20].mxu0 %vm752_vm4, %v1283_v39 }
 0xb29   : > { %v1326_v40 = vpop.f32.mrb[20].mxu0 }
 0xb2a   : > { %v1332_v42 = vpack.c.bf16 %v1326_v40, %v1326_v40  ;;  %v1733_v44 = vpop.f32.mrb[21].mxu0 }
 0xb2b   : > { %v1329_v45 = vpop.f32.mrb[22].mxu0 }
 0xb2c   : > { %v1734_v1 = vpop.f32.mrb[23].mxu0  ;;  %1740 = vmatmul.mubr.msk.bf16.vlgmr.msra.gmra.mrb[32].mxu1 %vm703_vm1, %v1332_v42 }
 0xbff   : > { %v1386_v46 = vpop.f32.mrb[32].mxu1 }
 0xc00   : > { %v1392_v49 = vadd.f32 %v1386_v46, %v1219_v31  ;;  %v1741_v50 = vpop.f32.mrb[33].mxu1 }
 0xc01   : > { %v1389_v51 = vpop.f32.mrb[34].mxu1 }
 0xc02   : > { %v1400_v52 = vadd.f32 %v1545_v47, %v1392_v49  ;;  %v1742_v53 = vpop.f32.mrb[35].mxu1 }
 0xc04   : > { %1401 = vst [vmem:[%s378_s19] sm:$0xff] %v1400_v52 }
 0xc05 PF: > { %s19_s30 = sadd.s32 1, %s1810_s30  }
 0xc06   : > { %p16_p4 = scmp.ge.s32.totalorder %s19_s30, 4  }
 0xc08   :  { %18 = sbr.rel (!%p16_p4) target bundleno = 1 (0x1), region = 95 }

// kernel: transformer_forward.25
= control target key start
LH: loop header
LB: loop body
LE: loop exit
PB: predicated region body
PF: predicated region fallthrough
CT: control target
= control target key end

     0   :  { %8 = vsyncpa [#allocation3], 0  ;;  %s665_s0 = inlined_call_operand.vmem [shape: f32[2,8,128], index: 0, kind: input, shape index: {}]   ;;  %s666_s1 = inlined_call_operand.vmem [shape: bf16[128,128], index: 1, kind: input, shape index: {}]   ;;  %s667_s2 = inlined_call_operand.vmem [shape: f32[1,128], index: 2, kind: input, shape index: {}]   ;;  %s668_s3 = inlined_call_operand.hbm [shape: f32[2,8,128], index: 3, kind: output, shape index: {}]  }
   0x1   :  { %10 = vsyncpa [#allocation3 + $0x1], 0  ;;  %s538_s12 = smov 0   ;;  %s540_s13 = smov 0  }
   0x2   :  { %s542_s14 = smov 0   ;;  %s544_s15 = smov 0  }
   0x3 LB: > { %s559_s16 = sadd.s32 4294967295, %s513_s15   ;;  %s354_s17 = sadd.s32 4294967294, %s513_s15   ;;  %s513_s15 = sphi %s544_s15, %s674_s15   ;;  %s509_s14 = sphi %s542_s14, %s673_s14   ;;  %s505_s13 = sphi %s540_s13, %s672_s13   ;;  %s501_s12 = sphi %s538_s12, %s671_s12  }
   0x4   : > { %s563_s18 = sadd.s32 1, %s513_s15   ;;  %s91_s19 = sadd.s32 1, %s509_s14 }
   0x5   : > { %s88_s20 = ssub.s32 %s513_s15, %s563_s18  ;;  %p101_p0 = scmp.ne.s32.totalorder %s509_s14, %s505_s13 }
   0x6   : > { %p89_p1 = scmp.eq.s32.totalorder %s88_s20, 0  ;;  %p102_p2 = scmp.eq.s32.totalorder %s559_s16, 1 }
   0x7   : > { %p107_p3 = scmp.ne.s32.totalorder %s505_s13, %s501_s12  ;;  %p108_p4 = scmp.eq.s32.totalorder %s354_s17, 1 }
   0x8   : > { %s574_s21 = scalar_select %p89_p1, %s509_s14, %s91_s19  }
   0x9   : > { %p576_p5 = por %p102_p2, %p101_p0  ;;  %p580_p6 = por %p108_p4, %p107_p3 }
   0xa   : > { %p357_p7 = scmp.ge.s32.totalorder %s513_s15, 1  ;;  %p139_p8 = scmp.lt.s32.totalorder %s513_s15, 3 }
   0xc   : > { %p140_p9 = pnand %p357_p7, %p139_p8 }
   0xd   : > { %v443_v0 = vld [vmem:[%s666_s1] sm:$0xff] (!%p140_p9)   ;;  %v515_v1 = vmov (!%p140_p9), 0.0   ;;  %v444_v2 = vld [vmem:[%s666_s1 + $0x8] sm:$0xff] (!%p140_p9)   ;;  %vm516_vm0 = vmmov (!%p140_p9), 0   ;;  %v445_v3 = vld [vmem:[%s666_s1 + $0x10] sm:$0xff] (!%p140_p9)   ;;  %p162_p10 = scmp.lt.s32.totalorder (!%p140_p9), %s559_s16, 1 }
   0xe   : > { %143 = sbr.rel (%p140_p9) target bundleno = 274 (0x112), region = 32  ;;  %382 = vmatprep.subr.bf16.mxu0 (!%p140_p9), %v515_v1  ;;  %398 = vmatprep.mubr.msk.bf16.mxu0 (!%p140_p9), %vm516_vm0, %v515_v1  ;;  %v446_v4 = vld [vmem:[%s666_s1 + $0x18] sm:$0xff] (!%p140_p9)   ;;  %v447_v5 = vld [vmem:[%s666_s1 + $0x20] sm:$0xff] (!%p140_p9)   ;;  %v448_v6 = vld [vmem:[%s666_s1 + $0x28] sm:$0xff] (!%p140_p9)   ;;  %s159_s27 = sand.u32 (!%p140_p9), 1, %s505_s13  }
   0xf   : > { %383 = vmatpush3.bf16.msra.mxu0 (!%p140_p9), %v443_v0  ;;  %v449_v7 = vld [vmem:[%s666_s1 + $0x30] sm:$0xff] (!%p140_p9)   ;;  %v450_v8 = vld [vmem:[%s666_s1 + $0x38] sm:$0xff] (!%p140_p9)   ;;  %s358_s28 = sshll.u32 (!%p140_p9), %s159_s27, 3  ;;  %v360_v11 = vld [vmem:[%s667_s2] ss:$0 sm:$0xff] (!%p140_p9)  ;;  %s370_s4 = sshll.u32 (!%p140_p9), %s559_s16, 7 }
  0x10   : > { %384 = vmatprep.subr.bf16.mxu0 (!%p140_p9), %v515_v1  ;;  %s161_s5 = scalar_lea.vmem (!%p140_p9), [#allocation2], %s358_s28  ;;  %s623_s9 = scalar_lea.hbm (!%p140_p9), %s668_s3, %s370_s4 }
  0x11   : > { %s295_s6 = sshll.u32 (!%p140_p9), %s161_s5, 4  ;;  %s517_s11 = smov (!%p140_p9), [#allocation2]   ;;  %s625_s6 = int_to_ptr.vmem [resolvable:$true] %s295_s6 }
  0x12   : > { %s455_s17 = sshll.u32 (!%p140_p9), %s517_s11, 4  ;;  %s456_s17 = int_to_ptr.vmem [resolvable:$false] %s455_s17 }
  0x13   : > { %385 = vmatpush3.bf16.msra.mxu0 (!%p140_p9), %v444_v2  ;;  %s457_s19 = scalar_lea.vmem (!%p140_p9), %s456_s17, 256  ;;  %p458_p0 = scmp.lt.s32.totalorder (!%p140_p9), %s625_s6, %s456_s17 }
  0x14   : > { %386 = vmatprep.subr.bf16.mxu0 (!%p140_p9), %v515_v1 }
  0x15   : > { %s163_s7 = scalar_select %p162_p10, %s559_s16, 1 }
  0x16   : > { %s451_s16 = scalar_lea.vmem %s625_s6, 128 }
  0x17   : > { %387 = vmatpush3.bf16.msra.mxu0 %v445_v3  ;;  %s359_s10 = sshll.u32 %s163_s7, 3  ;;  %p452_p11 = scmp.ne.s32.totalorder %s625_s6, %s451_s16 }
  0x18   : > { %388 = vmatprep.subr.bf16.mxu0 %v515_v1  ;;  %s165_s24 = scalar_lea.vmem %s665_s0, %s359_s10  ;;  %s282_s10 = scalar_lea.sflag [#allocation3], %s159_s27 }
  0x19   : > { %v167_v9 = vld [vmem:[%s165_s24] sm:$0xff]  ;;  %p453_p12 = pnand %p452_p11, %p576_p5  ;;  %p459_p1 = scmp.lt.s32.totalorder %s457_s19, %s451_s16 }
  0x1a   : > { %v168_v10 = vpack.c.bf16 %v167_v9, %v167_v9 }
  0x1b   : > { %389 = vmatpush3.bf16.msra.mxu0 %v446_v4  ;;  %p454_p13 = pneg %p453_p12  ;;  %p460_p2 = por %p459_p1, %p458_p0 }
  0x1c   : > { %390 = vmatprep.subr.bf16.mxu0 %v515_v1 }
  0x1d   : > { %p461_p3 = pnand %p460_p2, %p454_p13 }
  0x1f   : > { %391 = vmatpush3.bf16.msra.mxu0 %v447_v5 }
  0x20   : > { %392 = vmatprep.subr.bf16.mxu0 %v515_v1 }
  0x23   : > { %393 = vmatpush3.bf16.msra.mxu0 %v448_v6 }
  0x24   : > { %394 = vmatprep.subr.bf16.mxu0 %v515_v1 }
  0x27   : > { %395 = vmatpush3.bf16.msra.mxu0 %v449_v7 }
  0x28   : > { %396 = vmatprep.subr.bf16.mxu0 %v515_v1 }
  0x2b   : > { %397 = vmatpush3.bf16.msra.mxu0 %v450_v8 }
  0x2e   : > { %399 = vmatmul.mubr.bf16.vlgmr.msra.gmra.mrb[0].mxu0 %v168_v10 }
 0x101   : > { %v274_v12 = vpop.f32.mrb[0].mxu0 }
 0x102   : > { %v275_v13 = vadd.f32 %v360_v11, %v274_v12  ;;  %v400_v14 = vpop.f32.mrb[1].mxu0 }
 0x103   : > { %v277_v15 = vpop.f32.mrb[2].mxu0 }
 0x104   : > { %280 = vst [vmem:[%s161_s5] sm:$0xff] %v275_v13  ;;  %v401_v16 = vpop.f32.mrb[3].mxu0 }
 0x105   : > { %464 = shalt.err (!%p461_p3)
}
 0x106   : > { %s465_s20 = scalar_lea.hbm %s623_s9, 128  ;;  %s469_s26 = scalar_lea.hbm %s668_s3, 256 }
 0x107   : > { %p466_p4 = scmp.ne.s32.totalorder %s623_s9, %s465_s20  ;;  %p470_p9 = scmp.lt.u32.totalorder %s623_s9, %s668_s3 }
 0x108   : > { %p471_p10 = scmp.lt.u32.totalorder %s469_s26, %s465_s20  ;;  %p473_p12 = scmp.lt.u32.totalorder %s465_s20, %s623_s9 }
 0x109   : > { %p467_p7 = pnand %p466_p4, %p576_p5 }
 0x10a   : > { %p472_p11 = por %p471_p10, %p470_p9 }
 0x10b   : > { %p468_p8 = pneg %p467_p7 }
 0x10c   : > { %p474_p13 = por %p473_p12, %p472_p11 }
 0x10e   : > { %p475_p0 = pnand %p474_p13, %p468_p8 }
 0x110   : > { %478 = shalt.err (!%p475_p0)
}
 0x111   : > { %402 = dma.vmem_to_hbm [thread:$0]  (%p576_p5), %s625_s6, 128, %s623_s9, %s282_s10  }
 0x112 PF: > { %p408_p1 = scmp.ge.s32.totalorder %s513_s15, 2  ;;  %s307_s29 = sand.u32 1, %s501_s12  }
 0x113   : > { %s308_s30 = scalar_lea.sflag [#allocation3], %s307_s29 }
 0x114   : > { %p405_p2 = pnand %p408_p1, %p580_p6 }
 0x116   : > { %496 = dma.done.wait (!%p405_p2), %s308_s30, 128  }
 0x117   : > { %498 = vsyncadd (!%p405_p2), %s308_s30, 4294967168  ;;  %p13_p3 = scmp.ge.s32.totalorder %s563_s18, 4   ;;  %s671_s12 = smov %s505_s13 }
 0x118   : > { %s672_s13 = smov %s509_s14  ;;  %s673_s14 = smov %s574_s21 }
 0x119   : > { %s674_s15 = smov %s563_s18  ;;  %15 = sbr.rel (!%p13_p3) target bundleno = 3 (0x3), region = 67 }
 0x120   :  { %313 = vsyncpa [#allocation3], 1 }
 0x121   :  { %315 = vsyncpa [#allocation3 + $0x1], 1 }

// kernel: transformer_forward.20
= control target key start
LH: loop header
LB: loop body
LE: loop exit
PB: predicated region body
PF: predicated region fallthrough
CT: control target
= control target key end

     0   :  { %s1426_s13 = smov 0   ;;  %s1666_s0 = inlined_call_operand.vmem [shape: f32[2,8,128], index: 0, kind: input, shape index: {}]   ;;  %s1667_s1 = inlined_call_operand.vmem [shape: f32[2,8,128], index: 1, kind: input, shape index: {}]   ;;  %s1668_s2 = inlined_call_operand.vmem [shape: f32[1,128], index: 2, kind: input, shape index: {}]   ;;  %s1669_s3 = inlined_call_operand.vmem [shape: f32[1,128], index: 3, kind: input, shape index: {}]   ;;  %s1670_s4 = inlined_call_operand.vmem [shape: bf16[128,512], index: 4, kind: input, shape index: {}]   ;;  %s1671_s5 = inlined_call_operand.vmem [shape: f32[1,512], index: 5, kind: input, shape index: {}]   ;;  %s1672_s6 = inlined_call_operand.vmem [shape: bf16[512,128], index: 6, kind: input, shape index: {}]   ;;  %s1673_s7 = inlined_call_operand.vmem [shape: f32[1,128], index: 7, kind: input, shape index: {}]   ;;  %s1674_s8 = inlined_call_operand.vmem [shape: f32[1,128], index: 8, kind: input, shape index: {}]   ;;  %s1675_s9 = inlined_call_operand.vmem [shape: f32[1,128], index: 9, kind: input, shape index: {}]   ;;  %s1676_s10 = inlined_call_operand.vmem [shape: f32[2,8,128], index: 10, kind: output, shape index: {}]  }
   0x1 LB: > { %s1146_s14 = sadd.s32 4294967295, %s1368_s13   ;;  %p1150_p0 = scmp.ge.s32.totalorder %s1368_s13, 1  ;;  %s1368_s13 = sphi %s1426_s13, %s20_s13  }
   0x2   : > { %p320_p1 = scmp.lt.s32.totalorder %s1368_s13, 3 }
   0x4   : > { %p321_p2 = pnand %p1150_p0, %p320_p1 }
   0x5   : > { %p360_p3 = scmp.lt.s32.totalorder (!%p321_p2), %s1146_s14, 1  ;;  %v1278_v3 = vld [vmem:[%s1670_s4 + $0x4] ss:$16 sps:$4 sm:$0xff] (!%p321_p2)   ;;  %v1280_v4 = vld [vmem:[%s1670_s4 + $0xc] ss:$16 sps:$4 sm:$0xff] (!%p321_p2)   ;;  %v1370_v33 = vmov (!%p321_p2), 0  }
   0x6   : > { %324 = sbr.rel (%p321_p2) target bundleno = 1086 (0x43e), region = 60  ;;  %v1282_v5 = vld [vmem:[%s1670_s4] ss:$16 sps:$4 sm:$0xff] (!%p321_p2)   ;;  %v1283_v6 = vld [vmem:[%s1670_s4 + $0x8] ss:$16 sps:$4 sm:$0xff] (!%p321_p2)   ;;  %619 = vmatprep.subr.bf16.mxu0 (!%p321_p2), %v1278_v3  ;;  %660 = vmatprep.subr.bf16.mxu1 (!%p321_p2), %v1280_v4 }
   0x7   : > { %v1284_v7 = vld [vmem:[%s1670_s4 + $0x24] ss:$16 sps:$4 sm:$0xff] (!%p321_p2)   ;;  %v1286_v8 = vld [vmem:[%s1670_s4 + $0x2c] ss:$16 sps:$4 sm:$0xff] (!%p321_p2)   ;;  %v1288_v9 = vld [vmem:[%s1670_s4 + $0x20] ss:$16 sps:$4 sm:$0xff] (!%p321_p2)   ;;  %620 = vmatpush1.bf16.msra.mxu0 (!%p321_p2), %v1282_v5  ;;  %661 = vmatpush1.bf16.msra.mxu1 (!%p321_p2), %v1283_v6 }
   0x8   : > { %v1289_v10 = vld [vmem:[%s1670_s4 + $0x28] ss:$16 sps:$4 sm:$0xff] (!%p321_p2)   ;;  %v1290_v11 = vld [vmem:[%s1670_s4 + $0x44] ss:$16 sps:$4 sm:$0xff] (!%p321_p2)   ;;  %v1292_v12 = vld [vmem:[%s1670_s4 + $0x4c] ss:$16 sps:$4 sm:$0xff] (!%p321_p2)   ;;  %621 = vmatprep.subr.bf16.mxu0 (!%p321_p2), %v1284_v7  ;;  %662 = vmatprep.subr.bf16.mxu1 (!%p321_p2), %v1286_v8 }
   0x9   : > { %v1294_v17 = vld [vmem:[%s1670_s4 + $0x40] ss:$16 sps:$4 sm:$0xff] (!%p321_p2)   ;;  %v1295_v18 = vld [vmem:[%s1670_s4 + $0x48] ss:$16 sps:$4 sm:$0xff] (!%p321_p2)   ;;  %v1296_v19 = vld [vmem:[%s1670_s4 + $0x64] ss:$16 sps:$4 sm:$0xff] (!%p321_p2)   ;;  %651 = vmatprep.mubr.bf16.mxu0 (!%p321_p2), %v1370_v33  ;;  %692 = vmatprep.mubr.bf16.mxu1 (!%p321_p2), %v1370_v33 }
   0xa   : > { %v1298_v20 = vld [vmem:[%s1670_s4 + $0x6c] ss:$16 sps:$4 sm:$0xff] (!%p321_p2)   ;;  %v1300_v21 = vld [vmem:[%s1670_s4 + $0x60] ss:$16 sps:$4 sm:$0xff] (!%p321_p2)   ;;  %v1301_v22 = vld [vmem:[%s1670_s4 + $0x68] ss:$16 sps:$4 sm:$0xff] (!%p321_p2)  }
   0xb   : > { %622 = vmatpush1.bf16.msra.mxu0 (!%p321_p2), %v1288_v9  ;;  %663 = vmatpush1.bf16.msra.mxu1 (!%p321_p2), %v1289_v10  ;;  %v1302_v23 = vld [vmem:[%s1670_s4 + $0x84] ss:$16 sps:$4 sm:$0xff] (!%p321_p2)   ;;  %v1304_v24 = vld [vmem:[%s1670_s4 + $0x8c] ss:$16 sps:$4 sm:$0xff] (!%p321_p2)   ;;  %v1306_v25 = vld [vmem:[%s1670_s4 + $0x80] ss:$16 sps:$4 sm:$0xff] (!%p321_p2)  }
   0xc   : > { %623 = vmatprep.subr.bf16.mxu0 (!%p321_p2), %v1290_v11  ;;  %664 = vmatprep.subr.bf16.mxu1 (!%p321_p2), %v1292_v12  ;;  %v1307_v26 = vld [vmem:[%s1670_s4 + $0x88] ss:$16 sps:$4 sm:$0xff] (!%p321_p2)   ;;  %v1308_v27 = vld [vmem:[%s1670_s4 + $0xa4] ss:$16 sps:$4 sm:$0xff] (!%p321_p2)   ;;  %v1310_v28 = vld [vmem:[%s1670_s4 + $0xac] ss:$16 sps:$4 sm:$0xff] (!%p321_p2)  }
   0xd   : > { %s1678_s14 = smov (!%p360_p3, %s1146_s14), 1  ;;  %v1312_v29 = vld [vmem:[%s1670_s4 + $0xa0] ss:$16 sps:$4 sm:$0xff]   ;;  %v1313_v30 = vld [vmem:[%s1670_s4 + $0xa8] ss:$16 sps:$4 sm:$0xff]  }
   0xe   : > { %s1434_s15 = sshll.u32 %s1678_s14, 3  ;;  %v1314_v31 = vld [vmem:[%s1670_s4 + $0xc4] ss:$16 sps:$4 sm:$0xff]   ;;  %v1316_v32 = vld [vmem:[%s1670_s4 + $0xcc] ss:$16 sps:$4 sm:$0xff]  }
   0xf   : > { %s363_s18 = scalar_lea.vmem %s1666_s0, %s1434_s15  ;;  %s367_s21 = scalar_lea.vmem %s1667_s1, %s1434_s15  ;;  %624 = vmatpush1.bf16.msra.mxu0 %v1294_v17  ;;  %665 = vmatpush1.bf16.msra.mxu1 %v1295_v18  ;;  %v1318_v34 = vld [vmem:[%s1670_s4 + $0xc0] ss:$16 sps:$4 sm:$0xff]   ;;  %v1319_v35 = vld [vmem:[%s1670_s4 + $0xc8] ss:$16 sps:$4 sm:$0xff]   ;;  %v1320_v36 = vld [vmem:[%s1670_s4 + $0xe4] ss:$16 sps:$4 sm:$0xff]   ;;  %v439_v18 = vlaneseq }
  0x10   : > { %v373_v0 = vld [vmem:[%s363_s18] sm:$0xff]  ;;  %625 = vmatprep.subr.bf16.mxu0 %v1296_v19  ;;  %666 = vmatprep.subr.bf16.mxu1 %v1298_v20  ;;  %v1322_v37 = vld [vmem:[%s1670_s4 + $0xec] ss:$16 sps:$4 sm:$0xff]   ;;  %v1325_v39 = vld [vmem:[%s1670_s4 + $0xe8] ss:$16 sps:$4 sm:$0xff]   ;;  %s371_s20 = scalar_lea.vmem %s1676_s10, %s1434_s15 }
  0x11   : > { %v374_v1 = vld [vmem:[%s367_s21] sm:$0xff]  ;;  %v1330_v54 = vld [vmem:[%s1672_s6 + $0x48] sm:$0xff]   ;;  %v1334_v58 = vld [vmem:[%s1672_s6 + $0x50] sm:$0xff]   ;;  %v440_v19 = vshrl.u32 %v439_v18, 7 }
  0x12   : > { %v375_v2 = vadd.f32 %v374_v1, %v373_v0  ;;  %v1324_v38 = vld [vmem:[%s1670_s4 + $0xe0] ss:$16 sps:$4 sm:$0xff]   ;;  %v1331_v55 = vld [vmem:[%s1672_s6 + $0xc8] sm:$0xff]   ;;  %v1338_v62 = vld [vmem:[%s1672_s6 + $0x58] sm:$0xff]  }
  0x13   : > { %626 = vmatpush1.bf16.msra.mxu0 %v1300_v21  ;;  %667 = vmatpush1.bf16.msra.mxu1 %v1301_v22  ;;  %v1326_v40 = vld [vmem:[%s1672_s6 + $0x40] sm:$0xff]   ;;  %v1332_v56 = vld [vmem:[%s1672_s6 + $0x8] sm:$0xff]   ;;  %v1335_v59 = vld [vmem:[%s1672_s6 + $0xd0] sm:$0xff]   ;;  %v441_v20 = vsub.s32 0, %v440_v19  ;;  %v449_v21 = vsub.s32 2, %v440_v19 }
  0x14   : > { %378 = vadd.xlane.f32.xlu0 %v375_v2  ;;  %627 = vmatprep.subr.bf16.mxu0 %v1302_v23  ;;  %v1327_v41 = vld [vmem:[%s1672_s6 + $0xc0] sm:$0xff]   ;;  %v1333_v57 = vld [vmem:[%s1672_s6 + $0x88] sm:$0xff]   ;;  %v1336_v60 = vld [vmem:[%s1672_s6 + $0x10] sm:$0xff]   ;;  %v445_v23 = vsub.s32 1, %v440_v19 }
  0x15   : > { %668 = vmatprep.subr.bf16.mxu1 %v1304_v24  ;;  %v1154_v46 = vld [vmem:[%s1668_s2] ss:$0 sm:$0xff]  ;;  %v1337_v61 = vld [vmem:[%s1672_s6 + $0x90] sm:$0xff]   ;;  %v1339_v63 = vld [vmem:[%s1672_s6 + $0xd8] sm:$0xff]   ;;  %v453_v24 = vsub.s32 3, %v440_v19 }
  0x16   : > { %v1155_v48 = vld [vmem:[%s1669_s3] ss:$0 sm:$0xff]  ;;  %v1340_v0 = vld [vmem:[%s1672_s6 + $0x18] sm:$0xff]   ;;  %v1346_v6 = vld [vmem:[%s1672_s6 + $0x68] sm:$0xff]  }
  0x17   : > { %628 = vmatpush1.bf16.msra.mxu0 %v1306_v25  ;;  %669 = vmatpush1.bf16.msra.mxu1 %v1307_v26  ;;  %v1328_v51 = vld [vmem:[%s1672_s6] sm:$0xff]   ;;  %v1341_v1 = vld [vmem:[%s1672_s6 + $0x98] sm:$0xff]   ;;  %v1347_v7 = vld [vmem:[%s1672_s6 + $0xe8] sm:$0xff]  }
  0x18   : > { %629 = vmatprep.subr.bf16.mxu0 %v1308_v27  ;;  %670 = vmatprep.subr.bf16.mxu1 %v1310_v28  ;;  %v1329_v52 = vld [vmem:[%s1672_s6 + $0x80] sm:$0xff]   ;;  %v1348_v8 = vld [vmem:[%s1672_s6 + $0x28] sm:$0xff]   ;;  %v1350_v10 = vld [vmem:[%s1672_s6 + $0x70] sm:$0xff]  }
  0x19   : > { %v1343_v3 = vld [vmem:[%s1672_s6 + $0xe0] sm:$0xff]   ;;  %v1349_v9 = vld [vmem:[%s1672_s6 + $0xa8] sm:$0xff]   ;;  %v1351_v11 = vld [vmem:[%s1672_s6 + $0xf0] sm:$0xff]  }
  0x1a   : > { %v1344_v4 = vld [vmem:[%s1672_s6 + $0x20] sm:$0xff]   ;;  %v1352_v12 = vld [vmem:[%s1672_s6 + $0x30] sm:$0xff]   ;;  %v1357_v17 = vld [vmem:[%s1672_s6 + $0xb8] sm:$0xff]  }
  0x1b   : > { %630 = vmatpush1.bf16.msra.mxu0 %v1312_v29  ;;  %671 = vmatpush1.bf16.msra.mxu1 %v1313_v30  ;;  %v1345_v5 = vld [vmem:[%s1672_s6 + $0xa0] sm:$0xff]  }
  0x1c   : > { %631 = vmatprep.subr.bf16.mxu0 %v1314_v31  ;;  %672 = vmatprep.subr.bf16.mxu1 %v1316_v32  ;;  %v437_v22 = vld [vmem:[%s1671_s5] sm:$0xf] }
  0x1d   : > { %v442_v25 = vrot.slane %v437_v22, %v441_v20  ;;  %v450_v26 = vrot.slane %v437_v22, %v449_v21  ;;  %v446_v27 = vrot.slane %v437_v22, %v445_v23  ;;  %v454_v28 = vrot.slane %v437_v22, %v453_v24 }
  0x1f   : > { %632 = vmatpush1.bf16.msra.mxu0 %v1318_v34  ;;  %673 = vmatpush1.bf16.msra.mxu1 %v1319_v35 }
  0x20   : > { %633 = vmatprep.subr.bf16.mxu0 %v1320_v36  ;;  %674 = vmatprep.subr.bf16.mxu1 %v1322_v37 }
  0x23   : > { %634 = vmatpush1.bf16.msra.mxu0 %v1324_v38  ;;  %675 = vmatpush1.bf16.msra.mxu1 %v1325_v39 }
  0x24   : > { %1225 = vmatprep.subr.bf16.mxu0 %v1326_v40  ;;  %1247 = vmatprep.subr.bf16.mxu1 %v1327_v41 }
  0xa1   : > { %v379_v13 = vpop.xlane.xlu0 %378 }
  0xa2   : > { %v381_v14 = vmul.f32 0.0078125, %v379_v13  ;;  %v1353_v13 = vld [vmem:[%s1672_s6 + $0xb0] sm:$0xff]  }
  0xa4   : > { %v382_v15 = vsub.f32 %v375_v2, %v381_v14  ;;  %v1342_v2 = vld [vmem:[%s1672_s6 + $0x60] sm:$0xff]   ;;  %v1354_v14 = vld [vmem:[%s1672_s6 + $0x78] sm:$0xff]  }
  0xa6   : > { %v383_v16 = vmul.f32 %v382_v15, %v382_v15 }
  0xa8   : > { %384 = vadd.xlane.f32.xlu0 %v383_v16  ;;  %v1356_v16 = vld [vmem:[%s1672_s6 + $0x38] sm:$0xff]  }
 0x135   : > { %v385_v42 = vpop.xlane.xlu0 %384 }
 0x136   : > { %v386_v43 = vmul.f32 0.0078125, %v385_v42 }
 0x138   : > { %v387_v44 = vadd.f32 1e-05, %v386_v43 }
 0x13a   : > { %1358 = vrsqrt.f32 %v387_v44 }
 0x144   : > { %v1359_v45 = vpop.eup %1358 }
 0x145   : > { %v389_v47 = vmul.f32 %v1359_v45, %v382_v15  ;;  %v1355_v15 = vld [vmem:[%s1672_s6 + $0xf8] sm:$0xff]  }
 0x147   : > { %v396_v49 = vmul.f32 %v1154_v46, %v389_v47 }
 0x149   : > { %v1552_v50 = vadd.f32 %v1155_v48, %v396_v49 }
 0x14b   : > { %v404_v53 = vpack.c.bf16 %v1552_v50, %v1552_v50 }
 0x14d   : > { %652 = vmatmul.mubr.bf16.vlgmr.msra.gmra.mrb[0].mxu0 %v404_v53  ;;  %693 = vmatmul.mubr.bf16.vlgmr.msra.gmra.mrb[0].mxu1 %v404_v53 }
 0x14e   : > { %1226 = vmatpush3.bf16.msra.mxu0 %v1328_v51  ;;  %1248 = vmatpush3.bf16.msra.mxu1 %v1329_v52  ;;  %v1188_v52 = vld [vmem:[%s1673_s7] ss:$0 sm:$0xff] }
 0x14f   : > { %1227 = vmatprep.subr.bf16.mxu0 %v1330_v54  ;;  %1249 = vmatprep.subr.bf16.mxu1 %v1331_v55 }
 0x152   : > { %1228 = vmatpush3.bf16.msra.mxu0 %v1332_v56  ;;  %1250 = vmatpush3.bf16.msra.mxu1 %v1333_v57 }
 0x153   : > { %1229 = vmatprep.subr.bf16.mxu0 %v1334_v58  ;;  %1251 = vmatprep.subr.bf16.mxu1 %v1335_v59 }
 0x156   : > { %1230 = vmatpush3.bf16.msra.mxu0 %v1336_v60  ;;  %1252 = vmatpush3.bf16.msra.mxu1 %v1337_v61 }
 0x157   : > { %1231 = vmatprep.subr.bf16.mxu0 %v1338_v62  ;;  %1253 = vmatprep.subr.bf16.mxu1 %v1339_v63 }
 0x15a   : > { %1232 = vmatpush3.bf16.msra.mxu0 %v1340_v0  ;;  %1254 = vmatpush3.bf16.msra.mxu1 %v1341_v1 }
 0x15b   : > { %1233 = vmatprep.subr.bf16.mxu0 %v1342_v2  ;;  %1255 = vmatprep.subr.bf16.mxu1 %v1343_v3 }
 0x15e   : > { %1234 = vmatpush3.bf16.msra.mxu0 %v1344_v4  ;;  %1256 = vmatpush3.bf16.msra.mxu1 %v1345_v5 }
 0x15f   : > { %1235 = vmatprep.subr.bf16.mxu0 %v1346_v6  ;;  %1257 = vmatprep.subr.bf16.mxu1 %v1347_v7 }
 0x162   : > { %1236 = vmatpush3.bf16.msra.mxu0 %v1348_v8  ;;  %1258 = vmatpush3.bf16.msra.mxu1 %v1349_v9  ;;  %v1221_v8 = vld [vmem:[%s1674_s8] ss:$0 sm:$0xff] }
 0x163   : > { %1237 = vmatprep.subr.bf16.mxu0 %v1350_v10  ;;  %1259 = vmatprep.subr.bf16.mxu1 %v1351_v11 }
 0x166   : > { %1238 = vmatpush3.bf16.msra.mxu0 %v1352_v12  ;;  %1260 = vmatpush3.bf16.msra.mxu1 %v1353_v13 }
 0x167   : > { %1239 = vmatprep.subr.bf16.mxu0 %v1354_v14  ;;  %1261 = vmatprep.subr.bf16.mxu1 %v1355_v15 }
 0x16a   : > { %1240 = vmatpush3.bf16.msra.mxu0 %v1356_v16  ;;  %1262 = vmatpush3.bf16.msra.mxu1 %v1357_v17 }
 0x220   : > { %v653_v29 = vpop.f32.mrb[0].mxu0  ;;  %v694_v30 = vpop.f32.mrb[0].mxu1 }
 0x221   : > { %v654_v31 = vadd.f32 %v653_v29, %v442_v25  ;;  %v695_v32 = vadd.f32 %v694_v30, %v450_v26  ;;  %v655_v33 = vpop.f32.mrb[1].mxu0  ;;  %v696_v34 = vpop.f32.mrb[1].mxu1 }
 0x222   : > { %v656_v35 = vadd.f32 %v655_v33, %v446_v27  ;;  %v697_v36 = vadd.f32 %v696_v34, %v454_v28  ;;  %v657_v37 = vpop.f32.mrb[2].mxu0  ;;  %v698_v38 = vpop.f32.mrb[2].mxu1 }
 0x223   : > { %v701_v39 = vmax.f32 %v654_v31, 0.0  ;;  %v703_v40 = vmax.f32 %v695_v32, 0.0  ;;  %v658_v41 = vpop.f32.mrb[3].mxu0  ;;  %v699_v42 = vpop.f32.mrb[3].mxu1 }
 0x224   : > { %v702_v43 = vmax.f32 %v656_v35, 0.0  ;;  %v704_v44 = vmax.f32 %v697_v36, 0.0 }
 0x225   : > { %v705_v47 = vpack.c.bf16 %v701_v39, %v701_v39  ;;  %v707_v48 = vpack.c.bf16 %v703_v40, %v703_v40 }
 0x226   : > { %v706_v45 = vpack.c.bf16 %v702_v43, %v702_v43  ;;  %v708_v46 = vpack.c.bf16 %v704_v44, %v704_v44 }
 0x228   : > { %1004 = vmatprep.mubr.bf16.mxu0 %v706_v45  ;;  %1044 = vmatprep.mubr.bf16.mxu1 %v708_v46 }
 0x229   : > { %1005 = vmatmul.mubr.bf16.vlgmr.msra.gmra.mrb[4].mxu0 %v705_v47  ;;  %1045 = vmatmul.mubr.bf16.vlgmr.msra.gmra.mrb[4].mxu1 %v707_v48 }
 0x2fc   : > { %v1241_v49 = vpop.f32.mrb[4].mxu0  ;;  %v1263_v51 = vpop.f32.mrb[4].mxu1 }
 0x2fd   : > { %v1242_v53 = vpop.f32.mrb[5].mxu0  ;;  %v1264_v54 = vpop.f32.mrb[5].mxu1 }
 0x2fe   : > { %v1243_v55 = vadd.f32 %v1242_v53, %v1241_v49  ;;  %v1265_v56 = vadd.f32 %v1264_v54, %v1263_v51  ;;  %v1244_v57 = vpop.f32.mrb[6].mxu0  ;;  %v1266_v58 = vpop.f32.mrb[6].mxu1 }
 0x2ff   : > { %v1245_v59 = vpop.f32.mrb[7].mxu0  ;;  %v1267_v60 = vpop.f32.mrb[7].mxu1 }
 0x300   : > { %v1007_v61 = vadd.f32 %v1243_v55, %v1188_v52 }
 0x302   : > { %v1047_v62 = vadd.f32 %v1265_v56, %v1007_v61 }
 0x304   : > { %v1052_v63 = vadd.f32 %v1047_v62, %v1552_v50  ;;  %v1222_v50 = vld [vmem:[%s1675_s9] ss:$0 sm:$0xff] }
 0x306   : > { %1055 = vadd.xlane.f32.xlu1 %v1052_v63 }
 0x393   : > { %v1056_v0 = vpop.xlane.xlu1 %1055 }
 0x394   : > { %v1057_v1 = vmul.f32 0.0078125, %v1056_v0 }
 0x396   : > { %v1058_v2 = vsub.f32 %v1052_v63, %v1057_v1 }
 0x398   : > { %v1059_v3 = vmul.f32 %v1058_v2, %v1058_v2 }
 0x39a   : > { %1060 = vadd.xlane.f32.xlu1 %v1059_v3 }
 0x427   : > { %v1061_v4 = vpop.xlane.xlu1 %1060 }
 0x428   : > { %v1062_v5 = vmul.f32 0.0078125, %v1061_v4 }
 0x42a   : > { %v1063_v6 = vadd.f32 1e-05, %v1062_v5 }
 0x42c   : > { %1360 = vrsqrt.f32 %v1063_v6 }
 0x436   : > { %v1361_v7 = vpop.eup %1360 }
 0x437   : > { %v1065_v9 = vmul.f32 %v1361_v7, %v1058_v2 }
 0x439   : > { %v1072_v10 = vmul.f32 %v1221_v8, %v1065_v9 }
 0x43b   : > { %v1079_v11 = vadd.f32 %v1222_v50, %v1072_v10 }
 0x43d   : > { %1080 = vst [vmem:[%s371_s20] sm:$0xff] %v1079_v11 }
 0x43e PF: > { %s20_s13 = sadd.s32 1, %s1368_s13  }
 0x43f   : > { %p17_p4 = scmp.ge.s32.totalorder %s20_s13, 4  }
 0x441   :  { %19 = sbr.rel (!%p17_p4) target bundleno = 1 (0x1), region = 93 }

// kernel: transformer_forward.19
= control target key start
LH: loop header
LB: loop body
LE: loop exit
PB: predicated region body
PF: predicated region fallthrough
CT: control target
= control target key end

     0   :  { %s1871_s30 = smov 0   ;;  %s2141_s0 = inlined_call_operand.vmem [shape: f32[2,16,128], index: 0, kind: input, shape index: {}, may-alias: {0,1}]   ;;  %s2142_s1 = inlined_call_operand.vmem [shape: f32[2,16,128], index: 1, kind: input, shape index: {}, may-alias: {0,1}]   ;;  %s2143_s2 = inlined_call_operand.vmem [shape: f32[2,8,128], index: 2, kind: input, shape index: {}]   ;;  %s2144_s3 = inlined_call_operand.vmem [shape: f32[2,8,16], index: 3, kind: input, shape index: {}]   ;;  %s2145_s4 = inlined_call_operand.vmem [shape: bf16[128,128], index: 4, kind: input, shape index: {}]   ;;  %s2146_s5 = inlined_call_operand.vmem [shape: bf16[128,128], index: 5, kind: input, shape index: {}]   ;;  %s2147_s6 = inlined_call_operand.vmem [shape: bf16[128,128], index: 6, kind: input, shape index: {}]   ;;  %s2148_s7 = inlined_call_operand.vmem [shape: bf16[128,128], index: 7, kind: input, shape index: {}]   ;;  %s2149_s8 = inlined_call_operand.vmem [shape: f32[1,128], index: 8, kind: input, shape index: {}]   ;;  %s2150_s9 = inlined_call_operand.vmem [shape: f32[2,8,128], index: 9, kind: output, shape index: {}]  }
   0x1 LB: > { %s1491_s10 = sadd.s32 4294967295, %s1814_s30   ;;  %p1495_p0 = scmp.ge.s32.totalorder %s1814_s30, 1  ;;  %s1814_s30 = sphi %s1871_s30, %s19_s30  }
   0x2   : > { %p315_p1 = scmp.lt.s32.totalorder %s1814_s30, 3 }
   0x4   : > { %p316_p2 = pnand %p1495_p0, %p315_p1 }
   0x5   : > { %v1760_v0 = vld [vmem:[%s2145_s4] sm:$0xff] (!%p316_p2)   ;;  %v1816_v1 = vmov (!%p316_p2), 0.0   ;;  %v1761_v2 = vld [vmem:[%s2145_s4 + $0x8] sm:$0xff] (!%p316_p2)   ;;  %vm1817_vm0 = vmmov (!%p316_p2), 0   ;;  %v1762_v4 = vld [vmem:[%s2145_s4 + $0x10] sm:$0xff] (!%p316_p2)   ;;  %p363_p3 = scmp.lt.s32.totalorder (!%p316_p2), %s1491_s10, 1 }
   0x6   : > { %319 = sbr.rel (%p316_p2) target bundleno = 3077 (0xc05), region = 56  ;;  %1607 = vmatprep.subr.bf16.mxu0 (!%p316_p2), %v1816_v1  ;;  %1627 = vmatprep.subr.bf16.mxu1 (!%p316_p2), %v1816_v1  ;;  %v1765_v3 = vld [vmem:[%s2146_s5] sm:$0xff] (!%p316_p2)   ;;  %v1767_v5 = vld [vmem:[%s2146_s5 + $0x8] sm:$0xff] (!%p316_p2)   ;;  %v1763_v6 = vld [vmem:[%s2145_s4 + $0x18] sm:$0xff] (!%p316_p2)   ;;  %vm713_vm1 = vcmask (!%p316_p2), 261120   ;;  %vm762_vm3 = vcmask (!%p316_p2), 130048  }
   0x7   : > { %1608 = vmatpush3.bf16.msra.mxu0 (!%p316_p2), %v1760_v0  ;;  %1623 = vmatprep.mubr.msk.bf16.mxu0 (!%p316_p2), %vm1817_vm0, %v1816_v1  ;;  %v1769_v7 = vld [vmem:[%s2146_s5 + $0x10] sm:$0xff] (!%p316_p2)   ;;  %v1764_v8 = vld [vmem:[%s2145_s4 + $0x20] sm:$0xff] (!%p316_p2)   ;;  %v1771_v9 = vld [vmem:[%s2146_s5 + $0x18] sm:$0xff] (!%p316_p2)   ;;  %s1820_s26 = smov (!%p316_p2), 32  }
   0x8   : > { %1609 = vmatprep.subr.bf16.mxu0 (!%p316_p2), %v1816_v1  ;;  %1643 = vmatprep.mubr.msk.bf16.mxu1 (!%p316_p2), %vm1817_vm0, %v1816_v1  ;;  %v1766_v10 = vld [vmem:[%s2145_s4 + $0x28] sm:$0xff] (!%p316_p2)   ;;  %v1773_v11 = vld [vmem:[%s2146_s5 + $0x20] sm:$0xff] (!%p316_p2)   ;;  %v1768_v12 = vld [vmem:[%s2145_s4 + $0x30] sm:$0xff] (!%p316_p2)  }
   0x9   : > { %1628 = vmatpush3.bf16.msra.mxu1 (!%p316_p2), %v1765_v3  ;;  %v1775_v13 = vld [vmem:[%s2146_s5 + $0x28] sm:$0xff] (!%p316_p2)   ;;  %v1770_v14 = vld [vmem:[%s2145_s4 + $0x38] sm:$0xff] (!%p316_p2)   ;;  %v1777_v17 = vld [vmem:[%s2146_s5 + $0x30] sm:$0xff] (!%p316_p2)  }
   0xa   : > { %1629 = vmatprep.subr.bf16.mxu1 (!%p316_p2), %v1816_v1  ;;  %v1772_v18 = vld [vmem:[%s2147_s6] sm:$0xff] (!%p316_p2)   ;;  %v1779_v20 = vld [vmem:[%s2146_s5 + $0x38] sm:$0xff] (!%p316_p2)   ;;  %v1774_v23 = vld [vmem:[%s2147_s6 + $0x8] sm:$0xff] (!%p316_p2)  }
   0xb   : > { %1610 = vmatpush3.bf16.msra.mxu0 (!%p316_p2), %v1761_v2  ;;  %v1776_v25 = vld [vmem:[%s2147_s6 + $0x10] sm:$0xff] (!%p316_p2)   ;;  %v1778_v26 = vld [vmem:[%s2147_s6 + $0x18] sm:$0xff] (!%p316_p2)   ;;  %v1780_v27 = vld [vmem:[%s2147_s6 + $0x20] sm:$0xff] (!%p316_p2)  }
   0xc   : > { %1611 = vmatprep.subr.bf16.mxu0 (!%p316_p2), %v1816_v1  ;;  %v1781_v28 = vld [vmem:[%s2147_s6 + $0x28] sm:$0xff] (!%p316_p2)   ;;  %v1782_v29 = vld [vmem:[%s2147_s6 + $0x30] sm:$0xff] (!%p316_p2)   ;;  %v1783_v30 = vld [vmem:[%s2147_s6 + $0x38] sm:$0xff] (!%p316_p2)  }
   0xd   : > { %1630 = vmatpush3.bf16.msra.mxu1 %v1767_v5  ;;  %s2152_s10 = smov (!%p363_p3, %s1491_s10), 1 }
   0xe   : > { %1631 = vmatprep.subr.bf16.mxu1 %v1816_v1  ;;  %s1550_s12 = sshll.u32 %s2152_s10, 4  ;;  %s1990_s24 = sshll.u32 %s2152_s10, 3 }
   0xf   : > { %1612 = vmatpush3.bf16.msra.mxu0 %v1762_v4  ;;  %s367_s17 = scalar_lea.vmem %s2141_s0, %s1550_s12  ;;  %s372_s11 = scalar_lea.vmem %s2142_s1, %s1550_s12 }
  0x10   : > { %1613 = vmatprep.subr.bf16.mxu0 %v1816_v1  ;;  %v386_v15 = vld [vmem:[%s367_s17] sm:$0xff]  ;;  %v387_v16 = vld [vmem:[%s367_s17 + $0x8] sm:$0xff]  ;;  %s376_s29 = scalar_lea.vmem %s2143_s2, %s1990_s24  ;;  %s1818_s10 = smov 96  }
  0x11   : > { %1632 = vmatpush3.bf16.msra.mxu1 %v1769_v7  ;;  %v388_v19 = vpack.c.bf16 %v387_v16, %v386_v15  ;;  %v494_v21 = vld [vmem:[%s372_s11] sm:$0xff]  ;;  %v495_v22 = vld [vmem:[%s372_s11 + $0x8] sm:$0xff]  ;;  %s380_s16 = scalar_lea.vmem %s2144_s3, %s1990_s24  ;;  %s1819_s12 = smov 64  }
  0x12   : > { %1633 = vmatprep.subr.bf16.mxu1 %v1816_v1  ;;  %v496_v24 = vpack.c.bf16 %v495_v22, %v494_v21  ;;  %v602_v31 = vld [vmem:[%s376_s29] sm:$0xff]  ;;  %s384_s19 = scalar_lea.vmem %s2150_s9, %s1990_s24 }
  0x13   : > { %1614 = vmatpush3.bf16.msra.mxu0 %v1763_v6  ;;  %v603_v32 = vpack.c.bf16 %v602_v31, %v602_v31  ;;  %v2030_v49 = vld [vmem:[%s380_s16] sm:$0xff] }
  0x14   : > { %1615 = vmatprep.subr.bf16.mxu0 %v1816_v1  ;;  %vm709_vm2 = vcmp.eq.f32.partialorder %v2030_v49, 0.0 }
  0x15   : > { %1634 = vmatpush3.bf16.msra.mxu1 %v1771_v9 }
  0x16   : > { %1635 = vmatprep.subr.bf16.mxu1 %v1816_v1 }
  0x17   : > { %1616 = vmatpush3.bf16.msra.mxu0 %v1764_v8 }
  0x18   : > { %1617 = vmatprep.subr.bf16.mxu0 %v1816_v1 }
  0x19   : > { %1636 = vmatpush3.bf16.msra.mxu1 %v1773_v11 }
  0x1a   : > { %1637 = vmatprep.subr.bf16.mxu1 %v1816_v1 }
  0x1b   : > { %1618 = vmatpush3.bf16.msra.mxu0 %v1766_v10 }
  0x1c   : > { %1619 = vmatprep.subr.bf16.mxu0 %v1816_v1 }
  0x1d   : > { %1638 = vmatpush3.bf16.msra.mxu1 %v1775_v13 }
  0x1e   : > { %1639 = vmatprep.subr.bf16.mxu1 %v1816_v1 }
  0x1f   : > { %1620 = vmatpush3.bf16.msra.mxu0 %v1768_v12 }
  0x20   : > { %1621 = vmatprep.subr.bf16.mxu0 %v1816_v1 }
  0x21   : > { %1640 = vmatpush3.bf16.msra.mxu1 %v1777_v17 }
  0x22   : > { %1641 = vmatprep.subr.bf16.mxu1 %v1816_v1 }
  0x23   : > { %1622 = vmatpush3.bf16.msra.mxu0 %v1770_v14 }
  0x24   : > { %1647 = vmatprep.subr.bf16.mxu0 %v1816_v1 }
  0x25   : > { %1642 = vmatpush3.bf16.msra.mxu1 %v1779_v20 }
  0x26   : > { %1624 = vmatmul.mubr.bf16.vlgmr.msra.gmra.mrb[0].mxu0 %v388_v19  ;;  %1667 = vmatprep.subr.bf16.mxu1 %v1816_v1 }
  0x27   : > { %1648 = vmatpush3.bf16.msra.mxu0 %v1772_v18  ;;  %1663 = vmatprep.mubr.msk.bf16.mxu0 %vm1817_vm0, %v1816_v1 }
  0x28   : > { %1649 = vmatprep.subr.bf16.mxu0 %v1816_v1  ;;  %1644 = vmatmul.mubr.bf16.vlgmr.msra.gmra.mrb[0].mxu1 %v496_v24  ;;  %v1787_v24 = vld [vmem:[%s2148_s7 + $0x18] sm:$0xff]  }
  0x29   : > { %1669 = vmatprep.mubr.msk.bf16.mxu1 %vm1817_vm0, %v1816_v1 }
  0x2b   : > { %1650 = vmatpush3.bf16.msra.mxu0 %v1774_v23  ;;  %v1786_v23 = vld [vmem:[%s2148_s7 + $0x10] sm:$0xff]  }
  0x2c   : > { %1651 = vmatprep.subr.bf16.mxu0 %v1816_v1 }
  0x2f   : > { %1652 = vmatpush3.bf16.msra.mxu0 %v1776_v25 }
  0x30   : > { %1653 = vmatprep.subr.bf16.mxu0 %v1816_v1 }
  0x33   : > { %1654 = vmatpush3.bf16.msra.mxu0 %v1778_v26 }
  0x34   : > { %1655 = vmatprep.subr.bf16.mxu0 %v1816_v1 }
  0x37   : > { %1656 = vmatpush3.bf16.msra.mxu0 %v1780_v27 }
  0x38   : > { %1657 = vmatprep.subr.bf16.mxu0 %v1816_v1 }
  0x3b   : > { %1658 = vmatpush3.bf16.msra.mxu0 %v1781_v28  ;;  %v1784_v28 = vld [vmem:[%s2148_s7] sm:$0xff]  }
  0x3c   : > { %1659 = vmatprep.subr.bf16.mxu0 %v1816_v1 }
  0x3f   : > { %1660 = vmatpush3.bf16.msra.mxu0 %v1782_v29 }
  0x40   : > { %1661 = vmatprep.subr.bf16.mxu0 %v1816_v1 }
  0x43   : > { %1662 = vmatpush3.bf16.msra.mxu0 %v1783_v30  ;;  %v1785_v30 = vld [vmem:[%s2148_s7 + $0x8] sm:$0xff]  }
  0x44   : > { %1691 = vmatprep.subr.bf16.mxu0 %v1816_v1 }
  0x46   : > { %1664 = vmatmul.mubr.bf16.vlgmr.msra.gmra.mrb[4].mxu0 %v603_v32 }
  0x47   : > { %1695 = vmatprep.mubr.msk.bf16.mxu0 %vm1817_vm0, %v1816_v1  ;;  %1692 = vmatpush3.bf16.msra.mxu0 %v1786_v23 }
  0x48   : > { %1693 = vmatprep.subr.bf16.mxu0 %v1816_v1 }
  0x4b   : > { %1694 = vmatpush3.bf16.msra.mxu0 %v1787_v24 }
  0x4c   : > { %1707 = vmatprep.subr.bf16.mxu0 %v1816_v1 }
  0xf9   : > { %v487_v33 = vpop.f32.mrb[0].mxu0 }
  0xfa   : > { %v1625_v34 = vpop.f32.mrb[1].mxu0 }
  0xfb   : > { %v490_v35 = vpop.f32.mrb[2].mxu0  ;;  %v595_v38 = vpop.f32.mrb[0].mxu1 }
  0xfc   : > { %v2007_v36 = vpack.c.bf16 %v490_v35, %v487_v33  ;;  %v1626_v37 = vpop.f32.mrb[3].mxu0  ;;  %v1645_v39 = vpop.f32.mrb[1].mxu1 }
  0xfd   : > { %v598_v40 = vpop.f32.mrb[2].mxu1 }
  0xfe   : > { %v2009_v41 = vpack.c.bf16 %v598_v40, %v595_v38  ;;  %v1646_v42 = vpop.f32.mrb[3].mxu1 }
 0x100   : > { %827 = vrot.lane.b32.xlu1 %v2009_v41, %s1818_s10  ;;  %v718_v43 = vsel %vm713_vm1, %v2009_v41, 0 }
 0x101   : > { %1668 = vmatpush3.bf16.xpose.msra.mxu1 %v718_v43 }
 0x102   : > { %1673 = vmatprep.subr.bf16.mxu1 %v1816_v1 }
 0x119   : > { %v702_v44 = vpop.f32.mrb[4].mxu0 }
 0x11a   : > { %v2016_v45 = vpack.c.bf16 %v702_v44, %v702_v44  ;;  %v1665_v46 = vpop.f32.mrb[5].mxu0 }
 0x11b   : > { %v705_v47 = vpop.f32.mrb[6].mxu0 }
 0x11c   : > { %824 = vrot.lane.b32.xlu1 %v2016_v45, %s1818_s10  ;;  %v1666_v48 = vpop.f32.mrb[7].mxu0  ;;  %1670 = vmatmul.mubr.msk.bf16.vlgmr.msra.gmra.mrb[4].mxu1 %vm713_vm1, %v2016_v45 }
 0x11d   : > { %1674 = vmatpush3.bf16.msra.mxu1 %v2007_v36  ;;  %1675 = vmatprep.mubr.msk.bf16.mxu1 %vm1817_vm0, %v1816_v1 }
 0x11e   : > { %1679 = vmatprep.subr.bf16.mxu1 %v1816_v1 }
 0x172   : > { %v828_v2 = vpop.permute.xlu1 %827 }
 0x173   : > { %v833_v4 = vsel %vm713_vm1, %v828_v2, 0 }
 0x18e   : > { %v825_v5 = vpop.permute.xlu1 %824 }
 0x1ef   : > { %v754_v50 = vpop.f32.mrb[4].mxu1 }
 0x1f0   : > { %v760_v51 = vsel %vm709_vm2, -1e+20, %v754_v50  ;;  %v1671_v52 = vpop.f32.mrb[5].mxu1 }
 0x1f1   : > { %v761_v53 = vmul.f32 0.088388346, %v760_v51  ;;  %v757_v54 = vpop.f32.mrb[6].mxu1 }
 0x1f2   : > { %v1672_v55 = vpop.f32.mrb[7].mxu1 }
 0x1f3   : > { %v763_v56 = vsel %vm762_vm3, %v761_v53, -inf }
 0x1f4   : > { %764 = vmax.xlane.f32.xlu0 %v763_v56 }
 0x281   : > { %v765_v57 = vpop.xlane.xlu0 %764 }
 0x282   : > { %v766_v58 = vsub.f32 %v761_v53, %v765_v57 }
 0x284   : > { %v767_v59 = vmul.f32 1.442695, %v766_v58 }
 0x286   : > { %1792 = vpow2.f32 %v767_v59 }
 0x290   : > { %v1793_v60 = vpop.eup %1792 }
 0x291   : > { %v769_v61 = vsel %vm762_vm3, %v1793_v60, 0.0 }
 0x292   : > { %770 = vadd.xlane.f32.xlu0 %v769_v61 }
 0x31f   : > { %v771_v62 = vpop.xlane.xlu0 %770 }
 0x320   : > { %1794 = vrcp.f32 %v771_v62 }
 0x32a   : > { %v1795_v63 = vpop.eup %1794 }
 0x32b   : > { %v773_v0 = vmul.f32 %v1795_v63, %v1793_v60 }
 0x32d   : > { %v774_v3 = vpack.c.bf16 %v773_v0, %v773_v0 }
 0x32f   : > { %1676 = vmatmul.mubr.msk.bf16.vlgmr.msra.gmra.mrb[8].mxu1 %vm762_vm3, %v774_v3  ;;  %v1788_v3 = vld [vmem:[%s2148_s7 + $0x20] sm:$0xff]  }
 0x330   : > { %1680 = vmatpush3.bf16.xpose.msra.mxu1 %v833_v4  ;;  %1681 = vmatprep.mubr.msk.bf16.mxu1 %vm1817_vm0, %v1816_v1 }
 0x331   : > { %1685 = vmatprep.subr.bf16.mxu1 %v1816_v1 }
 0x337   : > { %1682 = vmatmul.mubr.msk.bf16.vlgmr.msra.gmra.mrb[12].mxu1 %vm713_vm1, %v825_v5 }
 0x338   : > { %1687 = vmatprep.mubr.msk.bf16.mxu1 %vm1817_vm0, %v1816_v1 }
 0x402   : > { %v812_v6 = vpop.f32.mrb[8].mxu1 }
 0x403   : > { %v1677_v7 = vpop.f32.mrb[9].mxu1  ;;  %v818_v31 = vpack.c.bf16 %v812_v6, %v812_v6 }
 0x404   : > { %v815_v8 = vpop.f32.mrb[10].mxu1 }
 0x405   : > { %v1678_v9 = vpop.f32.mrb[11].mxu1 }
 0x40a   : > { %v869_v10 = vpop.f32.mrb[12].mxu1 }
 0x40b   : > { %v875_v11 = vsel %vm709_vm2, -1e+20, %v869_v10  ;;  %v1683_v12 = vpop.f32.mrb[13].mxu1 }
 0x40c   : > { %v876_v13 = vmul.f32 0.088388346, %v875_v11  ;;  %v872_v14 = vpop.f32.mrb[14].mxu1 }
 0x40d   : > { %v1684_v15 = vpop.f32.mrb[15].mxu1 }
 0x40e   : > { %v877_v16 = vsel %vm762_vm3, %v876_v13, -inf }
 0x40f   : > { %878 = vmax.xlane.f32.xlu0 %v877_v16 }
 0x425   : > { %890 = vrot.lane.b32.xlu0 %v2007_v36, %s1818_s10 }
 0x429   : > { %1053 = vrot.lane.b32.xlu0 %v2009_v41, %s1819_s12 }
 0x42d   : > { %1051 = vrot.lane.b32.xlu0 %v2016_v45, %s1819_s12 }
 0x49c   : > { %v879_v17 = vpop.xlane.xlu0 %878 }
 0x49d   : > { %v880_v18 = vsub.f32 %v876_v13, %v879_v17 }
 0x49f   : > { %v881_v19 = vmul.f32 1.442695, %v880_v18 }
 0x4a0   : > { %v891_v20 = vpop.permute.xlu0 %890 }
 0x4a1   : > { %1796 = vpow2.f32 %v881_v19  ;;  %1686 = vmatpush3.bf16.msra.mxu1 %v891_v20 }
 0x4a2   : > { %1699 = vmatprep.subr.bf16.mxu1 %v1816_v1 }
 0x4a4   : > { %v1054_v33 = vpop.permute.xlu0 %1053 }
 0x4a5   : > { %v1059_v39 = vsel %vm713_vm1, %v1054_v33, 0 }
 0x4a8   : > { %v1052_v44 = vpop.permute.xlu0 %1051 }
 0x4ab   : > { %v1797_v21 = vpop.eup %1796 }
 0x4ac   : > { %v883_v22 = vsel %vm762_vm3, %v1797_v21, 0.0 }
 0x4ad   : > { %884 = vadd.xlane.f32.xlu1 %v883_v22 }
 0x4be   : > { %1115 = vrot.lane.b32.xlu1 %v2007_v36, %s1819_s12 }
 0x53a   : > { %v885_v25 = vpop.xlane.xlu1 %884 }
 0x53b   : > { %1798 = vrcp.f32 %v885_v25 }
 0x53e   : > { %v1116_v32 = vpop.permute.xlu1 %1115 }
 0x545   : > { %v1799_v26 = vpop.eup %1798 }
 0x546   : > { %v887_v27 = vmul.f32 %v1799_v26, %v1797_v21 }
 0x548   : > { %v888_v29 = vpack.c.bf16 %v887_v27, %v887_v27  ;;  %v1790_v27 = vld [vmem:[%s2148_s7 + $0x30] sm:$0xff]  }
 0x54a   : > { %1688 = vmatmul.mubr.msk.bf16.vlgmr.msra.gmra.mrb[16].mxu1 %vm762_vm3, %v888_v29 }
 0x54b   : > { %1700 = vmatpush3.bf16.msra.mxu1 %v1784_v28  ;;  %1703 = vmatprep.mubr.msk.bf16.mxu1 %vm1817_vm0, %v1816_v1  ;;  %v1791_v28 = vld [vmem:[%s2148_s7 + $0x38] sm:$0xff]  }
 0x54c   : > { %1701 = vmatprep.subr.bf16.mxu1 %v1816_v1 }
 0x54f   : > { %1702 = vmatpush3.bf16.msra.mxu1 %v1785_v30 }
 0x550   : > { %1713 = vmatprep.subr.bf16.mxu1 %v1816_v1 }
 0x552   : > { %1704 = vmatmul.mubr.msk.bf16.vlgmr.msra.gmra.mrb[20].mxu1 %vm713_vm1, %v818_v31 }
 0x553   : > { %1714 = vmatpush3.bf16.msra.mxu1 %v1116_v32  ;;  %1715 = vmatprep.mubr.msk.bf16.mxu1 %vm1817_vm0, %v1816_v1 }
 0x554   : > { %1727 = vmatprep.subr.bf16.mxu1 %v1816_v1 }
 0x61d   : > { %v930_v34 = vpop.f32.mrb[16].mxu1 }
 0x61e   : > { %v936_v35 = vpack.c.bf16 %v930_v34, %v930_v34  ;;  %v1689_v37 = vpop.f32.mrb[17].mxu1 }
 0x61f   : > { %v933_v38 = vpop.f32.mrb[18].mxu1 }
 0x620   : > { %v1690_v40 = vpop.f32.mrb[19].mxu1  ;;  %1696 = vmatmul.mubr.msk.bf16.vlgmr.msra.gmra.mrb[8].mxu0 %vm713_vm1, %v936_v35 }
 0x621   : > { %1708 = vmatpush3.bf16.xpose.msra.mxu0 %v1059_v39  ;;  %1709 = vmatprep.mubr.msk.bf16.mxu0 %vm1817_vm0, %v1816_v1 }
 0x622   : > { %1719 = vmatprep.subr.bf16.mxu0 %v1816_v1 }
 0x625   : > { %v1045_v42 = vpop.f32.mrb[20].mxu1 }
 0x626   : > { %v1705_v43 = vpop.f32.mrb[21].mxu1 }
 0x627   : > { %v1048_v46 = vpop.f32.mrb[22].mxu1 }
 0x628   : > { %v1706_v47 = vpop.f32.mrb[23].mxu1  ;;  %1710 = vmatmul.mubr.msk.bf16.vlgmr.msra.gmra.mrb[12].mxu0 %vm713_vm1, %v1052_v44  ;;  %v1547_v44 = vld [vmem:[%s2149_s8] ss:$0 sm:$0xff] }
 0x629   : > { %1723 = vmatprep.mubr.msk.bf16.mxu0 %vm1817_vm0, %v1816_v1  ;;  %1720 = vmatpush3.bf16.msra.mxu0 %v1788_v3 }
 0x62a   : > { %1721 = vmatprep.subr.bf16.mxu0 %v1816_v1 }
 0x6f3   : > { %v990_v48 = vpop.f32.mrb[8].mxu0 }
 0x6f4   : > { %v2086_v50 = vadd.f32 %v1045_v42, %v990_v48  ;;  %v1697_v51 = vpop.f32.mrb[9].mxu0 }
 0x6f5   : > { %v993_v52 = vpop.f32.mrb[10].mxu0 }
 0x6f6   : > { %v1698_v53 = vpop.f32.mrb[11].mxu0 }
 0x6fb   : > { %v1095_v54 = vpop.f32.mrb[12].mxu0 }
 0x6fc   : > { %v1101_v55 = vsel %vm709_vm2, -1e+20, %v1095_v54  ;;  %v1711_v56 = vpop.f32.mrb[13].mxu0 }
 0x6fd   : > { %v1102_v57 = vmul.f32 0.088388346, %v1101_v55  ;;  %v1098_v58 = vpop.f32.mrb[14].mxu0 }
 0x6fe   : > { %v1712_v59 = vpop.f32.mrb[15].mxu0 }
 0x6ff   : > { %v1103_v60 = vsel %vm762_vm3, %v1102_v57, -inf }
 0x700   : > { %1104 = vmax.xlane.f32.xlu0 %v1103_v60 }
 0x78d   : > { %v1105_v61 = vpop.xlane.xlu0 %1104 }
 0x78e   : > { %v1106_v62 = vsub.f32 %v1102_v57, %v1105_v61 }
 0x790   : > { %v1107_v63 = vmul.f32 1.442695, %v1106_v62 }
 0x792   : > { %1800 = vpow2.f32 %v1107_v63 }
 0x79c   : > { %v1801_v0 = vpop.eup %1800 }
 0x79d   : > { %v1109_v2 = vsel %vm762_vm3, %v1801_v0, 0.0 }
 0x79e   : > { %1110 = vadd.xlane.f32.xlu1 %v1109_v2 }
 0x7af   : > { %1224 = vrot.lane.b32.xlu1 %v2009_v41, %s1820_s26 }
 0x7b3   : > { %1222 = vrot.lane.b32.xlu1 %v2016_v45, %s1820_s26  ;;  %v1789_v45 = vld [vmem:[%s2148_s7 + $0x28] sm:$0xff]  }
 0x7b4   : > { %1722 = vmatpush3.bf16.msra.mxu0 %v1789_v45 }
 0x7b5   : > { %1733 = vmatprep.subr.bf16.mxu0 %v1816_v1 }
 0x82b   : > { %v1111_v4 = vpop.xlane.xlu1 %1110 }
 0x82c   : > { %1802 = vrcp.f32 %v1111_v4 }
 0x82f   : > { %v1225_v7 = vpop.permute.xlu1 %1224 }
 0x830   : > { %v1230_v9 = vsel %vm713_vm1, %v1225_v7, 0 }
 0x833   : > { %v1223_v41 = vpop.permute.xlu1 %1222 }
 0x836   : > { %v1803_v5 = vpop.eup %1802 }
 0x837   : > { %v1113_v6 = vmul.f32 %v1803_v5, %v1801_v0 }
 0x839   : > { %v1114_v8 = vpack.c.bf16 %v1113_v6, %v1113_v6 }
 0x83b   : > { %1716 = vmatmul.mubr.msk.bf16.vlgmr.msra.gmra.mrb[24].mxu1 %vm762_vm3, %v1114_v8 }
 0x83c   : > { %1728 = vmatpush3.bf16.xpose.msra.mxu1 %v1230_v9  ;;  %1729 = vmatprep.mubr.msk.bf16.mxu1 %vm1817_vm0, %v1816_v1 }
 0x83d   : > { %1739 = vmatprep.subr.bf16.mxu1 %v1816_v1 }
 0x843   : > { %1730 = vmatmul.mubr.msk.bf16.vlgmr.msra.gmra.mrb[28].mxu1 %vm713_vm1, %v1223_v41 }
 0x844   : > { %1743 = vmatprep.mubr.msk.bf16.mxu1 %vm1817_vm0, %v1816_v1  ;;  %1740 = vmatpush3.bf16.msra.mxu1 %v1790_v27 }
 0x845   : > { %1741 = vmatprep.subr.bf16.mxu1 %v1816_v1 }
 0x848   : > { %1742 = vmatpush3.bf16.msra.mxu1 %v1791_v28 }
 0x90e   : > { %v1155_v10 = vpop.f32.mrb[24].mxu1 }
 0x90f   : > { %v1161_v11 = vpack.c.bf16 %v1155_v10, %v1155_v10  ;;  %v1717_v12 = vpop.f32.mrb[25].mxu1 }
 0x910   : > { %v1158_v13 = vpop.f32.mrb[26].mxu1 }
 0x911   : > { %v1718_v14 = vpop.f32.mrb[27].mxu1  ;;  %1724 = vmatmul.mubr.msk.bf16.vlgmr.msra.gmra.mrb[16].mxu0 %vm713_vm1, %v1161_v11 }
 0x912   : > { %1735 = vmatprep.mubr.msk.bf16.mxu0 %vm1817_vm0, %v1816_v1 }
 0x916   : > { %v1266_v15 = vpop.f32.mrb[28].mxu1 }
 0x917   : > { %v1272_v16 = vsel %vm709_vm2, -1e+20, %v1266_v15  ;;  %v1731_v17 = vpop.f32.mrb[29].mxu1 }
 0x918   : > { %v1273_v18 = vmul.f32 0.088388346, %v1272_v16  ;;  %v1269_v19 = vpop.f32.mrb[30].mxu1 }
 0x919   : > { %v1732_v20 = vpop.f32.mrb[31].mxu1 }
 0x91a   : > { %v1274_v21 = vsel %vm762_vm3, %v1273_v18, -inf }
 0x91b   : > { %1275 = vmax.xlane.f32.xlu0 %v1274_v21 }
 0x931   : > { %1286 = vrot.lane.b32.xlu0 %v2007_v36, %s1820_s26 }
 0x9a8   : > { %v1276_v22 = vpop.xlane.xlu0 %1275 }
 0x9a9   : > { %v1277_v23 = vsub.f32 %v1273_v18, %v1276_v22 }
 0x9ab   : > { %v1278_v24 = vmul.f32 1.442695, %v1277_v23 }
 0x9ac   : > { %v1287_v25 = vpop.permute.xlu0 %1286 }
 0x9ad   : > { %1804 = vpow2.f32 %v1278_v24  ;;  %1734 = vmatpush3.bf16.msra.mxu0 %v1287_v25 }
 0x9b7   : > { %v1805_v26 = vpop.eup %1804 }
 0x9b8   : > { %v1280_v49 = vsel %vm762_vm3, %v1805_v26, 0.0 }
 0x9b9   : > { %1281 = vadd.xlane.f32.xlu1 %v1280_v49 }
 0x9e4   : > { %v1215_v36 = vpop.f32.mrb[16].mxu0 }
 0x9e5   : > { %v1221_v29 = vadd.f32 %v1215_v36, %v2086_v50  ;;  %v1725_v30 = vpop.f32.mrb[17].mxu0 }
 0x9e6   : > { %v1218_v31 = vpop.f32.mrb[18].mxu0 }
 0x9e7   : > { %v1726_v32 = vpop.f32.mrb[19].mxu0 }
 0xa46   : > { %v1282_v33 = vpop.xlane.xlu1 %1281 }
 0xa47   : > { %1806 = vrcp.f32 %v1282_v33 }
 0xa51   : > { %v1807_v34 = vpop.eup %1806 }
 0xa52   : > { %v1284_v35 = vmul.f32 %v1807_v34, %v1805_v26 }
 0xa54   : > { %v1285_v37 = vpack.c.bf16 %v1284_v35, %v1284_v35 }
 0xa56   : > { %1736 = vmatmul.mubr.msk.bf16.vlgmr.msra.gmra.mrb[20].mxu0 %vm762_vm3, %v1285_v37 }
 0xb29   : > { %v1326_v38 = vpop.f32.mrb[20].mxu0 }
 0xb2a   : > { %v1332_v39 = vpack.c.bf16 %v1326_v38, %v1326_v38  ;;  %v1737_v40 = vpop.f32.mrb[21].mxu0 }
 0xb2b   : > { %v1329_v42 = vpop.f32.mrb[22].mxu0 }
 0xb2c   : > { %v1738_v1 = vpop.f32.mrb[23].mxu0  ;;  %1744 = vmatmul.mubr.msk.bf16.vlgmr.msra.gmra.mrb[32].mxu1 %vm713_vm1, %v1332_v39 }
 0xbff   : > { %v1386_v43 = vpop.f32.mrb[32].mxu1 }
 0xc00   : > { %v1392_v46 = vadd.f32 %v1386_v43, %v1221_v29  ;;  %v1745_v47 = vpop.f32.mrb[33].mxu1 }
 0xc01   : > { %v1389_v48 = vpop.f32.mrb[34].mxu1 }
 0xc02   : > { %v1400_v50 = vadd.f32 %v1547_v44, %v1392_v46  ;;  %v1746_v51 = vpop.f32.mrb[35].mxu1 }
 0xc04   : > { %1401 = vst [vmem:[%s384_s19] sm:$0xff] %v1400_v50 }
 0xc05 PF: > { %s19_s30 = sadd.s32 1, %s1814_s30  }
 0xc06   : > { %p16_p4 = scmp.ge.s32.totalorder %s19_s30, 4  }
 0xc08   :  { %18 = sbr.rel (!%p16_p4) target bundleno = 1 (0x1), region = 95 }

</bundles_post_ra>
